<compile_context>
chip_gen: v6e
topology: v6e:2x2x1
jax: 0.10.0
libtpu: 0.0.40
codegen_flags: <defaults>
</compile_context>

<pallas_src>
import functools

import numpy as np
import jax
import jax.numpy as jnp
from jax import lax
from jax.experimental import pallas as pl
from jax.experimental.pallas import tpu as pltpu


# ---------------------------------------------------------------------------
# Kernel 1: ReLU -> conv(1,7) -> conv(7,1), plus per-sample BN partial stats.
# ---------------------------------------------------------------------------
def _conv_stats_kernel(x_ref, w1_ref, w2_ref, y_ref, stats_ref,
                       xpad_ref, mid_ref, *, stride):
    # x_ref:     (1, H, W, C)        one batch element, compute dtype
    # w1_ref:    (7*C, C)            (1,7)-conv taps, rows ordered (k, c_in)
    # w2_ref:    (7*C, C)            (7,1)-conv taps, rows ordered (k, c_in)
    # y_ref:     (1, Hout, Wout, C)  pre-BN conv output (f32)
    # stats_ref: (1, 2, C)           per-sample [sum, sum_of_squares] (f32)
    # xpad_ref:  (H, W+6, C)         scratch: ReLU'd input, W-padded by 3
    # mid_ref:   (H+6, Wout, C)      scratch: conv1 output, H-padded by 3
    _, H, W, C = x_ref.shape
    _, Hout, Wout, _ = y_ref.shape
    cdt = xpad_ref.dtype

    # ---- ReLU + in-kernel W padding.  Halo columns are re-zeroed every grid
    #      step (cheap), so this is safe even when the batch axis is sharded
    #      across TensorCores ("parallel") and each core has its own scratch.
    xpad_ref[:, 3:W + 3, :] = jnp.maximum(x_ref[0], 0.0).astype(cdt)
    xpad_ref[:, 0:3, :] = jnp.zeros((H, 3, C), cdt)
    xpad_ref[:, W + 3:W + 6, :] = jnp.zeros((H, 3, C), cdt)

    # ---- Conv (1,7), stride (1, s): fold the 7 taps into one matmul with a
    #      7*C contraction dim (one MXU push, no per-tap accumulator adds).
    xp = xpad_ref[...]                                   # (H, W+6, C)
    w_span = (Wout - 1) * stride + 1
    taps1 = [lax.slice(xp, (0, k, 0), (H, k + w_span, C), (1, stride, 1))
             for k in range(7)]                          # 7 x (H, Wout, C)
    slab1 = jnp.concatenate(taps1, axis=-1).reshape(H * Wout, 7 * C)
    y1 = jnp.dot(slab1, w1_ref[...], preferred_element_type=jnp.float32)

    # ---- In-kernel H padding for the (7,1) conv (scratch, not concat+zeros).
    mid_ref[3:H + 3, :, :] = y1.reshape(H, Wout, C).astype(cdt)
    mid_ref[0:3, :, :] = jnp.zeros((3, Wout, C), cdt)
    mid_ref[H + 3:H + 6, :, :] = jnp.zeros((3, Wout, C), cdt)

    # ---- Conv (7,1), stride (s, 1): again one 7*C-contraction matmul.
    md = mid_ref[...]                                    # (H+6, Wout, C)
    h_span = (Hout - 1) * stride + 1
    taps2 = [lax.slice(md, (k, 0, 0), (k + h_span, Wout, C), (stride, 1, 1))
             for k in range(7)]                          # 7 x (Hout, Wout, C)
    slab2 = jnp.concatenate(taps2, axis=-1).reshape(Hout * Wout, 7 * C)
    y2 = jnp.dot(slab2, w2_ref[...], preferred_element_type=jnp.float32)

    # ---- Outputs: pre-BN activations + fused partial BN statistics (no
    #      separate full pass over y for the stats).
    y_ref[...] = y2.reshape(1, Hout, Wout, C).astype(y_ref.dtype)
    s1 = jnp.sum(y2, axis=0, keepdims=True)              # (1, C)
    s2 = jnp.sum(y2 * y2, axis=0, keepdims=True)         # (1, C)
    stats_ref[...] = jnp.concatenate([s1, s2], axis=0).reshape(1, 2, C)


# ---------------------------------------------------------------------------
# Kernel 2: reduce partial stats to global mean/var, apply BN scale/shift.
# ---------------------------------------------------------------------------
def _bn_norm_kernel(stats_ref, gamma_ref, beta_ref, y_ref, o_ref, *, count):
    # stats_ref: (N, 2, C)  all per-sample partial stats (tiny, kept resident)
    # gamma_ref, beta_ref: (1, C)
    # y_ref, o_ref: (1, Hout, Wout, C)
    C = o_ref.shape[-1]
    st = stats_ref[...]                                          # (N, 2, C)
    total = jnp.sum(st[:, 0, :], axis=0, keepdims=True)          # (1, C)
    total_sq = jnp.sum(st[:, 1, :], axis=0, keepdims=True)       # (1, C)
    inv_count = 1.0 / count
    mean = total * inv_count
    var = jnp.maximum(total_sq * inv_count - mean * mean, 0.0)   # biased var
    inv = lax.rsqrt(var + 1e-5)
    scale = gamma_ref[...] * inv                                 # (1, C)
    shift = beta_ref[...] - mean * scale                         # (1, C)
    o_ref[...] = (y_ref[...] * scale.reshape(1, 1, 1, C)
                  + shift.reshape(1, 1, 1, C)).astype(o_ref.dtype)


# ---------------------------------------------------------------------------
# Wrapper
# ---------------------------------------------------------------------------
def conv7x1_conv1x7_bn(x_nchw, w1_oihw, w2_oihw, gamma, beta, stride,
                       compute_dtype=jnp.float32):
    """x_nchw: (N, C, H, W) float32.  Returns (N, C, Hout, Wout) float32."""
    N, C, H, W = x_nchw.shape
    Wout = (W + 2 * 3 - 7) // stride + 1
    Hout = (H + 2 * 3 - 7) // stride + 1

    # NCHW -> NHWC (channels on the lane axis); matmul operands in compute dtype.
    x_nhwc = jnp.transpose(x_nchw, (0, 2, 3, 1)).astype(compute_dtype)

    # (O, I, 1, 7)/(O, I, 7, 1) -> (7, I, O) -> (7*I, O): one fused contraction.
    w1_flat = jnp.transpose(w1_oihw[:, :, 0, :], (2, 1, 0)).reshape(7 * C, C)
    w2_flat = jnp.transpose(w2_oihw[:, :, :, 0], (2, 1, 0)).reshape(7 * C, C)
    w1_flat = w1_flat.astype(compute_dtype)
    w2_flat = w2_flat.astype(compute_dtype)
    gamma2 = gamma.reshape(1, C).astype(jnp.float32)
    beta2 = beta.reshape(1, C).astype(jnp.float32)

    itemsize = jnp.dtype(compute_dtype).itemsize
    conv_cost = pl.CostEstimate(
        flops=2 * N * (H * Wout + Hout * Wout) * 7 * C * C,
        transcendentals=0,
        bytes_accessed=(N * H * W * C + 2 * 7 * C * C) * itemsize
                       + (N * Hout * Wout * C + N * 2 * C) * 4)

    y, stats = pl.pallas_call(
        functools.partial(_conv_stats_kernel, stride=stride),
        out_shape=(jax.ShapeDtypeStruct((N, Hout, Wout, C), jnp.float32),
                   jax.ShapeDtypeStruct((N, 2, C), jnp.float32)),
        grid_spec=pltpu.PrefetchScalarGridSpec(
            num_scalar_prefetch=0,
            grid=(N,),
            in_specs=[pl.BlockSpec((1, H, W, C), lambda n: (n, 0, 0, 0)),
                      pl.BlockSpec((7 * C, C), lambda n: (0, 0)),
                      pl.BlockSpec((7 * C, C), lambda n: (0, 0))],
            out_specs=(pl.BlockSpec((1, Hout, Wout, C), lambda n: (n, 0, 0, 0)),
                       pl.BlockSpec((1, 2, C), lambda n: (n, 0, 0))),
            scratch_shapes=[pltpu.VMEM((H, W + 6, C), compute_dtype),
                            pltpu.VMEM((H + 6, Wout, C), compute_dtype)]),
        compiler_params=pltpu.CompilerParams(
            dimension_semantics=("parallel",)),
        cost_estimate=conv_cost,
    )(x_nhwc, w1_flat, w2_flat)

    bn_cost = pl.CostEstimate(
        flops=4 * N * Hout * Wout * C,
        transcendentals=C,
        bytes_accessed=(2 * N * Hout * Wout * C + N * 2 * C + 2 * C) * 4)

    count = float(N * Hout * Wout)
    out_nhwc = pl.pallas_call(
        functools.partial(_bn_norm_kernel, count=count),
        out_shape=jax.ShapeDtypeStruct((N, Hout, Wout, C), jnp.float32),
        grid_spec=pltpu.PrefetchScalarGridSpec(
            num_scalar_prefetch=0,
            grid=(N,),
            in_specs=[pl.BlockSpec((N, 2, C), lambda n: (0, 0, 0)),
                      pl.BlockSpec((1, C), lambda n: (0, 0)),
                      pl.BlockSpec((1, C), lambda n: (0, 0)),
                      pl.BlockSpec((1, Hout, Wout, C), lambda n: (n, 0, 0, 0))],
            out_specs=pl.BlockSpec((1, Hout, Wout, C), lambda n: (n, 0, 0, 0))),
        compiler_params=pltpu.CompilerParams(
            dimension_semantics=("parallel",)),
        cost_estimate=bn_cost,
    )(stats, gamma2, beta2, y)

    # NHWC -> NCHW
    return jnp.transpose(out_nhwc, (0, 3, 1, 2))


# ---------------------------------------------------------------------------
# Pure-JAX reference of the PyTorch forward (f32, NCHW)
# ---------------------------------------------------------------------------
def _reference(x_nchw, w1, w2, gamma, beta, stride):
    x = jnp.maximum(x_nchw, 0.0)
    y = lax.conv_general_dilated(
        x, w1, window_strides=(1, stride), padding=((0, 0), (3, 3)),
        dimension_numbers=("NCHW", "OIHW", "NCHW"))
    y = lax.conv_general_dilated(
        y, w2, window_strides=(stride, 1), padding=((3, 3), (0, 0)),
        dimension_numbers=("NCHW", "OIHW", "NCHW"))
    mean = jnp.mean(y, axis=(0, 2, 3), keepdims=True)
    var = jnp.mean((y - mean) ** 2, axis=(0, 2, 3), keepdims=True)
    yn = (y - mean) / jnp.sqrt(var + 1e-5)
    return yn * gamma.reshape(1, -1, 1, 1) + beta.reshape(1, -1, 1, 1)


if __name__ == "__main__":
    N, C, H, W = 2, 4, 16, 16
    stride = 1

    key = jax.random.PRNGKey(0)
    kx, k1, k2, kg, kb = jax.random.split(key, 5)

    x = jax.random.normal(kx, (N, C, H, W), jnp.float32)
    w1 = jax.random.normal(k1, (C, C, 1, 7), jnp.float32) * 0.1   # (1,7) conv weight
    w2 = jax.random.normal(k2, (C, C, 7, 1), jnp.float32) * 0.1   # (7,1) conv weight
    gamma = 1.0 + 0.1 * jax.random.normal(kg, (C,), jnp.float32)  # BN affine scale
    beta = 0.1 * jax.random.normal(kb, (C,), jnp.float32)         # BN affine shift

    ref = jax.block_until_ready(_reference(x, w1, w2, gamma, beta, stride))

    # f32 matmul path: strict check against the PyTorch-equivalent f32 reference.
    out_f32 = jax.block_until_ready(
        conv7x1_conv1x7_bn(x, w1, w2, gamma, beta, stride,
                           compute_dtype=jnp.float32))
    assert out_f32.shape == ref.shape, (out_f32.shape, ref.shape)
    err_f32 = float(np.max(np.abs(np.asarray(out_f32) - np.asarray(ref))))
    assert np.allclose(np.asarray(out_f32), np.asarray(ref),
                       atol=2e-4, rtol=2e-4), f"f32 max abs diff = {err_f32}"

    # bf16 matmul operands with f32 accumulation (perf path): looser tolerance.
    out_bf16 = jax.block_until_ready(
        conv7x1_conv1x7_bn(x, w1, w2, gamma, beta, stride,
                           compute_dtype=jnp.bfloat16))
    err_bf16 = float(np.max(np.abs(np.asarray(out_bf16) - np.asarray(ref))))
    assert err_bf16 < 1e-1, f"bf16 max abs diff = {err_bf16}"

    print("KERNEL_OK")
</pallas_src>

<mosaic_0001>
module attributes {stable_mosaic.version = 11 : i64} {
  func.func @_conv_stats_kernel(%arg0: i32, %arg1: memref<1x16x16x4xf32, #tpu.memory_space<vmem>>, %arg2: memref<28x4xf32, #tpu.memory_space<vmem>>, %arg3: memref<28x4xf32, #tpu.memory_space<vmem>>, %arg4: memref<1x16x16x4xf32, #tpu.memory_space<vmem>>, %arg5: memref<1x2x4xf32, #tpu.memory_space<vmem>>, %arg6: memref<16x22x4xf32, #tpu.memory_space<vmem>>, %arg7: memref<22x16x4xf32, #tpu.memory_space<vmem>>) attributes {dimension_semantics = [#tpu.dimension_semantics<parallel>], iteration_bounds = array<i64: 2>, scalar_prefetch = 0 : i64, scratch_operands = 2 : i64, tpu.core_type = #tpu.core_type<tc>, window_params = [{transform_indices = @transform_0, window_bounds = array<i64: 1, 16, 16, 4>}, {pipeline_mode = #tpu.pipeline_mode<synchronous>, transform_indices = @transform_1, window_bounds = array<i64: 28, 4>}, {pipeline_mode = #tpu.pipeline_mode<synchronous>, transform_indices = @transform_2, window_bounds = array<i64: 28, 4>}, {transform_indices = @transform_3, window_bounds = array<i64: 1, 16, 16, 4>}, {transform_indices = @transform_4, window_bounds = array<i64: 1, 2, 4>}]} {
    %c0 = arith.constant 0 : index
    %c0_0 = arith.constant 0 : index
    %c0_1 = arith.constant 0 : index
    %c0_2 = arith.constant 0 : index
    %0 = vector.load %arg1[%c0, %c0_0, %c0_1, %c0_2] : memref<1x16x16x4xf32, #tpu.memory_space<vmem>>, vector<1x16x16x4xf32>
    %1 = vector.shape_cast %0 : vector<1x16x16x4xf32> to vector<16x16x4xf32>
    %cst = arith.constant 0.000000e+00 : f32
    %2 = vector.broadcast %cst : f32 to vector<16x16x4xf32>
    %3 = arith.maximumf %1, %2 : vector<16x16x4xf32>
    %c0_3 = arith.constant 0 : index
    %c3 = arith.constant 3 : index
    %c0_4 = arith.constant 0 : index
    %4 = vector.load %arg6[%c0_3, %c3, %c0_4] : memref<16x22x4xf32, #tpu.memory_space<vmem>>, vector<16x16x4xf32>
    tpu.vector_store %arg6[%c0_3, %c3, %c0_4], %3 {strides = array<i32>} : memref<16x22x4xf32, #tpu.memory_space<vmem>>, vector<16x16x4xf32>,
    %cst_5 = arith.constant 0.000000e+00 : f32
    %5 = vector.broadcast %cst_5 : f32 to vector<16x3x4xf32>
    %c0_6 = arith.constant 0 : index
    %c0_7 = arith.constant 0 : index
    %c0_8 = arith.constant 0 : index
    %6 = vector.load %arg6[%c0_6, %c0_7, %c0_8] : memref<16x22x4xf32, #tpu.memory_space<vmem>>, vector<16x3x4xf32>
    tpu.vector_store %arg6[%c0_6, %c0_7, %c0_8], %5 {strides = array<i32>} : memref<16x22x4xf32, #tpu.memory_space<vmem>>, vector<16x3x4xf32>,
    %cst_9 = arith.constant 0.000000e+00 : f32
    %7 = vector.broadcast %cst_9 : f32 to vector<16x3x4xf32>
    %c0_10 = arith.constant 0 : index
    %c19 = arith.constant 19 : index
    %c0_11 = arith.constant 0 : index
    %8 = vector.load %arg6[%c0_10, %c19, %c0_11] : memref<16x22x4xf32, #tpu.memory_space<vmem>>, vector<16x3x4xf32>
    tpu.vector_store %arg6[%c0_10, %c19, %c0_11], %7 {strides = array<i32>} : memref<16x22x4xf32, #tpu.memory_space<vmem>>, vector<16x3x4xf32>,
    %c0_12 = arith.constant 0 : index
    %c0_13 = arith.constant 0 : index
    %c0_14 = arith.constant 0 : index
    %9 = vector.load %arg6[%c0_12, %c0_13, %c0_14] : memref<16x22x4xf32, #tpu.memory_space<vmem>>, vector<16x22x4xf32>
    %10 = vector.extract_strided_slice %9 {offsets = [0, 0, 0], sizes = [16, 16, 4], strides = [1, 1, 1]} : vector<16x22x4xf32> to vector<16x16x4xf32>
    %11 = vector.extract_strided_slice %9 {offsets = [0, 1, 0], sizes = [16, 16, 4], strides = [1, 1, 1]} : vector<16x22x4xf32> to vector<16x16x4xf32>
    %12 = vector.extract_strided_slice %9 {offsets = [0, 2, 0], sizes = [16, 16, 4], strides = [1, 1, 1]} : vector<16x22x4xf32> to vector<16x16x4xf32>
    %13 = vector.extract_strided_slice %9 {offsets = [0, 3, 0], sizes = [16, 16, 4], strides = [1, 1, 1]} : vector<16x22x4xf32> to vector<16x16x4xf32>
    %14 = vector.extract_strided_slice %9 {offsets = [0, 4, 0], sizes = [16, 16, 4], strides = [1, 1, 1]} : vector<16x22x4xf32> to vector<16x16x4xf32>
    %15 = vector.extract_strided_slice %9 {offsets = [0, 5, 0], sizes = [16, 16, 4], strides = [1, 1, 1]} : vector<16x22x4xf32> to vector<16x16x4xf32>
    %16 = vector.extract_strided_slice %9 {offsets = [0, 6, 0], sizes = [16, 16, 4], strides = [1, 1, 1]} : vector<16x22x4xf32> to vector<16x16x4xf32>
    %17 = tpu.concatenate %10, %11, %12, %13, %14, %15, %16 in 2 : vector<16x16x4xf32>, vector<16x16x4xf32>, vector<16x16x4xf32>, vector<16x16x4xf32>, vector<16x16x4xf32>, vector<16x16x4xf32>, vector<16x16x4xf32> -> vector<16x16x28xf32>
    %18 = vector.shape_cast %17 : vector<16x16x28xf32> to vector<256x28xf32>
    %c0_15 = arith.constant 0 : index
    %c0_16 = arith.constant 0 : index
    %19 = vector.load %arg2[%c0_15, %c0_16] : memref<28x4xf32, #tpu.memory_space<vmem>>, vector<28x4xf32>
    %cst_17 = arith.constant dense<0.000000e+00> : vector<256x4xf32>
    %20 = tpu.matmul %18, %19, %cst_17 {dimension_numbers = #tpu.dot_dimension_numbers<[1], [0], [0], [1], [0, 0, 1, 1], [], []>} : vector<256x28xf32>, vector<28x4xf32>, vector<256x4xf32> -> vector<256x4xf32>
    %21 = vector.shape_cast %20 : vector<256x4xf32> to vector<16x16x4xf32>
    %c3_18 = arith.constant 3 : index
    %c0_19 = arith.constant 0 : index
    %c0_20 = arith.constant 0 : index
    %22 = vector.load %arg7[%c3_18, %c0_19, %c0_20] : memref<22x16x4xf32, #tpu.memory_space<vmem>>, vector<16x16x4xf32>
    tpu.vector_store %arg7[%c3_18, %c0_19, %c0_20], %21 {strides = array<i32>} : memref<22x16x4xf32, #tpu.memory_space<vmem>>, vector<16x16x4xf32>,
    %cst_21 = arith.constant 0.000000e+00 : f32
    %23 = vector.broadcast %cst_21 : f32 to vector<3x16x4xf32>
    %c0_22 = arith.constant 0 : index
    %c0_23 = arith.constant 0 : index
    %c0_24 = arith.constant 0 : index
    %24 = vector.load %arg7[%c0_22, %c0_23, %c0_24] : memref<22x16x4xf32, #tpu.memory_space<vmem>>, vector<3x16x4xf32>
    tpu.vector_store %arg7[%c0_22, %c0_23, %c0_24], %23 {strides = array<i32>} : memref<22x16x4xf32, #tpu.memory_space<vmem>>, vector<3x16x4xf32>,
    %cst_25 = arith.constant 0.000000e+00 : f32
    %25 = vector.broadcast %cst_25 : f32 to vector<3x16x4xf32>
    %c19_26 = arith.constant 19 : index
    %c0_27 = arith.constant 0 : index
    %c0_28 = arith.constant 0 : index
    %26 = vector.load %arg7[%c19_26, %c0_27, %c0_28] : memref<22x16x4xf32, #tpu.memory_space<vmem>>, vector<3x16x4xf32>
    tpu.vector_store %arg7[%c19_26, %c0_27, %c0_28], %25 {strides = array<i32>} : memref<22x16x4xf32, #tpu.memory_space<vmem>>, vector<3x16x4xf32>,
    %c0_29 = arith.constant 0 : index
    %c0_30 = arith.constant 0 : index
    %c0_31 = arith.constant 0 : index
    %27 = vector.load %arg7[%c0_29, %c0_30, %c0_31] : memref<22x16x4xf32, #tpu.memory_space<vmem>>, vector<22x16x4xf32>
    %28 = vector.extract_strided_slice %27 {offsets = [0, 0, 0], sizes = [16, 16, 4], strides = [1, 1, 1]} : vector<22x16x4xf32> to vector<16x16x4xf32>
    %29 = vector.extract_strided_slice %27 {offsets = [1, 0, 0], sizes = [16, 16, 4], strides = [1, 1, 1]} : vector<22x16x4xf32> to vector<16x16x4xf32>
    %30 = vector.extract_strided_slice %27 {offsets = [2, 0, 0], sizes = [16, 16, 4], strides = [1, 1, 1]} : vector<22x16x4xf32> to vector<16x16x4xf32>
    %31 = vector.extract_strided_slice %27 {offsets = [3, 0, 0], sizes = [16, 16, 4], strides = [1, 1, 1]} : vector<22x16x4xf32> to vector<16x16x4xf32>
    %32 = vector.extract_strided_slice %27 {offsets = [4, 0, 0], sizes = [16, 16, 4], strides = [1, 1, 1]} : vector<22x16x4xf32> to vector<16x16x4xf32>
    %33 = vector.extract_strided_slice %27 {offsets = [5, 0, 0], sizes = [16, 16, 4], strides = [1, 1, 1]} : vector<22x16x4xf32> to vector<16x16x4xf32>
    %34 = vector.extract_strided_slice %27 {offsets = [6, 0, 0], sizes = [16, 16, 4], strides = [1, 1, 1]} : vector<22x16x4xf32> to vector<16x16x4xf32>
    %35 = tpu.concatenate %28, %29, %30, %31, %32, %33, %34 in 2 : vector<16x16x4xf32>, vector<16x16x4xf32>, vector<16x16x4xf32>, vector<16x16x4xf32>, vector<16x16x4xf32>, vector<16x16x4xf32>, vector<16x16x4xf32> -> vector<16x16x28xf32>
    %36 = vector.shape_cast %35 : vector<16x16x28xf32> to vector<256x28xf32>
    %c0_32 = arith.constant 0 : index
    %c0_33 = arith.constant 0 : index
    %37 = vector.load %arg3[%c0_32, %c0_33] : memref<28x4xf32, #tpu.memory_space<vmem>>, vector<28x4xf32>
    %cst_34 = arith.constant dense<0.000000e+00> : vector<256x4xf32>
    %38 = tpu.matmul %36, %37, %cst_34 {dimension_numbers = #tpu.dot_dimension_numbers<[1], [0], [0], [1], [0, 0, 1, 1], [], []>} : vector<256x28xf32>, vector<28x4xf32>, vector<256x4xf32> -> vector<256x4xf32>
    %39 = vector.shape_cast %38 : vector<256x4xf32> to vector<1x16x16x4xf32>
    %c0_35 = arith.constant 0 : index
    %c0_36 = arith.constant 0 : index
    %c0_37 = arith.constant 0 : index
    %c0_38 = arith.constant 0 : index
    %40 = vector.load %arg4[%c0_35, %c0_36, %c0_37, %c0_38] : memref<1x16x16x4xf32, #tpu.memory_space<vmem>>, vector<1x16x16x4xf32>
    tpu.vector_store %arg4[%c0_35, %c0_36, %c0_37, %c0_38], %39 {strides = array<i32>} : memref<1x16x16x4xf32, #tpu.memory_space<vmem>>, vector<1x16x16x4xf32>,
    %cst_39 = arith.constant dense<0.000000e+00> : vector<4xf32>
    %41 = vector.multi_reduction <add>, %38, %cst_39 [0] : vector<256x4xf32> to vector<4xf32>
    %42 = vector.shape_cast %41 : vector<4xf32> to vector<1x4xf32>
    %43 = arith.mulf %38, %38 : vector<256x4xf32>
    %cst_40 = arith.constant dense<0.000000e+00> : vector<4xf32>
    %44 = vector.multi_reduction <add>, %43, %cst_40 [0] : vector<256x4xf32> to vector<4xf32>
    %45 = vector.shape_cast %44 : vector<4xf32> to vector<1x4xf32>
    %46 = tpu.concatenate %42, %45 in 0 : vector<1x4xf32>, vector<1x4xf32> -> vector<2x4xf32>
    %47 = vector.shape_cast %46 : vector<2x4xf32> to vector<1x2x4xf32>
    %c0_41 = arith.constant 0 : index
    %c0_42 = arith.constant 0 : index
    %c0_43 = arith.constant 0 : index
    %48 = vector.load %arg5[%c0_41, %c0_42, %c0_43] : memref<1x2x4xf32, #tpu.memory_space<vmem>>, vector<1x2x4xf32>
    tpu.vector_store %arg5[%c0_41, %c0_42, %c0_43], %47 {strides = array<i32>} : memref<1x2x4xf32, #tpu.memory_space<vmem>>, vector<1x2x4xf32>,
    return
  }
  func.func @transform_0(%arg0: i32) -> (i32, i32, i32, i32) {
    %c0_i32 = arith.constant 0 : i32
    %c0_i32_0 = arith.constant 0 : i32
    %c0_i32_1 = arith.constant 0 : i32
    %c0_i32_2 = arith.constant 0 : i32
    return %arg0, %c0_i32, %c0_i32_0, %c0_i32_1 : i32, i32, i32, i32
  }
  func.func @transform_1(%arg0: i32) -> (i32, i32) {
    %c0_i32 = arith.constant 0 : i32
    %c0_i32_0 = arith.constant 0 : i32
    %c0_i32_1 = arith.constant 0 : i32
    return %c0_i32, %c0_i32_0 : i32, i32
  }
  func.func @transform_2(%arg0: i32) -> (i32, i32) {
    %c0_i32 = arith.constant 0 : i32
    %c0_i32_0 = arith.constant 0 : i32
    %c0_i32_1 = arith.constant 0 : i32
    return %c0_i32, %c0_i32_0 : i32, i32
  }
  func.func @transform_3(%arg0: i32) -> (i32, i32, i32, i32) {
    %c0_i32 = arith.constant 0 : i32
    %c0_i32_0 = arith.constant 0 : i32
    %c0_i32_1 = arith.constant 0 : i32
    %c0_i32_2 = arith.constant 0 : i32
    return %arg0, %c0_i32, %c0_i32_0, %c0_i32_1 : i32, i32, i32, i32
  }
  func.func @transform_4(%arg0: i32) -> (i32, i32, i32) {
    %c0_i32 = arith.constant 0 : i32
    %c0_i32_0 = arith.constant 0 : i32
    %c0_i32_1 = arith.constant 0 : i32
    return %arg0, %c0_i32, %c0_i32_0 : i32, i32, i32
  }
}

</mosaic_0001>

<bundles_post_ra>
// kernel: tpu_custom_call.1
= control target key start
LH: loop header
LB: loop body
LE: loop exit
PB: predicated region body
PF: predicated region fallthrough
CT: control target
= control target key end

     0   :  { %10 = vsyncpa [#allocation5], 0  ;;  %s6471_s0 = inlined_call_operand.vmem [shape: f32[2,16,16,4], index: 0, kind: input, shape index: {}]   ;;  %s6472_s1 = inlined_call_operand.vmem [shape: f32[28,4], index: 1, kind: input, shape index: {}]   ;;  %s6473_s2 = inlined_call_operand.vmem [shape: f32[28,4], index: 2, kind: input, shape index: {}]   ;;  %s6474_s3 = inlined_call_operand.vmem [shape: f32[2,16,16,4], index: 3, kind: output, shape index: {0}]   ;;  %s6475_s4 = inlined_call_operand.hbm [shape: f32[2,2,4], index: 4, kind: output, shape index: {1}]  }
   0x1   :  { %12 = vsyncpa [#allocation5 + $0x1], 0  ;;  %s4013_s15 = smov 0   ;;  %s4015_s16 = smov 0  }
   0x2   :  { %s4017_s17 = smov 0   ;;  %s4019_s18 = smov 0  }
   0x3 LB: > { %s4034_s19 = sadd.s32 4294967295, %s3978_s18   ;;  %s3563_s20 = sadd.s32 4294967294, %s3978_s18   ;;  %s3978_s18 = sphi %s4019_s18, %s6563_s18   ;;  %s3974_s17 = sphi %s4017_s17, %s6562_s17   ;;  %s3970_s16 = sphi %s4015_s16, %s6561_s16   ;;  %s3966_s15 = sphi %s4013_s15, %s6560_s15  }
   0x4   : > { %s4038_s21 = sadd.s32 1, %s3978_s18   ;;  %s119_s22 = sadd.s32 1, %s3974_s17 }
   0x5   : > { %s116_s23 = ssub.s32 %s3978_s18, %s4038_s21  ;;  %p129_p0 = scmp.ne.s32.totalorder %s3974_s17, %s3970_s16 }
   0x6   : > { %p117_p1 = scmp.eq.s32.totalorder %s116_s23, 0  ;;  %p130_p2 = scmp.eq.s32.totalorder %s4034_s19, 1 }
   0x7   : > { %p135_p3 = scmp.ne.s32.totalorder %s3970_s16, %s3966_s15  ;;  %p136_p4 = scmp.eq.s32.totalorder %s3563_s20, 1 }
   0x8   : > { %s4049_s24 = scalar_select %p117_p1, %s3974_s17, %s119_s22  }
   0x9   : > { %p4051_p5 = por %p130_p2, %p129_p0  ;;  %p4055_p6 = por %p136_p4, %p135_p3 }
   0xa   : > { %p3566_p7 = scmp.ge.s32.totalorder %s3978_s18, 1  ;;  %p168_p8 = scmp.lt.s32.totalorder %s3978_s18, 3 }
   0xc   : > { %p169_p9 = pnand %p3566_p7, %p168_p8 }
   0xe   : > { %172 = sbr.rel (%p169_p9) target bundleno = 1330 (0x532), region = 32 }
  0x13   : > { %p199_p10 = scmp.lt.s32.totalorder %s4034_s19, 1  ;;  %vm273_vm0 = vcmask 31744   ;;  %vm306_vm1 = vcmask 26624   ;;  %v3980_v0 = vmov 0.0   ;;  %vm435_vm2 = vcmask 1046528   ;;  %s3981_s6 = smov 4  }
  0x14   : > { %308 = vst.msk [vmem:[#allocation2 + $0x18] sm:$0x7] %vm306_vm1, %v3980_v0  ;;  %307 = vst.msk [vmem:[#allocation2] sm:$0x7] %vm306_vm1, %v3980_v0  ;;  %vm612_vm3 = vcmask 1045504   ;;  %s3982_s7 = smov 8  }
  0x15   : > { %309 = vst.msk [vmem:[#allocation2 + $0x30] sm:$0x7] %vm306_vm1, %v3980_v0  ;;  %310 = vst.msk [vmem:[#allocation2 + $0x48] sm:$0x7] %vm306_vm1, %v3980_v0  ;;  %s4109_s27 = scalar_select %p199_p10, %s4034_s19, 1  ;;  %vm789_vm4 = vcmask 1044480  }
  0x16   : > { %311 = vst.msk [vmem:[#allocation2 + $0x60] sm:$0x7] %vm306_vm1, %v3980_v0  ;;  %312 = vst.msk [vmem:[#allocation2 + $0x78] sm:$0x7] %vm306_vm1, %v3980_v0  ;;  %s3983_s8 = smov 12   ;;  %vm966_vm5 = vcmask 1043456  }
  0x17   : > { %313 = vst.msk [vmem:[#allocation2 + $0x90] sm:$0x7] %vm306_vm1, %v3980_v0  ;;  %314 = vst.msk [vmem:[#allocation2 + $0xa8] sm:$0x7] %vm306_vm1, %v3980_v0  ;;  %s3642_s28 = sshll.u32 %s4109_s27, 8  ;;  %vm1143_vm6 = vcmask 1042432  }
  0x18   : > { %315 = vst.msk [vmem:[#allocation2 + $0xc0] sm:$0x7] %vm306_vm1, %v3980_v0  ;;  %316 = vst.msk [vmem:[#allocation2 + $0xd8] sm:$0x7] %vm306_vm1, %v3980_v0  ;;  %s4117_s5 = scalar_lea.vmem %s6471_s0, %s3642_s28  ;;  %s3984_s23 = smov 16   ;;  %vm1320_vm7 = vcmask 1041408  }
  0x19   : > { %317 = vst.msk [vmem:[#allocation2 + $0xf0] sm:$0x7] %vm306_vm1, %v3980_v0  ;;  %318 = vst.msk [vmem:[#allocation2 + $0x108] sm:$0x7] %vm306_vm1, %v3980_v0  ;;  %v211_v1 = vld [vmem:[%s4117_s5 + $0x10] sm:$0xff]  ;;  %v212_v2 = vld [vmem:[%s4117_s5 + $0x18] sm:$0xff] }
  0x1a   : > { %319 = vst.msk [vmem:[#allocation2 + $0x120] sm:$0x7] %vm306_vm1, %v3980_v0  ;;  %320 = vst.msk [vmem:[#allocation2 + $0x138] sm:$0x7] %vm306_vm1, %v3980_v0  ;;  %v209_v3 = vld [vmem:[%s4117_s5] sm:$0xff]  ;;  %v243_v4 = vmax.f32 %v211_v1, 0.0 }
  0x1b   : > { %321 = vst.msk [vmem:[#allocation2 + $0x150] sm:$0x7] %vm306_vm1, %v3980_v0  ;;  %322 = vst.msk [vmem:[#allocation2 + $0x168] sm:$0x7] %vm306_vm1, %v3980_v0  ;;  %v244_v5 = vmax.f32 %v212_v2, 0.0  ;;  %v210_v6 = vld [vmem:[%s4117_s5 + $0x8] sm:$0xff] }
  0x1c   : > { %323 = vst.msk [vmem:[#allocation2 + $0x13] sm:$0x7] %vm306_vm1, %v3980_v0  ;;  %324 = vst.msk [vmem:[#allocation2 + $0x2b] sm:$0x7] %vm306_vm1, %v3980_v0  ;;  %v241_v7 = vmax.f32 %v209_v3, 0.0  ;;  %v213_v8 = vld [vmem:[%s4117_s5 + $0x20] sm:$0xff] }
  0x1d   : > { %325 = vst.msk [vmem:[#allocation2 + $0x43] sm:$0x7] %vm306_vm1, %v3980_v0  ;;  %326 = vst.msk [vmem:[#allocation2 + $0x5b] sm:$0x7] %vm306_vm1, %v3980_v0  ;;  %v214_v9 = vld [vmem:[%s4117_s5 + $0x28] sm:$0xff]  ;;  %v242_v10 = vmax.f32 %v210_v6, 0.0 }
  0x1e   : > { %327 = vst.msk [vmem:[#allocation2 + $0x73] sm:$0x7] %vm306_vm1, %v3980_v0  ;;  %328 = vst.msk [vmem:[#allocation2 + $0x8b] sm:$0x7] %vm306_vm1, %v3980_v0  ;;  %v245_v11 = vmax.f32 %v213_v8, 0.0  ;;  %v246_v12 = vmax.f32 %v214_v9, 0.0 }
  0x1f   : > { %329 = vst.msk [vmem:[#allocation2 + $0xa3] sm:$0x7] %vm306_vm1, %v3980_v0  ;;  %330 = vst.msk [vmem:[#allocation2 + $0xbb] sm:$0x7] %vm306_vm1, %v3980_v0  ;;  %v215_v13 = vld [vmem:[%s4117_s5 + $0x30] sm:$0xff]  ;;  %v216_v14 = vld [vmem:[%s4117_s5 + $0x38] sm:$0xff] }
  0x20   : > { %331 = vst.msk [vmem:[#allocation2 + $0xd3] sm:$0x7] %vm306_vm1, %v3980_v0  ;;  %332 = vst.msk [vmem:[#allocation2 + $0xeb] sm:$0x7] %vm306_vm1, %v3980_v0  ;;  %v217_v15 = vld [vmem:[%s4117_s5 + $0x40] sm:$0xff]  ;;  %v247_v16 = vmax.f32 %v215_v13, 0.0 }
  0x21   : > { %333 = vst.msk [vmem:[#allocation2 + $0x103] sm:$0x7] %vm306_vm1, %v3980_v0  ;;  %334 = vst.msk [vmem:[#allocation2 + $0x11b] sm:$0x7] %vm306_vm1, %v3980_v0  ;;  %v248_v17 = vmax.f32 %v216_v14, 0.0  ;;  %v218_v18 = vld [vmem:[%s4117_s5 + $0x48] sm:$0xff] }
  0x22   : > { %335 = vst.msk [vmem:[#allocation2 + $0x133] sm:$0x7] %vm306_vm1, %v3980_v0  ;;  %336 = vst.msk [vmem:[#allocation2 + $0x14b] sm:$0x7] %vm306_vm1, %v3980_v0  ;;  %v249_v19 = vmax.f32 %v217_v15, 0.0  ;;  %v219_v20 = vld [vmem:[%s4117_s5 + $0x50] sm:$0xff] }
  0x23   : > { %337 = vst.msk [vmem:[#allocation2 + $0x163] sm:$0x7] %vm306_vm1, %v3980_v0  ;;  %338 = vst.msk [vmem:[#allocation2 + $0x17b] sm:$0x7] %vm306_vm1, %v3980_v0  ;;  %v220_v21 = vld [vmem:[%s4117_s5 + $0x58] sm:$0xff]  ;;  %v250_v22 = vmax.f32 %v218_v18, 0.0 }
  0x24   : > { %2056 = vst.msk [vmem:[#allocation3] sm:$0xff] %vm273_vm0, %v3980_v0  ;;  %2057 = vst.msk [vmem:[#allocation3 + $0x8] sm:$0xff] %vm273_vm0, %v3980_v0  ;;  %v251_v23 = vmax.f32 %v219_v20, 0.0  ;;  %v252_v24 = vmax.f32 %v220_v21, 0.0  ;;  %v221_v25 = vld [vmem:[%s4117_s5 + $0x60] sm:$0xff]  ;;  %v222_v26 = vld [vmem:[%s4117_s5 + $0x68] sm:$0xff] }
  0x25   : > { %2058 = vst.msk [vmem:[#allocation3 + $0x10] sm:$0xff] %vm273_vm0, %v3980_v0  ;;  %2059 = vst.msk [vmem:[#allocation3 + $0x18] sm:$0xff] %vm273_vm0, %v3980_v0  ;;  %v223_v27 = vld [vmem:[%s4117_s5 + $0x70] sm:$0xff]  ;;  %v253_v28 = vmax.f32 %v221_v25, 0.0  ;;  %v254_v29 = vmax.f32 %v222_v26, 0.0  ;;  %v224_v30 = vld [vmem:[%s4117_s5 + $0x78] sm:$0xff] }
  0x26   : > { %2060 = vst.msk [vmem:[#allocation3 + $0x20] sm:$0xff] %vm273_vm0, %v3980_v0  ;;  %2061 = vst.msk [vmem:[#allocation3 + $0x28] sm:$0xff] %vm273_vm0, %v3980_v0  ;;  %v255_v31 = vmax.f32 %v223_v27, 0.0  ;;  %v225_v32 = vld [vmem:[%s4117_s5 + $0x80] sm:$0xff]  ;;  %v226_v33 = vld [vmem:[%s4117_s5 + $0x88] sm:$0xff]  ;;  %v256_v34 = vmax.f32 %v224_v30, 0.0 }
  0x27   : > { %2063 = vst.msk [vmem:[#allocation3 + $0x130] sm:$0xff] %vm273_vm0, %v3980_v0  ;;  %2064 = vst.msk [vmem:[#allocation3 + $0x138] sm:$0xff] %vm273_vm0, %v3980_v0  ;;  %v257_v35 = vmax.f32 %v225_v32, 0.0  ;;  %v258_v36 = vmax.f32 %v226_v33, 0.0  ;;  %v227_v37 = vld [vmem:[%s4117_s5 + $0x90] sm:$0xff]  ;;  %v228_v38 = vld [vmem:[%s4117_s5 + $0x98] sm:$0xff] }
  0x28   : > { %2065 = vst.msk [vmem:[#allocation3 + $0x140] sm:$0xff] %vm273_vm0, %v3980_v0  ;;  %2066 = vst.msk [vmem:[#allocation3 + $0x148] sm:$0xff] %vm273_vm0, %v3980_v0  ;;  %v229_v39 = vld [vmem:[%s4117_s5 + $0xa0] sm:$0xff]  ;;  %v259_v40 = vmax.f32 %v227_v37, 0.0  ;;  %v260_v41 = vmax.f32 %v228_v38, 0.0  ;;  %v230_v42 = vld [vmem:[%s4117_s5 + $0xa8] sm:$0xff] }
  0x29   : > { %2067 = vst.msk [vmem:[#allocation3 + $0x150] sm:$0xff] %vm273_vm0, %v3980_v0  ;;  %2068 = vst.msk [vmem:[#allocation3 + $0x158] sm:$0xff] %vm273_vm0, %v3980_v0  ;;  %v261_v43 = vmax.f32 %v229_v39, 0.0  ;;  %v231_v44 = vld [vmem:[%s4117_s5 + $0xb0] sm:$0xff]  ;;  %v232_v45 = vld [vmem:[%s4117_s5 + $0xb8] sm:$0xff]  ;;  %v262_v46 = vmax.f32 %v230_v42, 0.0 }
  0x2a   : > { %276 = vst.msk [vmem:[#allocation2 + $0x1b] sm:$0xff] %vm273_vm0, %v243_v4  ;;  %277 = vst.msk [vmem:[#allocation2 + $0x23] sm:$0xff] %vm273_vm0, %v244_v5  ;;  %v263_v47 = vmax.f32 %v231_v44, 0.0  ;;  %v264_v48 = vmax.f32 %v232_v45, 0.0  ;;  %v233_v49 = vld [vmem:[%s4117_s5 + $0xc0] sm:$0xff]  ;;  %v234_v50 = vld [vmem:[%s4117_s5 + $0xc8] sm:$0xff] }
  0x2b   : > { %274 = vst.msk [vmem:[#allocation2 + $0x3] sm:$0xff] %vm273_vm0, %v241_v7  ;;  %275 = vst.msk [vmem:[#allocation2 + $0xb] sm:$0xff] %vm273_vm0, %v242_v10  ;;  %v235_v51 = vld [vmem:[%s4117_s5 + $0xd0] sm:$0xff]  ;;  %v265_v52 = vmax.f32 %v233_v49, 0.0  ;;  %v266_v53 = vmax.f32 %v234_v50, 0.0  ;;  %v236_v54 = vld [vmem:[%s4117_s5 + $0xd8] sm:$0xff] }
  0x2c   : > { %278 = vst.msk [vmem:[#allocation2 + $0x33] sm:$0xff] %vm273_vm0, %v245_v11  ;;  %279 = vst.msk [vmem:[#allocation2 + $0x3b] sm:$0xff] %vm273_vm0, %v246_v12  ;;  %v267_v55 = vmax.f32 %v235_v51, 0.0  ;;  %v237_v56 = vld [vmem:[%s4117_s5 + $0xe0] sm:$0xff]  ;;  %v238_v57 = vld [vmem:[%s4117_s5 + $0xe8] sm:$0xff]  ;;  %v268_v61 = vmax.f32 %v236_v54, 0.0 }
  0x2d   : > { %280 = vst.msk [vmem:[#allocation2 + $0x4b] sm:$0xff] %vm273_vm0, %v247_v16  ;;  %281 = vst.msk [vmem:[#allocation2 + $0x53] sm:$0xff] %vm273_vm0, %v248_v17  ;;  %v269_v62 = vmax.f32 %v237_v56, 0.0  ;;  %v270_v63 = vmax.f32 %v238_v57, 0.0  ;;  %v240_v42 = vld [vmem:[%s4117_s5 + $0xf8] sm:$0xff]  ;;  %s3985_s29 = smov 20  }
  0x2e   : > { %282 = vst.msk [vmem:[#allocation2 + $0x63] sm:$0xff] %vm273_vm0, %v249_v19  ;;  %283 = vst.msk [vmem:[#allocation2 + $0x6b] sm:$0xff] %vm273_vm0, %v250_v22  ;;  %v272_v49 = vmax.f32 %v240_v42, 0.0  ;;  %s3986_s30 = smov 24   ;;  %vm1529_vm8 = vcmask 64512   ;;  %vm1562_vm9 = vcmask 97280  }
  0x2f   : > { %284 = vst.msk [vmem:[#allocation2 + $0x7b] sm:$0xff] %vm273_vm0, %v251_v23  ;;  %285 = vst.msk [vmem:[#allocation2 + $0x83] sm:$0xff] %vm273_vm0, %v252_v24  ;;  %vm1595_vm10 = vcmask 130048   ;;  %vm1628_vm11 = vcmask 162816   ;;  %vm1661_vm12 = vcmask 195584   ;;  %vm1698_vm13 = vcmask 228352  }
  0x30   : > { %286 = vst.msk [vmem:[#allocation2 + $0x93] sm:$0xff] %vm273_vm0, %v253_v28  ;;  %287 = vst.msk [vmem:[#allocation2 + $0x9b] sm:$0xff] %vm273_vm0, %v254_v29  ;;  %s196_s27 = sand.u32 1, %s3970_s16   ;;  %s3639_s22 = sshll.u32 %s4034_s19, 5  ;;  %vm3453_vm14 = vcmask 1040384   ;;  %vm3455_vm15 = vcmask 25600  }
  0x31   : > { %288 = vst.msk [vmem:[#allocation2 + $0xab] sm:$0xff] %vm273_vm0, %v255_v31  ;;  %289 = vst.msk [vmem:[#allocation2 + $0xb3] sm:$0xff] %vm273_vm0, %v256_v34  ;;  %v4170_v58 = vld [vmem:[#allocation2 + $0x18] sm:$0xff]  ;;  %v4172_v59 = vld [vmem:[#allocation2 + $0x20] sm:$0xff]  ;;  %s6436_s9 = scalar_lea.hbm %s6475_s4, %s3639_s22  ;;  %s3463_s10 = scalar_lea.sflag [#allocation5], %s196_s27 }
  0x32   : > { %290 = vst.msk [vmem:[#allocation2 + $0xc3] sm:$0xff] %vm273_vm0, %v257_v35  ;;  %291 = vst.msk [vmem:[#allocation2 + $0xcb] sm:$0xff] %vm273_vm0, %v258_v36  ;;  %v4174_v60 = vld [vmem:[#allocation2] sm:$0xff]  ;;  %v441_v0 = vrot.slane %v4170_v58, 1  ;;  %v442_v1 = vrot.slane %v4172_v59, 1  ;;  %v4181_v2 = vld [vmem:[#allocation2 + $0x8] sm:$0xff] }
  0x33   : > { %292 = vst.msk [vmem:[#allocation2 + $0xdb] sm:$0xff] %vm273_vm0, %v259_v40  ;;  %293 = vst.msk [vmem:[#allocation2 + $0xe3] sm:$0xff] %vm273_vm0, %v260_v41  ;;  %v436_v3 = vrot.slane %v4174_v60, 1  ;;  %v4184_v4 = vld [vmem:[#allocation2 + $0x28] sm:$0x3f]  ;;  %v437_v5 = vrot.slane %v4181_v2, 1 }
  0x34   : > { %294 = vst.msk [vmem:[#allocation2 + $0xf3] sm:$0xff] %vm273_vm0, %v261_v43  ;;  %295 = vst.msk [vmem:[#allocation2 + $0xfb] sm:$0xff] %vm273_vm0, %v262_v46  ;;  %v444_v6 = vrot.slane %v4184_v4, 1  ;;  %v4191_v7 = vld [vmem:[#allocation2 + $0x10] sm:$0x3f]  ;;  %v4193_v8 = vld [vmem:[#allocation2 + $0x38] sm:$0xff]  ;;  %v443_v9 = vsel %vm435_vm2, %v441_v0, %v442_v1 }
  0x35   : > { %296 = vst.msk [vmem:[#allocation2 + $0x10b] sm:$0xff] %vm273_vm0, %v263_v47  ;;  %297 = vst.msk [vmem:[#allocation2 + $0x113] sm:$0xff] %vm273_vm0, %v264_v48  ;;  %v439_v10 = vrot.slane %v4191_v7, 1  ;;  %v4200_v11 = vld [vmem:[#allocation2 + $0x40] sm:$0x3f]  ;;  %v4202_v12 = vld [vmem:[#allocation2 + $0x30] sm:$0xff]  ;;  %520 = vrot.lane.b32.xlu1 %v443_v9, %s3981_s6  ;;  %v438_v13 = vsel %vm435_vm2, %v436_v3, %v437_v5 }
  0x36   : > { %298 = vst.msk [vmem:[#allocation2 + $0x123] sm:$0xff] %vm273_vm0, %v265_v52  ;;  %299 = vst.msk [vmem:[#allocation2 + $0x12b] sm:$0xff] %vm273_vm0, %v266_v53  ;;  %516 = vrot.lane.b32.xlu0 %v438_v13, %s3981_s6  ;;  %v445_v14 = vsel %vm435_vm2, %v442_v1, %v444_v6  ;;  %v447_v15 = vrot.slane %v4193_v8, 1  ;;  %v449_v16 = vrot.slane %v4200_v11, 1  ;;  %v446_v18 = vrot.slane %v4202_v12, 1  ;;  %v4212_v19 = vld [vmem:[#allocation2 + $0x50] sm:$0xff] }
  0x37   : > { %300 = vst.msk [vmem:[#allocation2 + $0x13b] sm:$0xff] %vm273_vm0, %v267_v55  ;;  %301 = vst.msk [vmem:[#allocation2 + $0x143] sm:$0xff] %vm273_vm0, %v268_v61  ;;  %v440_v17 = vsel %vm435_vm2, %v437_v5, %v439_v10  ;;  %v4214_v20 = vld [vmem:[#allocation2 + $0x58] sm:$0x3f]  ;;  %v4216_v21 = vld [vmem:[#allocation2 + $0x48] sm:$0xff]  ;;  %v452_v23 = vrot.slane %v4212_v19, 1 }
  0x38   : > { %302 = vst.msk [vmem:[#allocation2 + $0x153] sm:$0xff] %vm273_vm0, %v269_v62  ;;  %303 = vst.msk [vmem:[#allocation2 + $0x15b] sm:$0xff] %vm273_vm0, %v270_v63  ;;  %v450_v22 = vsel %vm435_vm2, %v447_v15, %v449_v16  ;;  %v454_v24 = vrot.slane %v4214_v20, 1  ;;  %v448_v25 = vsel %vm435_vm2, %v446_v18, %v447_v15  ;;  %v451_v26 = vrot.slane %v4216_v21, 1  ;;  %v4225_v27 = vld [vmem:[#allocation2 + $0x68] sm:$0xff]  ;;  %v4229_v29 = vld [vmem:[#allocation2 + $0x60] sm:$0xff] }
  0x39   : > { %522 = vrot.lane.b32.xlu1 %v445_v14, %s3981_s6  ;;  %v4227_v28 = vld [vmem:[#allocation2 + $0x70] sm:$0x3f]  ;;  %v457_v31 = vrot.slane %v4225_v27, 1  ;;  %v456_v34 = vrot.slane %v4229_v29, 1  ;;  %v4238_v35 = vld [vmem:[#allocation2 + $0x80] sm:$0xff]  ;;  %v4242_v37 = vld [vmem:[#allocation2 + $0x78] sm:$0xff] }
  0x3a   : > { %518 = vrot.lane.b32.xlu0 %v440_v17, %s3981_s6  ;;  %v455_v30 = vsel %vm435_vm2, %v452_v23, %v454_v24  ;;  %v459_v32 = vrot.slane %v4227_v28, 1  ;;  %v453_v33 = vsel %vm435_vm2, %v451_v26, %v452_v23  ;;  %v4240_v36 = vld [vmem:[#allocation2 + $0x88] sm:$0x3f]  ;;  %v462_v39 = vrot.slane %v4238_v35, 1  ;;  %v239_v41 = vld [vmem:[%s4117_s5 + $0xf0] sm:$0xff]  ;;  %v4253_v45 = vld [vmem:[#allocation2 + $0x98] sm:$0xff] }
  0x3b   : > { %v464_v40 = vrot.slane %v4240_v36, 1  ;;  %v458_v43 = vsel %vm435_vm2, %v456_v34, %v457_v31  ;;  %v461_v44 = vrot.slane %v4242_v37, 1  ;;  %v4255_v46 = vld [vmem:[#allocation2 + $0xa0] sm:$0x3f]  ;;  %v4257_v47 = vld [vmem:[#allocation2 + $0x90] sm:$0xff]  ;;  %v271_v48 = vmax.f32 %v239_v41, 0.0 }
  0x3c   : > { %v460_v38 = vsel %vm435_vm2, %v457_v31, %v459_v32  ;;  %v467_v51 = vrot.slane %v4253_v45, 1  ;;  %v469_v52 = vrot.slane %v4255_v46, 1  ;;  %v466_v54 = vrot.slane %v4257_v47, 1  ;;  %v4267_v55 = vld [vmem:[#allocation2 + $0xb0] sm:$0xff]  ;;  %v4269_v56 = vld [vmem:[#allocation2 + $0xb8] sm:$0x3f] }
  0x3d   : > { %526 = vrot.lane.b32.xlu1 %v450_v22, %s3981_s6  ;;  %v465_v50 = vsel %vm435_vm2, %v462_v39, %v464_v40  ;;  %304 = vst.msk [vmem:[#allocation2 + $0x16b] sm:$0xff] %vm273_vm0, %v271_v48  ;;  %v463_v53 = vsel %vm435_vm2, %v461_v44, %v462_v39  ;;  %305 = vst.msk [vmem:[#allocation2 + $0x173] sm:$0xff] %vm273_vm0, %v272_v49  ;;  %v4272_v57 = vld [vmem:[#allocation2 + $0xa8] sm:$0xff]  ;;  %v472_v62 = vrot.slane %v4267_v55, 1  ;;  %v474_v63 = vrot.slane %v4269_v56, 1  ;;  %v4285_v6 = vld [vmem:[#allocation2 + $0xc0] sm:$0xff] }
  0x3e   : > { %524 = vrot.lane.b32.xlu0 %v448_v25, %s3981_s6  ;;  %v470_v61 = vsel %vm435_vm2, %v467_v51, %v469_v52  ;;  %v468_v0 = vsel %vm435_vm2, %v466_v54, %v467_v51  ;;  %v471_v1 = vrot.slane %v4272_v57, 1  ;;  %v4281_v3 = vld [vmem:[#allocation2 + $0xc8] sm:$0xff]  ;;  %v4283_v5 = vld [vmem:[#allocation2 + $0xd0] sm:$0x3f]  ;;  %v476_v15 = vrot.slane %v4285_v6, 1  ;;  %v4294_v16 = vld [vmem:[#allocation2 + $0xe0] sm:$0xff] }
  0x3f   : > { %v475_v9 = vsel %vm435_vm2, %v472_v62, %v474_v63  ;;  %v477_v10 = vrot.slane %v4281_v3, 1  ;;  %v479_v13 = vrot.slane %v4283_v5, 1  ;;  %v4296_v17 = vld [vmem:[#allocation2 + $0xe8] sm:$0x3f]  ;;  %v4298_v18 = vld [vmem:[#allocation2 + $0xd8] sm:$0xff]  ;;  %v482_v23 = vrot.slane %v4294_v16, 1 }
  0x40   : > { %v473_v14 = vsel %vm435_vm2, %v471_v1, %v472_v62  ;;  %v484_v24 = vrot.slane %v4296_v17, 1  ;;  %v481_v26 = vrot.slane %v4298_v18, 1  ;;  %v4309_v31 = vld [vmem:[#allocation2 + $0x100] sm:$0x3f]  ;;  %v4311_v32 = vld [vmem:[#allocation2 + $0xf0] sm:$0xff]  ;;  %v4333_v52 = vld [vmem:[#allocation2 + $0x128] sm:$0xff] }
  0x41   : > { %530 = vrot.lane.b32.xlu1 %v455_v30, %s3981_s6  ;;  %v480_v22 = vsel %vm435_vm2, %v477_v10, %v479_v13  ;;  %v478_v25 = vsel %vm435_vm2, %v476_v15, %v477_v10  ;;  %v4307_v30 = vld [vmem:[#allocation2 + $0xf8] sm:$0xff]  ;;  %v486_v40 = vrot.slane %v4311_v32, 1  ;;  %v4320_v41 = vld [vmem:[#allocation2 + $0x110] sm:$0xff]  ;;  %v4337_v54 = vld [vmem:[#allocation2 + $0x120] sm:$0xff]  ;;  %v497_v62 = vrot.slane %v4333_v52, 1  ;;  %s3987_s19 = smov [#allocation4]  }
  0x42   : > { %528 = vrot.lane.b32.xlu0 %v453_v33, %s3981_s6  ;;  %v485_v33 = vsel %vm435_vm2, %v482_v23, %v484_v24  ;;  %v487_v34 = vrot.slane %v4307_v30, 1  ;;  %v483_v39 = vsel %vm435_vm2, %v481_v26, %v482_v23  ;;  %v4322_v42 = vld [vmem:[#allocation2 + $0x118] sm:$0x3f]  ;;  %v492_v48 = vrot.slane %v4320_v41, 1  ;;  %v4348_v10 = vld [vmem:[#allocation2 + $0x148] sm:$0x3f] }
  0x43   : > { %v494_v49 = vrot.slane %v4322_v42, 1  ;;  %v496_v1 = vrot.slane %v4337_v54, 1  ;;  %v4350_v13 = vld [vmem:[#allocation2 + $0x138] sm:$0xff]  ;;  %v4361_v26 = vld [vmem:[#allocation2 + $0x160] sm:$0x3f]  ;;  %s3922_s12 = sshll.u32 %s3987_s19, 4  ;;  %s3923_s12 = int_to_ptr.vmem [resolvable:$false] %s3922_s12 }
  0x44   : > { %v501_v24 = vrot.slane %v4350_v13, 1  ;;  %s3924_s13 = scalar_lea.vmem %s3923_s12, 64 }
  0x45   : > { %534 = vrot.lane.b32.xlu1 %v460_v38, %s3981_s6  ;;  %v489_v38 = vrot.slane %v4309_v31, 1  ;;  %v498_v23 = vsel %vm435_vm2, %v496_v1, %v497_v62 }
  0x46   : > { %532 = vrot.lane.b32.xlu0 %v458_v43, %s3981_s6  ;;  %v4324_v43 = vld [vmem:[#allocation2 + $0x108] sm:$0xff] }
  0x47   : > { %v490_v44 = vsel %vm435_vm2, %v487_v34, %v489_v38  ;;  %v491_v51 = vrot.slane %v4324_v43, 1 }
  0x49   : > { %538 = vrot.lane.b32.xlu1 %v465_v50, %s3981_s6  ;;  %v488_v50 = vsel %vm435_vm2, %v486_v40, %v487_v34 }
  0x4a   : > { %536 = vrot.lane.b32.xlu0 %v463_v53, %s3981_s6  ;;  %v4335_v53 = vld [vmem:[#allocation2 + $0x130] sm:$0x3f] }
  0x4b   : > { %v499_v63 = vrot.slane %v4335_v53, 1 }
  0x4d   : > { %542 = vrot.lane.b32.xlu1 %v470_v61, %s3981_s6  ;;  %v495_v61 = vsel %vm435_vm2, %v492_v48, %v494_v49  ;;  %v4374_v49 = vld [vmem:[#allocation2 + $0x178] sm:$0x3f] }
  0x4e   : > { %540 = vrot.lane.b32.xlu0 %v468_v0, %s3981_s6  ;;  %v493_v0 = vsel %vm435_vm2, %v491_v51, %v492_v48  ;;  %v4372_v48 = vld [vmem:[#allocation2 + $0x170] sm:$0xff] }
  0x51   : > { %546 = vrot.lane.b32.xlu1 %v475_v9, %s3981_s6  ;;  %v4346_v9 = vld [vmem:[#allocation2 + $0x140] sm:$0xff] }
  0x52   : > { %544 = vrot.lane.b32.xlu0 %v473_v14, %s3981_s6  ;;  %v500_v14 = vsel %vm435_vm2, %v497_v62, %v499_v63  ;;  %v502_v15 = vrot.slane %v4346_v9, 1  ;;  %v514_v62 = vrot.slane %v4374_v49, 1 }
  0x54   : > { %v503_v40 = vsel %vm435_vm2, %v501_v24, %v502_v15 }
  0x55   : > { %550 = vrot.lane.b32.xlu1 %v480_v22, %s3981_s6  ;;  %v504_v22 = vrot.slane %v4348_v10, 1 }
  0x56   : > { %548 = vrot.lane.b32.xlu0 %v478_v25, %s3981_s6  ;;  %v4359_v25 = vld [vmem:[#allocation2 + $0x158] sm:$0xff] }
  0x57   : > { %v505_v34 = vsel %vm435_vm2, %v502_v15, %v504_v22  ;;  %v507_v38 = vrot.slane %v4359_v25, 1  ;;  %v616_v15 = vrot.slane %v4191_v7, 2 }
  0x59   : > { %554 = vrot.lane.b32.xlu1 %v485_v33, %s3981_s6  ;;  %v4363_v33 = vld [vmem:[#allocation2 + $0x150] sm:$0xff] }
  0x5a   : > { %552 = vrot.lane.b32.xlu0 %v483_v39, %s3981_s6  ;;  %v509_v39 = vrot.slane %v4361_v26, 1 }
  0x5c   : > { %v510_v51 = vsel %vm435_vm2, %v507_v38, %v509_v39 }
  0x5d   : > { %558 = vrot.lane.b32.xlu1 %v490_v44, %s3981_s6  ;;  %v506_v44 = vrot.slane %v4363_v33, 1 }
  0x5e   : > { %556 = vrot.lane.b32.xlu0 %v488_v50, %s3981_s6  ;;  %v4376_v50 = vld [vmem:[#allocation2 + $0x168] sm:$0xff] }
  0x5f   : > { %v508_v63 = vsel %vm435_vm2, %v506_v44, %v507_v38  ;;  %v621_v38 = vrot.slane %v4184_v4, 2 }
  0x61   : > { %562 = vrot.lane.b32.xlu1 %v495_v61, %s3981_s6  ;;  %v512_v61 = vrot.slane %v4372_v48, 1 }
  0x62   : > { %560 = vrot.lane.b32.xlu0 %v493_v0, %s3981_s6  ;;  %v511_v0 = vrot.slane %v4376_v50, 1 }
  0x63   : > { %v515_v1 = vsel %vm435_vm2, %v512_v61, %v514_v62 }
  0x64   : > { %v513_v22 = vsel %vm435_vm2, %v511_v0, %v512_v61  ;;  %v626_v61 = vrot.slane %v4200_v11, 2 }
  0x65   : > { %566 = vrot.lane.b32.xlu1 %v500_v14, %s3981_s6  ;;  %v614_v14 = vrot.slane %v4181_v2, 2 }
  0x66   : > { %564 = vrot.lane.b32.xlu0 %v498_v23, %s3981_s6  ;;  %v613_v23 = vrot.slane %v4174_v60, 2 }
  0x67   : > { %v617_v24 = vsel %vm612_vm3, %v614_v14, %v616_v15 }
  0x68   : > { %v615_v39 = vsel %vm612_vm3, %v613_v23, %v614_v14  ;;  %v631_v14 = vrot.slane %v4214_v20, 2 }
  0x69   : > { %570 = vrot.lane.b32.xlu1 %v505_v34, %s3981_s6  ;;  %v619_v34 = vrot.slane %v4172_v59, 2 }
  0x6a   : > { %568 = vrot.lane.b32.xlu0 %v503_v40, %s3981_s6  ;;  %v618_v40 = vrot.slane %v4170_v58, 2 }
  0x6b   : > { %v622_v44 = vsel %vm612_vm3, %v619_v34, %v621_v38 }
  0x6c   : > { %v620_v62 = vsel %vm612_vm3, %v618_v40, %v619_v34  ;;  %v636_v34 = vrot.slane %v4227_v28, 2 }
  0x6d   : > { %574 = vrot.lane.b32.xlu1 %v510_v51, %s3981_s6  ;;  %v624_v51 = vrot.slane %v4193_v8, 2 }
  0x6e   : > { %572 = vrot.lane.b32.xlu0 %v508_v63, %s3981_s6  ;;  %v623_v63 = vrot.slane %v4202_v12, 2 }
  0x6f   : > { %v627_v0 = vsel %vm612_vm3, %v624_v51, %v626_v61 }
  0x70   : > { %v625_v15 = vsel %vm612_vm3, %v623_v63, %v624_v51  ;;  %v641_v51 = vrot.slane %v4240_v36, 2 }
  0x71   : > { %578 = vrot.lane.b32.xlu1 %v515_v1, %s3981_s6  ;;  %v629_v1 = vrot.slane %v4212_v19, 2 }
  0x72   : > { %576 = vrot.lane.b32.xlu0 %v513_v22, %s3981_s6  ;;  %v628_v22 = vrot.slane %v4216_v21, 2 }
  0x73   : > { %v632_v23 = vsel %vm612_vm3, %v629_v1, %v631_v14 }
  0x74   : > { %v630_v38 = vsel %vm612_vm3, %v628_v22, %v629_v1  ;;  %v646_v1 = vrot.slane %v4255_v46, 2 }
  0x75   : > { %695 = vrot.lane.b32.xlu1 %v617_v24, %s3982_s7  ;;  %v634_v24 = vrot.slane %v4225_v27, 2 }
  0x76   : > { %693 = vrot.lane.b32.xlu0 %v615_v39, %s3982_s7  ;;  %v633_v39 = vrot.slane %v4229_v29, 2 }
  0x77   : > { %v637_v40 = vsel %vm612_vm3, %v634_v24, %v636_v34 }
  0x78   : > { %v635_v61 = vsel %vm612_vm3, %v633_v39, %v634_v24  ;;  %v651_v24 = vrot.slane %v4269_v56, 2 }
  0x79   : > { %699 = vrot.lane.b32.xlu1 %v622_v44, %s3982_s7  ;;  %v639_v44 = vrot.slane %v4238_v35, 2 }
  0x7a   : > { %697 = vrot.lane.b32.xlu0 %v620_v62, %s3982_s7  ;;  %v638_v62 = vrot.slane %v4242_v37, 2 }
  0x7b   : > { %v642_v63 = vsel %vm612_vm3, %v639_v44, %v641_v51 }
  0x7c   : > { %v640_v14 = vsel %vm612_vm3, %v638_v62, %v639_v44  ;;  %v656_v44 = vrot.slane %v4283_v5, 2 }
  0x7d   : > { %703 = vrot.lane.b32.xlu1 %v627_v0, %s3982_s7  ;;  %v644_v0 = vrot.slane %v4253_v45, 2 }
  0x7e   : > { %701 = vrot.lane.b32.xlu0 %v625_v15, %s3982_s7  ;;  %v643_v15 = vrot.slane %v4257_v47, 2 }
  0x7f   : > { %v647_v22 = vsel %vm612_vm3, %v644_v0, %v646_v1 }
  0x80   : > { %v645_v34 = vsel %vm612_vm3, %v643_v15, %v644_v0  ;;  %v661_v0 = vrot.slane %v4296_v17, 2 }
  0x81   : > { %707 = vrot.lane.b32.xlu1 %v632_v23, %s3982_s7  ;;  %v649_v23 = vrot.slane %v4267_v55, 2 }
  0x82   : > { %705 = vrot.lane.b32.xlu0 %v630_v38, %s3982_s7  ;;  %v648_v38 = vrot.slane %v4272_v57, 2 }
  0x83   : > { %v652_v39 = vsel %vm612_vm3, %v649_v23, %v651_v24 }
  0x84   : > { %v650_v51 = vsel %vm612_vm3, %v648_v38, %v649_v23  ;;  %v666_v23 = vrot.slane %v4309_v31, 2 }
  0x85   : > { %711 = vrot.lane.b32.xlu1 %v637_v40, %s3982_s7  ;;  %v654_v40 = vrot.slane %v4281_v3, 2 }
  0x86   : > { %709 = vrot.lane.b32.xlu0 %v635_v61, %s3982_s7  ;;  %v653_v61 = vrot.slane %v4285_v6, 2 }
  0x87   : > { %v657_v62 = vsel %vm612_vm3, %v654_v40, %v656_v44  ;;  %v681_v44 = vrot.slane %v4348_v10, 2  ;;  %v683_v10 = vrot.slane %v4363_v33, 2 }
  0x88   : > { %v655_v1 = vsel %vm612_vm3, %v653_v61, %v654_v40  ;;  %v686_v61 = vrot.slane %v4361_v26, 2 }
  0x89   : > { %715 = vrot.lane.b32.xlu1 %v642_v63, %s3982_s7  ;;  %v659_v63 = vrot.slane %v4294_v16, 2  ;;  %v663_v16 = vrot.slane %v4311_v32, 2  ;;  %v674_v32 = vrot.slane %v4333_v52, 2  ;;  %v678_v52 = vrot.slane %v4350_v13, 2 }
  0x8a   : > { %713 = vrot.lane.b32.xlu0 %v640_v14, %s3982_s7  ;;  %v658_v14 = vrot.slane %v4298_v18, 2  ;;  %v669_v18 = vrot.slane %v4320_v41, 2  ;;  %v673_v41 = vrot.slane %v4337_v54, 2  ;;  %v684_v54 = vrot.slane %v4359_v25, 2 }
  0x8b   : > { %v662_v15 = vsel %vm612_vm3, %v659_v63, %v661_v0  ;;  %v689_v0 = vrot.slane %v4372_v48, 2  ;;  %v691_v25 = vrot.slane %v4374_v49, 2  ;;  %v793_v48 = vrot.slane %v4191_v7, 3 }
  0x8c   : > { %v660_v24 = vsel %vm612_vm3, %v658_v14, %v659_v63  ;;  %v687_v13 = vsel %vm612_vm3, %v684_v54, %v686_v61  ;;  %v685_v26 = vsel %vm612_vm3, %v683_v10, %v684_v54  ;;  %v688_v14 = vrot.slane %v4376_v50, 2 }
  0x8d   : > { %719 = vrot.lane.b32.xlu1 %v647_v22, %s3982_s7  ;;  %v664_v22 = vrot.slane %v4307_v30, 2  ;;  %v668_v30 = vrot.slane %v4324_v43, 2  ;;  %v679_v43 = vrot.slane %v4346_v9, 2  ;;  %v692_v33 = vsel %vm612_vm3, %v689_v0, %v691_v25 }
  0x8e   : > { %717 = vrot.lane.b32.xlu0 %v645_v34, %s3982_s7  ;;  %v671_v34 = vrot.slane %v4322_v42, 2  ;;  %v690_v49 = vsel %vm612_vm3, %v688_v14, %v689_v0  ;;  %v811_v0 = vrot.slane %v4225_v27, 3  ;;  %v813_v25 = vrot.slane %v4227_v28, 3 }
  0x8f   : > { %v667_v17 = vsel %vm612_vm3, %v664_v22, %v666_v23  ;;  %v665_v38 = vsel %vm612_vm3, %v663_v16, %v664_v22  ;;  %v670_v40 = vsel %vm612_vm3, %v668_v30, %v669_v18  ;;  %v680_v9 = vsel %vm612_vm3, %v678_v52, %v679_v43 }
  0x90   : > { %v672_v31 = vsel %vm612_vm3, %v669_v18, %v671_v34  ;;  %v791_v22 = vrot.slane %v4181_v2, 3  ;;  %v798_v18 = vrot.slane %v4184_v4, 3  ;;  %v795_v30 = vrot.slane %v4170_v58, 3 }
  0x91   : > { %723 = vrot.lane.b32.xlu1 %v652_v39, %s3982_s7  ;;  %v676_v39 = vrot.slane %v4335_v53, 2  ;;  %v682_v53 = vsel %vm612_vm3, %v679_v43, %v681_v44  ;;  %v800_v43 = vrot.slane %v4202_v12, 3  ;;  %v806_v52 = vrot.slane %v4212_v19, 3 }
  0x92   : > { %721 = vrot.lane.b32.xlu0 %v650_v51, %s3982_s7  ;;  %v675_v51 = vsel %vm612_vm3, %v673_v41, %v674_v32  ;;  %v794_v16 = vsel %vm789_vm4, %v791_v22, %v793_v48  ;;  %v814_v48 = vsel %vm789_vm4, %v811_v0, %v813_v25 }
  0x93   : > { %v677_v42 = vsel %vm612_vm3, %v674_v32, %v676_v39  ;;  %v801_v39 = vrot.slane %v4193_v8, 3 }
  0x95   : > { %727 = vrot.lane.b32.xlu1 %v657_v62, %s3982_s7  ;;  %v802_v61 = vsel %vm789_vm4, %v800_v43, %v801_v39 }
  0x96   : > { %725 = vrot.lane.b32.xlu0 %v655_v1, %s3982_s7 }
  0x99   : > { %731 = vrot.lane.b32.xlu1 %v662_v15, %s3982_s7 }
  0x9a   : > { %729 = vrot.lane.b32.xlu0 %v660_v24, %s3982_s7  ;;  %v790_v24 = vrot.slane %v4174_v60, 3 }
  0x9d   : > { %735 = vrot.lane.b32.xlu1 %v667_v17, %s3982_s7  ;;  %v796_v17 = vrot.slane %v4172_v59, 3 }
  0x9e   : > { %733 = vrot.lane.b32.xlu0 %v665_v38, %s3982_s7  ;;  %v792_v38 = vsel %vm789_vm4, %v790_v24, %v791_v22  ;;  %v818_v24 = vrot.slane %v4240_v36, 3 }
  0x9f   : > { %v799_v32 = vsel %vm789_vm4, %v796_v17, %v798_v18  ;;  %v815_v18 = vrot.slane %v4242_v37, 3 }
  0xa1   : > { %739 = vrot.lane.b32.xlu1 %v672_v31, %s3982_s7 }
  0xa2   : > { %737 = vrot.lane.b32.xlu0 %v670_v40, %s3982_s7  ;;  %v803_v40 = vrot.slane %v4200_v11, 3 }
  0xa5   : > { %743 = vrot.lane.b32.xlu1 %v677_v42, %s3982_s7  ;;  %v797_v42 = vsel %vm789_vm4, %v795_v30, %v796_v17 }
  0xa6   : > { %741 = vrot.lane.b32.xlu0 %v675_v51, %s3982_s7  ;;  %v804_v51 = vsel %vm789_vm4, %v801_v39, %v803_v40  ;;  %v823_v39 = vrot.slane %v4255_v46, 3  ;;  %v1697_v40 = vld [vmem:[%s6472_s1 + $0x18] sm:$0xf] }
  0xa7   : > { %v4488_v62 = vpop.permute.xlu1 %520  ;;  %3716 = vmatprep.subr.msk.mxu0 %vm966_vm5, %v1697_v40 }
  0xa8   : > { %v4492_v63 = vpop.permute.xlu0 %516  ;;  %3717 = vmatpush3.msk.msra.mxu0 %vm966_vm5, %v1697_v40 }
  0xa9   : > { %747 = vrot.lane.b32.xlu1 %v682_v53, %s3982_s7  ;;  %v808_v53 = vrot.slane %v4214_v20, 3 }
  0xaa   : > { %745 = vrot.lane.b32.xlu0 %v680_v9, %s3982_s7  ;;  %v805_v9 = vrot.slane %v4216_v21, 3 }
  0xab   : > { %v4499_v1 = vpop.permute.xlu1 %522 }
  0xac   : > { %v4503_v15 = vpop.permute.xlu0 %518  ;;  %v807_v14 = vsel %vm789_vm4, %v805_v9, %v806_v52  ;;  %v968_v9 = vrot.slane %v4181_v2, 4 }
  0xad   : > { %751 = vrot.lane.b32.xlu1 %v687_v13, %s3982_s7  ;;  %v809_v13 = vsel %vm789_vm4, %v806_v52, %v808_v53  ;;  %v1696_v53 = vld [vmem:[%s6472_s1 + $0x10] sm:$0xff] }
  0xae   : > { %749 = vrot.lane.b32.xlu0 %v685_v26, %s3982_s7  ;;  %3718 = vmatprep.subr.mxu0 %v1696_v53 }
  0xaf   : > { %v4510_v23 = vpop.permute.xlu1 %526  ;;  %3719 = vmatpush3.msra.mxu0 %v1696_v53  ;;  %v1324_v53 = vrot.slane %v4191_v7, 6 }
  0xb0   : > { %v4514_v50 = vpop.permute.xlu0 %524 }
  0xb1   : > { %755 = vrot.lane.b32.xlu1 %v692_v33, %s3982_s7  ;;  %v810_v33 = vrot.slane %v4229_v29, 3 }
  0xb2   : > { %753 = vrot.lane.b32.xlu0 %v690_v49, %s3982_s7  ;;  %v816_v49 = vrot.slane %v4238_v35, 3 }
  0xb3   : > { %v4521_v34 = vpop.permute.xlu1 %530  ;;  %v812_v17 = vsel %vm789_vm4, %v810_v33, %v811_v0  ;;  %v1695_v0 = vld [vmem:[%s6472_s1 + $0x8] sm:$0xff]  ;;  %v967_v33 = vrot.slane %v4174_v60, 4 }
  0xb4   : > { %v4525_v31 = vpop.permute.xlu0 %528  ;;  %v819_v30 = vsel %vm789_vm4, %v816_v49, %v818_v24  ;;  %v817_v43 = vsel %vm789_vm4, %v815_v18, %v816_v49  ;;  %3720 = vmatprep.subr.mxu0 %v1695_v0  ;;  %v1694_v49 = vld [vmem:[%s6472_s1] sm:$0xff]  ;;  %v1147_v18 = vrot.slane %v4191_v7, 5 }
  0xb5   : > { %872 = vrot.lane.b32.xlu1 %v794_v16, %s3983_s8  ;;  %3721 = vmatpush3.msra.mxu0 %v1695_v0 }
  0xb6   : > { %870 = vrot.lane.b32.xlu0 %v792_v38, %s3983_s8  ;;  %3722 = vmatprep.subr.mxu0 %v1694_v49 }
  0xb7   : > { %v4532_v41 = vpop.permute.xlu1 %534  ;;  %3723 = vmatpush3.msra.mxu0 %v1694_v49 }
  0xb8   : > { %v4536_v44 = vpop.permute.xlu0 %532 }
  0xb9   : > { %876 = vrot.lane.b32.xlu1 %v799_v32, %s3983_s8  ;;  %v821_v32 = vrot.slane %v4253_v45, 3 }
  0xba   : > { %874 = vrot.lane.b32.xlu0 %v797_v42, %s3983_s8 }
  0xbb   : > { %v4543_v54 = vpop.permute.xlu1 %538 }
  0xbc   : > { %v4547_v10 = vpop.permute.xlu0 %536 }
  0xbd   : > { %880 = vrot.lane.b32.xlu1 %v804_v51, %s3983_s8  ;;  %v820_v51 = vrot.slane %v4257_v47, 3 }
  0xbe   : > { %878 = vrot.lane.b32.xlu0 %v802_v61, %s3983_s8  ;;  %v824_v61 = vsel %vm789_vm4, %v821_v32, %v823_v39  ;;  %v1144_v39 = vrot.slane %v4174_v60, 5 }
  0xbf   : > { %v4554_v26 = vpop.permute.xlu1 %542 }
  0xc0   : > { %v4558_v22 = vpop.permute.xlu0 %540 }
  0xc1   : > { %884 = vrot.lane.b32.xlu1 %v809_v13, %s3983_s8  ;;  %v970_v13 = vrot.slane %v4191_v7, 4  ;;  %v975_v7 = vrot.slane %v4184_v4, 4 }
  0xc2   : > { %882 = vrot.lane.b32.xlu0 %v807_v14, %s3983_s8  ;;  %v822_v14 = vsel %vm789_vm4, %v820_v51, %v821_v32  ;;  %v969_v32 = vsel %vm966_vm5, %v967_v33, %v968_v9  ;;  %v1322_v51 = vrot.slane %v4181_v2, 6 }
  0xc3   : > { %v4565_v16 = vpop.permute.xlu1 %546  ;;  %v971_v24 = vsel %vm966_vm5, %v968_v9, %v970_v13  ;;  %v1321_v13 = vrot.slane %v4174_v60, 6 }
  0xc4   : > { %6482 = vst [vmem:[#allocation7_spill] sm:$0xff] %v4565_v16  ;;  %v4569_v38 = vpop.permute.xlu0 %544 }
  0xc5   : > { %888 = vrot.lane.b32.xlu1 %v814_v48, %s3983_s8  ;;  %v1323_v49 = vsel %vm1320_vm7, %v1321_v13, %v1322_v51  ;;  %v1327_v13 = vrot.slane %v4172_v59, 6 }
  0xc6   : > { %886 = vrot.lane.b32.xlu0 %v812_v17, %s3983_s8  ;;  %v1145_v17 = vrot.slane %v4181_v2, 5  ;;  %v973_v2 = vrot.slane %v4172_v59, 4 }
  0xc7   : > { %v4579_v42 = vpop.permute.xlu1 %550 }
  0xc8   : > { %6483 = vst [vmem:[#allocation8_spill] sm:$0xff] %v4579_v42  ;;  %v4584_v52 = vpop.permute.xlu0 %548  ;;  %v1146_v9 = vsel %vm1143_vm6, %v1144_v39, %v1145_v17 }
  0xc9   : > { %6484 = vst [vmem:[#allocation9_spill] sm:$0xff] %v4584_v52  ;;  %892 = vrot.lane.b32.xlu1 %v819_v30, %s3983_s8 }
  0xca   : > { %890 = vrot.lane.b32.xlu0 %v817_v43, %s3983_s8  ;;  %v1148_v43 = vsel %vm1143_vm6, %v1145_v17, %v1147_v18  ;;  %v976_v17 = vsel %vm966_vm5, %v973_v2, %v975_v7  ;;  %v1150_v18 = vrot.slane %v4172_v59, 5  ;;  %v980_v59 = vrot.slane %v4200_v11, 4 }
  0xcb   : > { %v4598_v25 = vpop.permute.xlu1 %554 }
  0xcc   : > { %6485 = vst [vmem:[#allocation10_spill] sm:$0xff] %v4598_v25  ;;  %v4602_v48 = vpop.permute.xlu0 %552  ;;  %v4915_v25 = vld [vmem:[#allocation2 + $0xe0] sm:$0xff] }
  0xcd   : > { %6486 = vst [vmem:[#allocation11_spill] sm:$0xff] %v4602_v48  ;;  %896 = vrot.lane.b32.xlu1 %v824_v61, %s3983_s8 }
  0xce   : > { %894 = vrot.lane.b32.xlu0 %v822_v14, %s3983_s8  ;;  %v1325_v14 = vsel %vm1320_vm7, %v1322_v51, %v1324_v53  ;;  %v1149_v51 = vrot.slane %v4170_v58, 5 }
  0xcf   : > { %v4612_v30 = vpop.permute.xlu1 %558 }
  0xd0   : > { %6487 = vst [vmem:[#allocation12_spill] sm:$0xff] %v4612_v30  ;;  %v4616_v40 = vpop.permute.xlu0 %556 }
  0xd1   : > { %6488 = vst [vmem:[#allocation13_spill] sm:$0xff] %v4616_v40  ;;  %1049 = vrot.lane.b32.xlu1 %v971_v24, %s3984_s23  ;;  %v972_v24 = vrot.slane %v4170_v58, 4 }
  0xd2   : > { %1047 = vrot.lane.b32.xlu0 %v969_v32, %s3984_s23  ;;  %v1152_v32 = vrot.slane %v4184_v4, 5 }
  0xd3   : > { %v4623_v61 = vpop.permute.xlu1 %562 }
  0xd4   : > { %6489 = vst [vmem:[#allocation14_spill] sm:$0xff] %v4623_v61  ;;  %v4627_v0 = vpop.permute.xlu0 %560 }
  0xd5   : > { %6490 = vst [vmem:[#allocation15_spill] sm:$0xff] %v4627_v0  ;;  %1226 = vrot.lane.b32.xlu1 %v1148_v43, %s3985_s29  ;;  %v974_v43 = vsel %vm966_vm5, %v972_v24, %v973_v2  ;;  %v1326_v2 = vrot.slane %v4170_v58, 6 }
  0xd6   : > { %1224 = vrot.lane.b32.xlu0 %v1146_v9, %s3985_s29  ;;  %v1153_v9 = vsel %vm1143_vm6, %v1150_v18, %v1152_v32  ;;  %v978_v32 = vrot.slane %v4193_v8, 4 }
  0xd7   : > { %v4634_v33 = vpop.permute.xlu1 %566 }
  0xd8   : > { %6491 = vst [vmem:[#allocation16_spill] sm:$0xff] %v4634_v33  ;;  %v4638_v60 = vpop.permute.xlu0 %564  ;;  %v981_v58 = vsel %vm966_vm5, %v978_v32, %v980_v59  ;;  %v1332_v59 = vrot.slane %v4193_v8, 6 }
  0xd9   : > { %6492 = vst [vmem:[#allocation17_spill] sm:$0xff] %v4638_v60  ;;  %1403 = vrot.lane.b32.xlu1 %v1325_v14, %s3986_s30  ;;  %v1329_v14 = vrot.slane %v4184_v4, 6  ;;  %v1328_v4 = vsel %vm1320_vm7, %v1326_v2, %v1327_v13 }
  0xda   : > { %1401 = vrot.lane.b32.xlu0 %v1323_v49, %s3986_s30  ;;  %v1151_v49 = vsel %vm1143_vm6, %v1149_v51, %v1150_v18  ;;  %v977_v18 = vrot.slane %v4202_v12, 4 }
  0xdb   : > { %v4645_v39 = vpop.permute.xlu1 %570 }
  0xdc   : > { %6493 = vst [vmem:[#allocation18_spill] sm:$0xff] %v4645_v39  ;;  %v4649_v53 = vpop.permute.xlu0 %568 }
  0xdd   : > { %6494 = vst [vmem:[#allocation19_spill] sm:$0xff] %v4649_v53  ;;  %1053 = vrot.lane.b32.xlu1 %v976_v17, %s3984_s23  ;;  %v1330_v17 = vsel %vm1320_vm7, %v1327_v13, %v1329_v14  ;;  %v1157_v14 = vrot.slane %v4200_v11, 5  ;;  %v1154_v13 = vrot.slane %v4202_v12, 5 }
  0xde   : > { %1051 = vrot.lane.b32.xlu0 %v974_v43, %s3984_s23 }
  0xdf   : > { %v4656_v7 = vpop.permute.xlu1 %574 }
  0xe0   : > { %6495 = vst [vmem:[#allocation20_spill] sm:$0xff] %v4656_v7  ;;  %v4660_v24 = vpop.permute.xlu0 %572 }
  0xe1   : > { %6496 = vst [vmem:[#allocation21_spill] sm:$0xff] %v4660_v24  ;;  %1230 = vrot.lane.b32.xlu1 %v1153_v9, %s3985_s29  ;;  %v1155_v9 = vrot.slane %v4193_v8, 5  ;;  %v985_v8 = vrot.slane %v4214_v20, 4 }
  0xe2   : > { %1228 = vrot.lane.b32.xlu0 %v1151_v49, %s3985_s29 }
  0xe3   : > { %v4667_v43 = vpop.permute.xlu1 %578  ;;  %v1156_v7 = vsel %vm1143_vm6, %v1154_v13, %v1155_v9 }
  0xe4   : > { %6497 = vst [vmem:[#allocation22_spill] sm:$0xff] %v4667_v43  ;;  %v4671_v51 = vpop.permute.xlu0 %576  ;;  %v979_v43 = vsel %vm966_vm5, %v977_v18, %v978_v32  ;;  %v1331_v32 = vrot.slane %v4202_v12, 6 }
  0xe5   : > { %6498 = vst [vmem:[#allocation23_spill] sm:$0xff] %v4671_v51  ;;  %1407 = vrot.lane.b32.xlu1 %v1330_v17, %s3986_s30  ;;  %v1158_v17 = vsel %vm1143_vm6, %v1155_v9, %v1157_v14  ;;  %v982_v9 = vrot.slane %v4216_v21, 4 }
  0xe6   : > { %1405 = vrot.lane.b32.xlu0 %v1328_v4, %s3986_s30  ;;  %v1334_v4 = vrot.slane %v4200_v11, 6  ;;  %v1333_v11 = vsel %vm1320_vm7, %v1331_v32, %v1332_v59 }
  0xe7   : > { %v4678_v49 = vpop.permute.xlu1 %695 }
  0xe8   : > { %v4682_v2 = vpop.permute.xlu0 %693 }
  0xe9   : > { %1057 = vrot.lane.b32.xlu1 %v981_v58, %s3984_s23  ;;  %v983_v58 = vrot.slane %v4212_v19, 4 }
  0xea   : > { %1055 = vrot.lane.b32.xlu0 %v979_v43, %s3984_s23  ;;  %v1335_v43 = vsel %vm1320_vm7, %v1332_v59, %v1334_v4  ;;  %v1159_v59 = vrot.slane %v4216_v21, 5 }
  0xeb   : > { %v4689_v51 = vpop.permute.xlu1 %699  ;;  %v986_v12 = vsel %vm966_vm5, %v983_v58, %v985_v8  ;;  %v984_v24 = vsel %vm966_vm5, %v982_v9, %v983_v58  ;;  %v1337_v8 = vrot.slane %v4212_v19, 6  ;;  %v1336_v58 = vrot.slane %v4216_v21, 6 }
  0xec   : > { %v4693_v18 = vpop.permute.xlu0 %697 }
  0xed   : > { %1234 = vrot.lane.b32.xlu1 %v1158_v17, %s3985_s29  ;;  %v1162_v17 = vrot.slane %v4214_v20, 5 }
  0xee   : > { %1232 = vrot.lane.b32.xlu0 %v1156_v7, %s3985_s29  ;;  %v1160_v7 = vrot.slane %v4212_v19, 5  ;;  %v990_v19 = vrot.slane %v4227_v28, 4 }
  0xef   : > { %v4700_v14 = vpop.permute.xlu1 %703 }
  0xf0   : > { %v4704_v13 = vpop.permute.xlu0 %701  ;;  %v1161_v53 = vsel %vm1143_vm6, %v1159_v59, %v1160_v7 }
  0xf1   : > { %1411 = vrot.lane.b32.xlu1 %v1335_v43, %s3986_s30  ;;  %v1163_v43 = vsel %vm1143_vm6, %v1160_v7, %v1162_v17  ;;  %v987_v7 = vrot.slane %v4229_v29, 4 }
  0xf2   : > { %1409 = vrot.lane.b32.xlu0 %v1333_v11, %s3986_s30  ;;  %v1339_v11 = vrot.slane %v4214_v20, 6  ;;  %v1338_v20 = vsel %vm1320_vm7, %v1336_v58, %v1337_v8 }
  0xf3   : > { %v4711_v4 = vpop.permute.xlu1 %707 }
  0xf4   : > { %v4715_v32 = vpop.permute.xlu0 %705 }
  0xf5   : > { %1061 = vrot.lane.b32.xlu1 %v986_v12, %s3984_s23  ;;  %v988_v12 = vrot.slane %v4225_v27, 4 }
  0xf6   : > { %1059 = vrot.lane.b32.xlu0 %v984_v24, %s3984_s23  ;;  %v1340_v24 = vsel %vm1320_vm7, %v1337_v8, %v1339_v11  ;;  %v1164_v8 = vrot.slane %v4229_v29, 5 }
  0xf7   : > { %v4722_v39 = vpop.permute.xlu1 %711  ;;  %v991_v21 = vsel %vm966_vm5, %v988_v12, %v990_v19  ;;  %v989_v33 = vsel %vm966_vm5, %v987_v7, %v988_v12  ;;  %v1342_v19 = vrot.slane %v4225_v27, 6  ;;  %v1341_v12 = vrot.slane %v4229_v29, 6 }
  0xf8   : > { %v4726_v9 = vpop.permute.xlu0 %709 }
  0xf9   : > { %1238 = vrot.lane.b32.xlu1 %v1163_v43, %s3985_s29  ;;  %v1167_v43 = vrot.slane %v4227_v28, 5 }
  0xfa   : > { %1236 = vrot.lane.b32.xlu0 %v1161_v53, %s3985_s29  ;;  %v1165_v53 = vrot.slane %v4225_v27, 5  ;;  %v995_v27 = vrot.slane %v4240_v36, 4 }
  0xfb   : > { %v4733_v17 = vpop.permute.xlu1 %715 }
  0xfc   : > { %v4737_v59 = vpop.permute.xlu0 %713  ;;  %v1166_v61 = vsel %vm1143_vm6, %v1164_v8, %v1165_v53 }
  0xfd   : > { %1415 = vrot.lane.b32.xlu1 %v1340_v24, %s3986_s30  ;;  %v1168_v24 = vsel %vm1143_vm6, %v1165_v53, %v1167_v43  ;;  %v992_v53 = vrot.slane %v4242_v37, 4 }
  0xfe   : > { %1413 = vrot.lane.b32.xlu0 %v1338_v20, %s3986_s30  ;;  %v1344_v20 = vrot.slane %v4227_v28, 6  ;;  %v1343_v28 = vsel %vm1320_vm7, %v1341_v12, %v1342_v19 }
  0xff   : > { %v4744_v11 = vpop.permute.xlu1 %719 }
 0x100   : > { %v4748_v58 = vpop.permute.xlu0 %717 }
 0x101   : > { %1065 = vrot.lane.b32.xlu1 %v991_v21, %s3984_s23  ;;  %v993_v21 = vrot.slane %v4238_v35, 4 }
 0x102   : > { %1063 = vrot.lane.b32.xlu0 %v989_v33, %s3984_s23  ;;  %v1345_v33 = vsel %vm1320_vm7, %v1342_v19, %v1344_v20  ;;  %v1169_v19 = vrot.slane %v4242_v37, 5 }
 0x103   : > { %v4755_v60 = vpop.permute.xlu1 %723  ;;  %v996_v29 = vsel %vm966_vm5, %v993_v21, %v995_v27  ;;  %v994_v0 = vsel %vm966_vm5, %v992_v53, %v993_v21  ;;  %v1347_v27 = vrot.slane %v4238_v35, 6  ;;  %v1346_v21 = vrot.slane %v4242_v37, 6 }
 0x104   : > { %6499 = vst [vmem:[#allocation24_spill] sm:$0xff] %v4755_v60  ;;  %v4759_v7 = vpop.permute.xlu0 %721 }
 0x105   : > { %6500 = vst [vmem:[#allocation25_spill] sm:$0xff] %v4759_v7  ;;  %1242 = vrot.lane.b32.xlu1 %v1168_v24, %s3985_s29  ;;  %v1172_v24 = vrot.slane %v4240_v36, 5 }
 0x106   : > { %1240 = vrot.lane.b32.xlu0 %v1166_v61, %s3985_s29  ;;  %v1170_v61 = vrot.slane %v4238_v35, 5  ;;  %v1000_v35 = vrot.slane %v4255_v46, 4 }
 0x107   : > { %v4766_v43 = vpop.permute.xlu1 %727 }
 0x108   : > { %6501 = vst [vmem:[#allocation26_spill] sm:$0xff] %v4766_v43  ;;  %v4770_v8 = vpop.permute.xlu0 %725  ;;  %v1171_v40 = vsel %vm1143_vm6, %v1169_v19, %v1170_v61 }
 0x109   : > { %6502 = vst [vmem:[#allocation27_spill] sm:$0xff] %v4770_v8  ;;  %1419 = vrot.lane.b32.xlu1 %v1345_v33, %s3986_s30  ;;  %v1173_v33 = vsel %vm1143_vm6, %v1170_v61, %v1172_v24  ;;  %v997_v61 = vrot.slane %v4257_v47, 4 }
 0x10a   : > { %1417 = vrot.lane.b32.xlu0 %v1343_v28, %s3986_s30  ;;  %v1349_v28 = vrot.slane %v4240_v36, 6  ;;  %v1348_v36 = vsel %vm1320_vm7, %v1346_v21, %v1347_v27 }
 0x10b   : > { %v4777_v20 = vpop.permute.xlu1 %731 }
 0x10c   : > { %6503 = vst [vmem:[#allocation28_spill] sm:$0xff] %v4777_v20  ;;  %v4781_v12 = vpop.permute.xlu0 %729 }
 0x10d   : > { %6504 = vst [vmem:[#allocation29_spill] sm:$0xff] %v4781_v12  ;;  %1069 = vrot.lane.b32.xlu1 %v996_v29, %s3984_s23  ;;  %v998_v29 = vrot.slane %v4253_v45, 4  ;;  %v836_v12 = vrot.slane %v4915_v25, 3 }
 0x10e   : > { %1067 = vrot.lane.b32.xlu0 %v994_v0, %s3984_s23  ;;  %v1350_v0 = vsel %vm1320_vm7, %v1347_v27, %v1349_v28  ;;  %v1174_v27 = vrot.slane %v4257_v47, 5 }
 0x10f   : > { %v4788_v30 = vpop.permute.xlu1 %735  ;;  %v1001_v37 = vsel %vm966_vm5, %v998_v29, %v1000_v35  ;;  %v825_v35 = vrot.slane %v4272_v57, 3 }
 0x110   : > { %6505 = vst [vmem:[#allocation30_spill] sm:$0xff] %v4788_v30  ;;  %v4792_v53 = vpop.permute.xlu0 %733 }
 0x111   : > { %6506 = vst [vmem:[#allocation31_spill] sm:$0xff] %v4792_v53  ;;  %1246 = vrot.lane.b32.xlu1 %v1173_v33, %s3985_s29  ;;  %v1177_v33 = vrot.slane %v4255_v46, 5 }
 0x112   : > { %1244 = vrot.lane.b32.xlu0 %v1171_v40, %s3985_s29  ;;  %v1175_v40 = vrot.slane %v4253_v45, 5 }
 0x113   : > { %v4799_v24 = vpop.permute.xlu1 %739 }
 0x114   : > { %6507 = vst [vmem:[#allocation32_spill] sm:$0xff] %v4799_v24  ;;  %v4803_v19 = vpop.permute.xlu0 %737  ;;  %v999_v24 = vsel %vm966_vm5, %v997_v61, %v998_v29  ;;  %v1351_v29 = vrot.slane %v4257_v47, 6  ;;  %v1352_v61 = vrot.slane %v4253_v45, 6  ;;  %v1003_v47 = vrot.slane %v4267_v55, 4 }
 0x115   : > { %6508 = vst [vmem:[#allocation33_spill] sm:$0xff] %v4803_v19  ;;  %1423 = vrot.lane.b32.xlu1 %v1350_v0, %s3986_s30  ;;  %v1178_v0 = vsel %vm1143_vm6, %v1175_v40, %v1177_v33 }
 0x116   : > { %1421 = vrot.lane.b32.xlu0 %v1348_v36, %s3986_s30  ;;  %v826_v36 = vrot.slane %v4267_v55, 3 }
 0x117   : > { %v4810_v28 = vpop.permute.xlu1 %743 }
 0x118   : > { %6509 = vst [vmem:[#allocation34_spill] sm:$0xff] %v4810_v28  ;;  %v4814_v21 = vpop.permute.xlu0 %741  ;;  %v1176_v28 = vsel %vm1143_vm6, %v1174_v27, %v1175_v40  ;;  %v1354_v40 = vrot.slane %v4255_v46, 6 }
 0x119   : > { %6510 = vst [vmem:[#allocation35_spill] sm:$0xff] %v4814_v21  ;;  %1073 = vrot.lane.b32.xlu1 %v1001_v37, %s3984_s23  ;;  %v828_v37 = vrot.slane %v4269_v56, 3  ;;  %v4894_v21 = vld [vmem:[#allocation2 + $0xc0] sm:$0xff] }
 0x11a   : > { %1071 = vrot.lane.b32.xlu0 %v999_v24, %s3984_s23  ;;  %v827_v24 = vsel %vm789_vm4, %v825_v35, %v826_v36  ;;  %v1355_v35 = vsel %vm1320_vm7, %v1352_v61, %v1354_v40  ;;  %6520 = vst [vmem:[#allocation45_spill] sm:$0xff] %v4894_v21 }
 0x11b   : > { %v4821_v19 = vpop.permute.xlu1 %747  ;;  %v829_v45 = vsel %vm789_vm4, %v826_v36, %v828_v37  ;;  %v1182_v36 = vrot.slane %v4269_v56, 5 }
 0x11c   : > { %6511 = vst [vmem:[#allocation36_spill] sm:$0xff] %v4821_v19  ;;  %v4826_v30 = vpop.permute.xlu0 %745  ;;  %v1353_v19 = vsel %vm1320_vm7, %v1351_v29, %v1352_v61  ;;  %v1002_v29 = vrot.slane %v4272_v57, 4  ;;  %v1179_v61 = vrot.slane %v4272_v57, 5 }
 0x11d   : > { %6512 = vst [vmem:[#allocation37_spill] sm:$0xff] %v4826_v30  ;;  %1250 = vrot.lane.b32.xlu1 %v1178_v0, %s3985_s29 }
 0x11e   : > { %1248 = vrot.lane.b32.xlu0 %v1176_v28, %s3985_s29  ;;  %v1005_v28 = vrot.slane %v4269_v56, 4  ;;  %v1004_v37 = vsel %vm966_vm5, %v1002_v29, %v1003_v47 }
 0x11f   : > { %v4832_v33 = vpop.permute.xlu1 %751 }
 0x120   : > { %6513 = vst [vmem:[#allocation38_spill] sm:$0xff] %v4832_v33  ;;  %v4836_v27 = vpop.permute.xlu0 %749  ;;  %v1006_v46 = vsel %vm966_vm5, %v1003_v47, %v1005_v28  ;;  %v830_v28 = vrot.slane %v4285_v6, 3  ;;  %v4871_v47 = vld [vmem:[#allocation2 + $0xb0] sm:$0xff]  ;;  %v833_v6 = vrot.slane %v4283_v5, 3 }
 0x121   : > { %6514 = vst [vmem:[#allocation39_spill] sm:$0xff] %v4836_v27  ;;  %898 = vrot.lane.b32.xlu1 %v827_v24, %s3983_s8  ;;  %6518 = vst [vmem:[#allocation43_spill] sm:$0xff] %v4871_v47  ;;  %v1357_v29 = vrot.slane %v4871_v47, 6  ;;  %v4888_v27 = vld [vmem:[#allocation2 + $0xc8] sm:$0xff] }
 0x122   : > { %1425 = vrot.lane.b32.xlu0 %v1353_v19, %s3986_s30  ;;  %v1180_v19 = vrot.slane %v4267_v55, 5  ;;  %v831_v55 = vrot.slane %v4281_v3, 3  ;;  %6519 = vst [vmem:[#allocation44_spill] sm:$0xff] %v4888_v27 }
 0x123   : > { %v4843_v0 = vpop.permute.xlu1 %755 }
 0x124   : > { %6515 = vst [vmem:[#allocation40_spill] sm:$0xff] %v4843_v0  ;;  %v4847_v33 = vpop.permute.xlu0 %753  ;;  %v1181_v56 = vsel %vm1143_vm6, %v1179_v61, %v1180_v19  ;;  %v832_v3 = vsel %vm789_vm4, %v830_v28, %v831_v55  ;;  %v1008_v28 = vrot.slane %v4888_v27, 4 }
 0x125   : > { %6516 = vst [vmem:[#allocation41_spill] sm:$0xff] %v4847_v33  ;;  %900 = vrot.lane.b32.xlu1 %v829_v45, %s3983_s8  ;;  %v1183_v45 = vsel %vm1143_vm6, %v1180_v19, %v1182_v36  ;;  %v4868_v33 = vld [vmem:[#allocation2 + $0xa8] sm:$0xff] }
 0x126   : > { %1427 = vrot.lane.b32.xlu0 %v1355_v35, %s3986_s30  ;;  %6517 = vst [vmem:[#allocation42_spill] sm:$0xff] %v4868_v33  ;;  %v1356_v57 = vrot.slane %v4868_v33, 6 }
 0x127   : > { %v4854_v24 = vpop.permute.xlu1 %872 }
 0x128   : > { %v4858_v40 = vpop.permute.xlu0 %870  ;;  %v1358_v19 = vsel %vm1320_vm7, %v1356_v57, %v1357_v29 }
 0x129   : > { %1077 = vrot.lane.b32.xlu1 %v1006_v46, %s3984_s23 }
 0x12a   : > { %1075 = vrot.lane.b32.xlu0 %v1004_v37, %s3984_s23  ;;  %v3876_v37 = vld [vmem:[#allocation2 + $0xb8] sm:$0x3f] }
 0x12b   : > { %v4865_v35 = vpop.permute.xlu1 %876  ;;  %v1359_v61 = vrot.slane %v3876_v37, 6  ;;  %v1007_v37 = vrot.slane %v4894_v21, 4 }
 0x12c   : > { %v4874_v46 = vpop.permute.xlu0 %874 }
 0x12d   : > { %1254 = vrot.lane.b32.xlu1 %v1183_v45, %s3985_s29  ;;  %v834_v45 = vsel %vm789_vm4, %v831_v55, %v833_v6  ;;  %v1360_v57 = vsel %vm1320_vm7, %v1357_v29, %v1359_v61  ;;  %v1009_v20 = vsel %vm966_vm5, %v1007_v37, %v1008_v28  ;;  %v1184_v29 = vrot.slane %v4894_v21, 5 }
 0x12e   : > { %1252 = vrot.lane.b32.xlu0 %v1181_v56, %s3985_s29  ;;  %v3878_v56 = vld [vmem:[#allocation2 + $0xd0] sm:$0x3f]  ;;  %v1361_v37 = vrot.slane %v4894_v21, 6 }
 0x12f   : > { %v4880_v36 = vpop.permute.xlu1 %880  ;;  %v1010_v5 = vrot.slane %v3878_v56, 4  ;;  %v1187_v6 = vrot.slane %v3878_v56, 5 }
 0x130   : > { %v4883_v0 = vpop.permute.xlu0 %878 }
 0x131   : > { %902 = vrot.lane.b32.xlu1 %v832_v3, %s3983_s8  ;;  %v1011_v55 = vsel %vm966_vm5, %v1008_v28, %v1010_v5  ;;  %v1185_v3 = vrot.slane %v4888_v27, 5 }
 0x132   : > { %1429 = vrot.lane.b32.xlu0 %v1358_v19, %s3986_s30 }
 0x133   : > { %v4891_v30 = vpop.permute.xlu1 %884  ;;  %v1186_v28 = vsel %vm1143_vm6, %v1184_v29, %v1185_v3  ;;  %v1364_v29 = vrot.slane %v3878_v56, 6  ;;  %v1190_v56 = vrot.slane %v4915_v25, 5 }
 0x134   : > { %v4897_v53 = vpop.permute.xlu0 %882 }
 0x135   : > { %904 = vrot.lane.b32.xlu1 %v834_v45, %s3983_s8  ;;  %v1188_v45 = vsel %vm1143_vm6, %v1185_v3, %v1187_v6  ;;  %v4928_v6 = vld [vmem:[#allocation2 + $0xe8] sm:$0x3f] }
 0x136   : > { %1431 = vrot.lane.b32.xlu0 %v1360_v57, %s3986_s30  ;;  %v4912_v57 = vld [vmem:[#allocation2 + $0xd8] sm:$0xff]  ;;  %v838_v42 = vrot.slane %v4928_v6, 3 }
 0x137   : > { %v4903_v19 = vpop.permute.xlu1 %888  ;;  %v835_v5 = vrot.slane %v4912_v57, 3  ;;  %v1012_v60 = vrot.slane %v4912_v57, 4 }
 0x138   : > { %v4907_v61 = vpop.permute.xlu0 %886 }
 0x139   : > { %1081 = vrot.lane.b32.xlu1 %v1011_v55, %s3984_s23  ;;  %v1362_v55 = vrot.slane %v4888_v27, 6 }
 0x13a   : > { %1079 = vrot.lane.b32.xlu0 %v1009_v20, %s3984_s23  ;;  %v837_v20 = vsel %vm789_vm4, %v835_v5, %v836_v12  ;;  %v1015_v5 = vrot.slane %v4928_v6, 4 }
 0x13b   : > { %v4918_v48 = vpop.permute.xlu1 %892  ;;  %v1363_v3 = vsel %vm1320_vm7, %v1361_v37, %v1362_v55  ;;  %v1365_v52 = vsel %vm1320_vm7, %v1362_v55, %v1364_v29  ;;  %v1192_v37 = vrot.slane %v4928_v6, 5 }
 0x13c   : > { %v4923_v43 = vpop.permute.xlu0 %890 }
 0x13d   : > { %1258 = vrot.lane.b32.xlu1 %v1188_v45, %s3985_s29  ;;  %v839_v45 = vsel %vm789_vm4, %v836_v12, %v838_v42  ;;  %v3883_v12 = vld [vmem:[#allocation2] sm:$0xff] }
 0x13e   : > { %1256 = vrot.lane.b32.xlu0 %v1186_v28, %s3985_s29  ;;  %v1013_v28 = vrot.slane %v4915_v25, 4  ;;  %v1497_v55 = vsel %vm273_vm0, %v3883_v12, %v4492_v63  ;;  %v1366_v12 = vrot.slane %v4912_v57, 6 }
 0x13f   : > { %v4931_v8 = vpop.permute.xlu1 %896 }
 0x140   : > { %v4934_v21 = vpop.permute.xlu0 %894  ;;  %v1016_v42 = vsel %vm966_vm5, %v1013_v28, %v1015_v5  ;;  %v1014_v7 = vsel %vm966_vm5, %v1012_v60, %v1013_v28  ;;  %v1530_v5 = vsel %vm1529_vm8, %v1497_v55, %v4682_v2  ;;  %v4967_v28 = vld [vmem:[#allocation2 + $0xf0] sm:$0xff]  ;;  %v4970_v2 = vld [vmem:[#allocation2 + $0xf8] sm:$0xff] }
 0x141   : > { %906 = vrot.lane.b32.xlu1 %v837_v20, %s3983_s8  ;;  %v1189_v20 = vrot.slane %v4912_v57, 5  ;;  %v1563_v60 = vsel %vm1562_vm9, %v1530_v5, %v4858_v40  ;;  %v1367_v40 = vrot.slane %v4915_v25, 6  ;;  %v1369_v5 = vrot.slane %v4928_v6, 6 }
 0x142   : > { %1433 = vrot.lane.b32.xlu0 %v1363_v3, %s3986_s30  ;;  %v3884_v3 = vld [vmem:[#allocation2 + $0x8] sm:$0xff]  ;;  %v1017_v6 = vrot.slane %v4967_v28, 4 }
 0x143   : > { %v1050_v27 = vpop.permute.xlu1 %1049  ;;  %v1498_v29 = vsel %vm273_vm0, %v3884_v3, %v4503_v15  ;;  %v1191_v15 = vsel %vm1143_vm6, %v1189_v20, %v1190_v56 }
 0x144   : > { %v1048_v47 = vpop.permute.xlu0 %1047 }
 0x145   : > { %908 = vrot.lane.b32.xlu1 %v839_v45, %s3983_s8  ;;  %v1531_v45 = vsel %vm1529_vm8, %v1498_v29, %v4678_v49 }
 0x146   : > { %1435 = vrot.lane.b32.xlu0 %v1365_v52, %s3986_s30  ;;  %v1193_v52 = vsel %vm1143_vm6, %v1190_v56, %v1192_v37  ;;  %v1564_v63 = vsel %vm1562_vm9, %v1531_v45, %v4854_v24  ;;  %v840_v37 = vrot.slane %v4967_v28, 3  ;;  %v841_v24 = vrot.slane %v4970_v2, 3 }
 0x147   : > { %v1227_v16 = vpop.permute.xlu1 %1226  ;;  %v1597_v49 = vsel %vm1595_vm10, %v1564_v63, %v1050_v27  ;;  %v1368_v45 = vsel %vm1320_vm7, %v1366_v12, %v1367_v40  ;;  %v1018_v63 = vrot.slane %v4970_v2, 4 }
 0x148   : > { %v1225_v33 = vpop.permute.xlu0 %1224  ;;  %v1630_v56 = vsel %vm1628_vm11, %v1597_v49, %v1227_v16  ;;  %v842_v16 = vsel %vm789_vm4, %v840_v37, %v841_v24  ;;  %v3888_v49 = vld [vmem:[#allocation2 + $0x20] sm:$0xff] }
 0x149   : > { %1085 = vrot.lane.b32.xlu1 %v1016_v42, %s3984_s23  ;;  %v1596_v42 = vsel %vm1595_vm10, %v1563_v60, %v1048_v47  ;;  %v4984_v47 = vld [vmem:[#allocation2 + $0x100] sm:$0x3f]  ;;  %v1500_v37 = vsel %vm273_vm0, %v3888_v49, %v4499_v1  ;;  %v5029_v49 = vld [vmem:[#allocation2 + $0x110] sm:$0xff] }
 0x14a   : > { %1083 = vrot.lane.b32.xlu0 %v1014_v7, %s3984_s23  ;;  %v1629_v27 = vsel %vm1628_vm11, %v1596_v42, %v1225_v33  ;;  %v843_v29 = vrot.slane %v4984_v47, 3 }
 0x14b   : > { %v1404_v20 = vpop.permute.xlu1 %1403 }
 0x14c   : > { %v1663_v7 = vsel %vm1661_vm12, %v1630_v56, %v1404_v20  ;;  %v1402_v55 = vpop.permute.xlu0 %1401  ;;  %v844_v60 = vsel %vm789_vm4, %v841_v24, %v843_v29  ;;  %v1370_v56 = vsel %vm1320_vm7, %v1367_v40, %v1369_v5  ;;  %v3889_v20 = vld [vmem:[#allocation2 + $0x18] sm:$0xff]  ;;  %v1019_v29 = vsel %vm966_vm5, %v1017_v6, %v1018_v63 }
 0x14d   : > { %1262 = vrot.lane.b32.xlu1 %v1193_v52, %s3985_s29  ;;  %v1662_v3 = vsel %vm1661_vm12, %v1629_v27, %v1402_v55  ;;  %v1499_v12 = vsel %vm273_vm0, %v3889_v20, %v4488_v62  ;;  %v1533_v27 = vsel %vm1529_vm8, %v1500_v37, %v4689_v51  ;;  %v1195_v62 = vrot.slane %v4970_v2, 5 }
 0x14e   : > { %1260 = vrot.lane.b32.xlu0 %v1191_v15, %s3985_s29  ;;  %3724 = vmatprep.mubr.msk.f32.mxu0 %vm1698_vm13, %v1662_v3  ;;  %v1020_v15 = vrot.slane %v4984_v47, 4  ;;  %v1532_v24 = vsel %vm1529_vm8, %v1499_v12, %v4693_v18  ;;  %v1566_v55 = vsel %vm1562_vm9, %v1533_v27, %v4865_v35  ;;  %v1197_v51 = vrot.slane %v4984_v47, 5  ;;  %v5037_v27 = vld [vmem:[#allocation2 + $0x118] sm:$0x3f] }
 0x14f   : > { %3725 = vmatmul.mubr.msk.f32.vlgmr.msra.gmra.mxu0 %vm1698_vm13, %v1663_v7  ;;  %v1054_v33 = vpop.permute.xlu1 %1053  ;;  %v1565_v40 = vsel %vm1562_vm9, %v1532_v24, %v4874_v46  ;;  %v846_v37 = vrot.slane %v5029_v49, 3  ;;  %v1371_v6 = vrot.slane %v4967_v28, 6  ;;  %v1372_v20 = vrot.slane %v4970_v2, 6 }
 0x150   : > { %v1052_v52 = vpop.permute.xlu0 %1051  ;;  %v1021_v1 = vsel %vm966_vm5, %v1018_v63, %v1020_v15  ;;  %v1599_v3 = vsel %vm1595_vm10, %v1566_v55, %v1054_v33  ;;  %v3893_v55 = vld [vmem:[#allocation2 + $0x38] sm:$0xff] }
 0x151   : > { %910 = vrot.lane.b32.xlu1 %v842_v16, %s3983_s8  ;;  %v1598_v18 = vsel %vm1595_vm10, %v1565_v40, %v1052_v52  ;;  %v1198_v52 = vsel %vm1143_vm6, %v1195_v62, %v1197_v51  ;;  %v3894_v51 = vld [vmem:[#allocation2 + $0x30] sm:$0xff] }
 0x152   : > { %1437 = vrot.lane.b32.xlu0 %v1368_v45, %s3986_s30  ;;  %v1194_v45 = vrot.slane %v4967_v28, 5 }
 0x153   : > { %v1231_v42 = vpop.permute.xlu1 %1230 }
 0x154   : > { %v1229_v7 = vpop.permute.xlu0 %1228  ;;  %v1632_v16 = vsel %vm1628_vm11, %v1599_v3, %v1231_v42  ;;  %v1373_v3 = vsel %vm1320_vm7, %v1371_v6, %v1372_v20  ;;  %v1202_v6 = vrot.slane %v5037_v27, 5 }
 0x155   : > { %912 = vrot.lane.b32.xlu1 %v844_v60, %s3983_s8  ;;  %v1631_v5 = vsel %vm1628_vm11, %v1598_v18, %v1229_v7  ;;  %v5026_v60 = vld [vmem:[#allocation2 + $0x108] sm:$0xff]  ;;  %v848_v7 = vrot.slane %v5037_v27, 3  ;;  %v1501_v18 = vsel %vm273_vm0, %v3894_v51, %v4514_v50  ;;  %v1023_v50 = vrot.slane %v5029_v49, 4  ;;  %v3897_v51 = vld [vmem:[#allocation2 + $0x50] sm:$0xff] }
 0x156   : > { %1439 = vrot.lane.b32.xlu0 %v1370_v56, %s3986_s30  ;;  %v845_v63 = vrot.slane %v5026_v60, 3  ;;  %v1196_v56 = vsel %vm1143_vm6, %v1194_v45, %v1195_v62  ;;  %v1374_v62 = vrot.slane %v4984_v47, 6 }
 0x157   : > { %v1408_v35 = vpop.permute.xlu1 %1407 }
 0x158   : > { %v1665_v46 = vsel %vm1661_vm12, %v1632_v16, %v1408_v35  ;;  %v1406_v33 = vpop.permute.xlu0 %1405  ;;  %v847_v24 = vsel %vm789_vm4, %v845_v63, %v846_v37 }
 0x159   : > { %v1664_v15 = vsel %vm1661_vm12, %v1631_v5, %v1406_v33  ;;  %1089 = vrot.lane.b32.xlu1 %v1021_v1, %s3984_s23  ;;  %v1502_v1 = vsel %vm273_vm0, %v3893_v55, %v4510_v23  ;;  %v849_v23 = vsel %vm789_vm4, %v846_v37, %v848_v7  ;;  %v1375_v33 = vsel %vm1320_vm7, %v1372_v20, %v1374_v62 }
 0x15a   : > { %1087 = vrot.lane.b32.xlu0 %v1019_v29, %s3984_s23  ;;  %3727 = vmatprep.mubr.msk.f32.mxu0 %vm1698_vm13, %v1664_v15  ;;  %v1535_v16 = vsel %vm1529_vm8, %v1502_v1, %v4700_v14  ;;  %v1534_v29 = vsel %vm1529_vm8, %v1501_v18, %v4704_v13  ;;  %v1025_v14 = vrot.slane %v5037_v27, 4  ;;  %v1022_v15 = vrot.slane %v5026_v60, 4  ;;  %v5081_v1 = vld [vmem:[#allocation2 + $0x120] sm:$0xff] }
 0x15b   : > { %3728 = vmatmul.mubr.msk.f32.gmra.mxu0 %vm1698_vm13, %v1665_v46  ;;  %v1058_v42 = vpop.permute.xlu1 %1057  ;;  %v1568_v45 = vsel %vm1562_vm9, %v1535_v16, %v4880_v36  ;;  %v1567_v47 = vsel %vm1562_vm9, %v1534_v29, %v4883_v0  ;;  %v1199_v7 = vrot.slane %v5026_v60, 5  ;;  %v1504_v18 = vsel %vm273_vm0, %v3897_v51, %v4521_v34  ;;  %v3900_v51 = vld [vmem:[#allocation2 + $0x68] sm:$0xff] }
 0x15c   : > { %v1056_v12 = vpop.permute.xlu0 %1055  ;;  %v1601_v5 = vsel %vm1595_vm10, %v1568_v45, %v1058_v42  ;;  %v1026_v42 = vsel %vm966_vm5, %v1023_v50, %v1025_v14  ;;  %v1376_v29 = vrot.slane %v5026_v60, 6  ;;  %v1377_v45 = vrot.slane %v5029_v49, 6 }
 0x15d   : > { %1266 = vrot.lane.b32.xlu1 %v1198_v52, %s3985_s29  ;;  %v1600_v13 = vsel %vm1595_vm10, %v1567_v47, %v1056_v12  ;;  %v1024_v12 = vsel %vm966_vm5, %v1022_v15, %v1023_v50 }
 0x15e   : > { %1264 = vrot.lane.b32.xlu0 %v1196_v56, %s3985_s29  ;;  %v1200_v56 = vrot.slane %v5029_v49, 5  ;;  %v1378_v15 = vsel %vm1320_vm7, %v1376_v29, %v1377_v45  ;;  %v3901_v29 = vld [vmem:[#allocation2 + $0x60] sm:$0xff] }
 0x15f   : > { %v1235_v40 = vpop.permute.xlu1 %1234 }
 0x160   : > { %v1233_v35 = vpop.permute.xlu0 %1232  ;;  %v1634_v46 = vsel %vm1628_vm11, %v1601_v5, %v1235_v40  ;;  %v1203_v55 = vsel %vm1143_vm6, %v1200_v56, %v1202_v6  ;;  %v850_v40 = vrot.slane %v5081_v1, 3  ;;  %v1537_v5 = vsel %vm1529_vm8, %v1504_v18, %v4711_v4 }
 0x161   : > { %914 = vrot.lane.b32.xlu1 %v847_v24, %s3983_s8  ;;  %v1633_v52 = vsel %vm1628_vm11, %v1600_v13, %v1233_v35  ;;  %v1201_v35 = vsel %vm1143_vm6, %v1199_v7, %v1200_v56  ;;  %v1570_v34 = vsel %vm1562_vm9, %v1537_v5, %v4891_v30  ;;  %v1506_v18 = vsel %vm273_vm0, %v3900_v51, %v4532_v41 }
 0x162   : > { %1441 = vrot.lane.b32.xlu0 %v1373_v3, %s3986_s30  ;;  %v5084_v3 = vld [vmem:[#allocation2 + $0x128] sm:$0xff] }
 0x163   : > { %v1412_v36 = vpop.permute.xlu1 %1411  ;;  %v851_v62 = vrot.slane %v5084_v3, 3  ;;  %v1028_v56 = vrot.slane %v5084_v3, 4 }
 0x164   : > { %v1667_v0 = vsel %vm1661_vm12, %v1634_v46, %v1412_v36  ;;  %v1410_v63 = vpop.permute.xlu0 %1409  ;;  %v5106_v36 = vld [vmem:[#allocation2 + $0x130] sm:$0x3f] }
 0x165   : > { %v1666_v37 = vsel %vm1661_vm12, %v1633_v52, %v1410_v63  ;;  %916 = vrot.lane.b32.xlu1 %v849_v23, %s3983_s8  ;;  %v3898_v23 = vld [vmem:[#allocation2 + $0x48] sm:$0xff]  ;;  %v853_v4 = vrot.slane %v5106_v36, 3  ;;  %v1379_v52 = vrot.slane %v5037_v27, 6  ;;  %v1030_v6 = vrot.slane %v5106_v36, 4 }
 0x166   : > { %1443 = vrot.lane.b32.xlu0 %v1375_v33, %s3986_s30  ;;  %3730 = vmatprep.mubr.msk.f32.mxu0 %vm1698_vm13, %v1666_v37  ;;  %v1503_v47 = vsel %vm273_vm0, %v3898_v23, %v4525_v31  ;;  %v852_v31 = vsel %vm789_vm4, %v850_v40, %v851_v62  ;;  %v1204_v40 = vrot.slane %v5081_v1, 5  ;;  %v1539_v23 = vsel %vm1529_vm8, %v1506_v18, %v4722_v39  ;;  %v5149_v39 = vld [vmem:[#allocation2 + $0x138] sm:$0xff] }
 0x167   : > { %3731 = vmatmul.mubr.msk.f32.gmra.mxu0 %vm1698_vm13, %v1667_v0  ;;  %v1062_v20 = vpop.permute.xlu1 %1061  ;;  %v1536_v14 = vsel %vm1529_vm8, %v1503_v47, %v4715_v32 }
 0x168   : > { %v1060_v24 = vpop.permute.xlu0 %1059  ;;  %v1569_v13 = vsel %vm1562_vm9, %v1536_v14, %v4897_v53  ;;  %v1603_v46 = vsel %vm1595_vm10, %v1570_v34, %v1062_v20  ;;  %v1380_v20 = vsel %vm1320_vm7, %v1377_v45, %v1379_v52  ;;  %v1505_v45 = vsel %vm273_vm0, %v3901_v29, %v4536_v44 }
 0x169   : > { %1093 = vrot.lane.b32.xlu1 %v1026_v42, %s3984_s23  ;;  %v1602_v32 = vsel %vm1595_vm10, %v1569_v13, %v1060_v24  ;;  %v854_v42 = vsel %vm789_vm4, %v851_v62, %v853_v4  ;;  %v1205_v24 = vrot.slane %v5084_v3, 5  ;;  %v1031_v62 = vsel %vm966_vm5, %v1028_v56, %v1030_v6  ;;  %v5152_v13 = vld [vmem:[#allocation2 + $0x140] sm:$0xff] }
 0x16a   : > { %1091 = vrot.lane.b32.xlu0 %v1024_v12, %s3984_s23  ;;  %v1027_v12 = vrot.slane %v5081_v1, 4  ;;  %v1538_v5 = vsel %vm1529_vm8, %v1505_v45, %v4726_v9  ;;  %v855_v9 = vrot.slane %v5149_v39, 3 }
 0x16b   : > { %v1239_v16 = vpop.permute.xlu1 %1238  ;;  %v1206_v14 = vsel %vm1143_vm6, %v1204_v40, %v1205_v24  ;;  %v1571_v34 = vsel %vm1562_vm9, %v1538_v5, %v4907_v61  ;;  %v1382_v61 = vrot.slane %v5084_v3, 6 }
 0x16c   : > { %v1237_v50 = vpop.permute.xlu0 %1236  ;;  %v1636_v33 = vsel %vm1628_vm11, %v1603_v46, %v1239_v16 }
 0x16d   : > { %1270 = vrot.lane.b32.xlu1 %v1203_v55, %s3985_s29  ;;  %v1635_v53 = vsel %vm1628_vm11, %v1602_v32, %v1237_v50  ;;  %v1207_v55 = vrot.slane %v5106_v36, 5  ;;  %v1572_v50 = vsel %vm1562_vm9, %v1539_v23, %v4903_v19  ;;  %v856_v19 = vrot.slane %v5152_v13, 3 }
 0x16e   : > { %1268 = vrot.lane.b32.xlu0 %v1201_v35, %s3985_s29  ;;  %v1029_v35 = vsel %vm966_vm5, %v1027_v12, %v1028_v56  ;;  %v1381_v32 = vrot.slane %v5081_v1, 6  ;;  %v1384_v56 = vrot.slane %v5106_v36, 6  ;;  %v1032_v36 = vrot.slane %v5149_v39, 4 }
 0x16f   : > { %v1416_v30 = vpop.permute.xlu1 %1415  ;;  %v1208_v41 = vsel %vm1143_vm6, %v1205_v24, %v1207_v55 }
 0x170   : > { %v1669_v0 = vsel %vm1661_vm12, %v1636_v33, %v1416_v30  ;;  %v1414_v63 = vpop.permute.xlu0 %1413  ;;  %v1385_v40 = vsel %vm1320_vm7, %v1382_v61, %v1384_v56  ;;  %v3910_v56 = vld [vmem:[#allocation2 + $0x90] sm:$0xff] }
 0x171   : > { %v1668_v37 = vsel %vm1661_vm12, %v1635_v53, %v1414_v63  ;;  %918 = vrot.lane.b32.xlu1 %v852_v31, %s3983_s8  ;;  %v857_v53 = vsel %vm789_vm4, %v855_v9, %v856_v19  ;;  %v5208_v9 = vld [vmem:[#allocation2 + $0x150] sm:$0xff] }
 0x172   : > { %1445 = vrot.lane.b32.xlu0 %v1378_v15, %s3986_s30  ;;  %3733 = vmatprep.mubr.msk.f32.mxu0 %vm1698_vm13, %v1668_v37 }
 0x173   : > { %3734 = vmatmul.mubr.msk.f32.gmra.mxu0 %vm1698_vm13, %v1669_v0  ;;  %v1066_v27 = vpop.permute.xlu1 %1065  ;;  %v5166_v0 = vld [vmem:[#allocation2 + $0x148] sm:$0x3f] }
 0x174   : > { %v1064_v7 = vpop.permute.xlu0 %1063  ;;  %v1605_v44 = vsel %vm1595_vm10, %v1572_v50, %v1066_v27  ;;  %v858_v63 = vrot.slane %v5166_v0, 3  ;;  %v1033_v27 = vrot.slane %v5152_v13, 4  ;;  %v1209_v50 = vrot.slane %v5149_v39, 5 }
 0x175   : > { %920 = vrot.lane.b32.xlu1 %v854_v42, %s3983_s8  ;;  %v1604_v46 = vsel %vm1595_vm10, %v1571_v34, %v1064_v7  ;;  %v1383_v42 = vsel %vm1320_vm7, %v1381_v32, %v1382_v61  ;;  %v3905_v7 = vld [vmem:[#allocation2 + $0x80] sm:$0xff]  ;;  %v1386_v61 = vrot.slane %v5149_v39, 6 }
 0x176   : > { %1447 = vrot.lane.b32.xlu0 %v1380_v20, %s3986_s30  ;;  %v1035_v20 = vrot.slane %v5166_v0, 4  ;;  %v859_v12 = vsel %vm789_vm4, %v856_v19, %v858_v63  ;;  %v1508_v24 = vsel %vm273_vm0, %v3905_v7, %v4543_v54  ;;  %v1034_v5 = vsel %vm966_vm5, %v1032_v36, %v1033_v27  ;;  %v3911_v36 = vld [vmem:[#allocation2 + $0x98] sm:$0xff] }
 0x177   : > { %v1243_v16 = vpop.permute.xlu1 %1242  ;;  %v1541_v18 = vsel %vm1529_vm8, %v1508_v24, %v4733_v17  ;;  %v1212_v17 = vrot.slane %v5166_v0, 5  ;;  %v860_v19 = vrot.slane %v5208_v9, 3 }
 0x178   : > { %v1241_v47 = vpop.permute.xlu0 %1240  ;;  %v1638_v31 = vsel %vm1628_vm11, %v1605_v44, %v1243_v16  ;;  %v1574_v29 = vsel %vm1562_vm9, %v1541_v18, %v4918_v48  ;;  %v1036_v54 = vsel %vm966_vm5, %v1033_v27, %v1035_v20 }
 0x179   : > { %1097 = vrot.lane.b32.xlu1 %v1031_v62, %s3984_s23  ;;  %v1637_v33 = vsel %vm1628_vm11, %v1604_v46, %v1241_v47  ;;  %v3906_v62 = vld [vmem:[#allocation2 + $0x78] sm:$0xff] }
 0x17a   : > { %1095 = vrot.lane.b32.xlu0 %v1029_v35, %s3984_s23  ;;  %v1507_v51 = vsel %vm273_vm0, %v3906_v62, %v4547_v10  ;;  %v1210_v10 = vrot.slane %v5152_v13, 5  ;;  %v5211_v46 = vld [vmem:[#allocation2 + $0x158] sm:$0xff]  ;;  %v1510_v62 = vsel %vm273_vm0, %v3911_v36, %v4554_v26 }
 0x17b   : > { %v1420_v4 = vpop.permute.xlu1 %1419  ;;  %v1540_v35 = vsel %vm1529_vm8, %v1507_v51, %v4737_v59  ;;  %v1038_v24 = vrot.slane %v5211_v46, 4  ;;  %v1543_v18 = vsel %vm1529_vm8, %v1510_v62, %v4744_v11  ;;  %v1215_v26 = vrot.slane %v5211_v46, 5 }
 0x17c   : > { %v1671_v30 = vsel %vm1661_vm12, %v1638_v31, %v1420_v4  ;;  %v1418_v15 = vpop.permute.xlu0 %1417  ;;  %v1573_v45 = vsel %vm1562_vm9, %v1540_v35, %v4923_v43  ;;  %v1213_v44 = vsel %vm1143_vm6, %v1210_v10, %v1212_v17  ;;  %v861_v31 = vrot.slane %v5211_v46, 3 }
 0x17d   : > { %v1670_v52 = vsel %vm1661_vm12, %v1637_v33, %v1418_v15  ;;  %1274 = vrot.lane.b32.xlu1 %v1208_v41, %s3985_s29  ;;  %v1211_v32 = vsel %vm1143_vm6, %v1209_v50, %v1210_v10  ;;  %v1387_v33 = vrot.slane %v5152_v13, 6  ;;  %v1576_v35 = vsel %vm1562_vm9, %v1543_v18, %v4931_v8  ;;  %v5266_v50 = vld [vmem:[#allocation2 + $0x170] sm:$0xff] }
 0x17e   : > { %1272 = vrot.lane.b32.xlu0 %v1206_v14, %s3985_s29  ;;  %3736 = vmatprep.mubr.msk.f32.mxu0 %vm1698_vm13, %v1670_v52  ;;  %v862_v15 = vsel %vm789_vm4, %v860_v19, %v861_v31  ;;  %v5221_v52 = vld [vmem:[#allocation2 + $0x160] sm:$0x3f]  ;;  %v1214_v10 = vrot.slane %v5208_v9, 5  ;;  %v1220_v18 = vrot.slane %v5266_v50, 5 }
 0x17f   : > { %3737 = vmatmul.mubr.msk.f32.gmra.mxu0 %vm1698_vm13, %v1671_v30  ;;  %v1070_v37 = vpop.permute.xlu1 %1069 }
 0x180   : > { %v1068_v6 = vpop.permute.xlu0 %1067  ;;  %v1607_v23 = vsel %vm1595_vm10, %v1574_v29, %v1070_v37  ;;  %v1388_v37 = vsel %vm1320_vm7, %v1386_v61, %v1387_v33 }
 0x181   : > { %922 = vrot.lane.b32.xlu1 %v857_v53, %s3983_s8  ;;  %v1606_v59 = vsel %vm1595_vm10, %v1573_v45, %v1068_v6  ;;  %v863_v53 = vrot.slane %v5221_v52, 3  ;;  %v1509_v6 = vsel %vm273_vm0, %v3910_v56, %v4558_v22 }
 0x182   : > { %1449 = vrot.lane.b32.xlu0 %v1383_v42, %s3986_s30  ;;  %v1389_v42 = vrot.slane %v5166_v0, 6  ;;  %v1542_v20 = vsel %vm1529_vm8, %v1509_v6, %v4748_v58  ;;  %v1040_v0 = vrot.slane %v5221_v52, 4  ;;  %v1037_v58 = vrot.slane %v5208_v9, 4 }
 0x183   : > { %v1247_v55 = vpop.permute.xlu1 %1246  ;;  %v864_v7 = vsel %vm789_vm4, %v861_v31, %v863_v53 }
 0x184   : > { %v1245_v16 = vpop.permute.xlu0 %1244  ;;  %v1640_v47 = vsel %vm1628_vm11, %v1607_v23, %v1247_v55  ;;  %v1041_v29 = vsel %vm966_vm5, %v1038_v24, %v1040_v0  ;;  %v1039_v23 = vsel %vm966_vm5, %v1037_v58, %v1038_v24  ;;  %v6523_v24 = vld [vmem:[#allocation7_spill] sm:$0xff]  ;;  %v6525_v58 = vld [vmem:[#allocation24_spill] sm:$0xff] }
 0x185   : > { %924 = vrot.lane.b32.xlu1 %v859_v12, %s3983_s8  ;;  %v1639_v41 = vsel %vm1628_vm11, %v1606_v59, %v1245_v16  ;;  %v1575_v12 = vsel %vm1562_vm9, %v1542_v20, %v4934_v21  ;;  %v6524_v0 = vld [vmem:[#allocation43_spill] sm:$0xff] }
 0x186   : > { %1451 = vrot.lane.b32.xlu0 %v1385_v40, %s3986_s30  ;;  %v1390_v40 = vsel %vm1320_vm7, %v1387_v33, %v1389_v42 }
 0x187   : > { %v1424_v48 = vpop.permute.xlu1 %1423 }
 0x188   : > { %v1673_v43 = vsel %vm1661_vm12, %v1640_v47, %v1424_v48  ;;  %v1422_v14 = vpop.permute.xlu0 %1421  ;;  %v5263_v48 = vld [vmem:[#allocation2 + $0x168] sm:$0xff] }
 0x189   : > { %v1672_v34 = vsel %vm1661_vm12, %v1639_v41, %v1422_v14  ;;  %1101 = vrot.lane.b32.xlu1 %v1036_v54, %s3984_s23  ;;  %v1217_v54 = vrot.slane %v5221_v52, 5  ;;  %v866_v41 = vrot.slane %v5266_v50, 3  ;;  %v1216_v14 = vsel %vm1143_vm6, %v1214_v10, %v1215_v26 }
 0x18a   : > { %1099 = vrot.lane.b32.xlu0 %v1034_v5, %s3984_s23  ;;  %3739 = vmatprep.mubr.msk.f32.mxu0 %vm1698_vm13, %v1672_v34  ;;  %v865_v5 = vrot.slane %v5263_v48, 3  ;;  %v1391_v34 = vrot.slane %v5208_v9, 6 }
 0x18b   : > { %3740 = vmatmul.mubr.msk.f32.gmra.mxu0 %vm1698_vm13, %v1673_v43  ;;  %v1074_v4 = vpop.permute.xlu1 %1073  ;;  %v1218_v47 = vsel %vm1143_vm6, %v1215_v26, %v1217_v54  ;;  %v1219_v54 = vrot.slane %v5263_v48, 5 }
 0x18c   : > { %v1072_v30 = vpop.permute.xlu0 %1071  ;;  %v1609_v45 = vsel %vm1595_vm10, %v1576_v35, %v1074_v4  ;;  %v867_v31 = vsel %vm789_vm4, %v865_v5, %v866_v41  ;;  %v3914_v4 = vld [vmem:[#allocation2 + $0x178] sm:$0x3f]  ;;  %v1396_v5 = vrot.slane %v5263_v48, 6 }
 0x18d   : > { %1278 = vrot.lane.b32.xlu1 %v1213_v44, %s3985_s29  ;;  %v1608_v55 = vsel %vm1595_vm10, %v1575_v12, %v1072_v30  ;;  %v1392_v44 = vrot.slane %v5211_v46, 6  ;;  %v1394_v30 = vrot.slane %v5221_v52, 6  ;;  %v1045_v20 = vrot.slane %v3914_v4, 4 }
 0x18e   : > { %1276 = vrot.lane.b32.xlu0 %v1211_v32, %s3985_s29  ;;  %v868_v32 = vrot.slane %v3914_v4, 3 }
 0x18f   : > { %v1251_v63 = vpop.permute.xlu1 %1250  ;;  %v1393_v33 = vsel %vm1320_vm7, %v1391_v34, %v1392_v44 }
 0x190   : > { %v1249_v27 = vpop.permute.xlu0 %1248  ;;  %v1642_v17 = vsel %vm1628_vm11, %v1609_v45, %v1251_v63  ;;  %v869_v6 = vsel %vm789_vm4, %v866_v41, %v868_v32  ;;  %v6528_v32 = vld [vmem:[#allocation27_spill] sm:$0xff] }
 0x191   : > { %926 = vrot.lane.b32.xlu1 %v862_v15, %s3983_s8  ;;  %v1641_v21 = vsel %vm1628_vm11, %v1608_v55, %v1249_v27  ;;  %v6521_v15 = vld [vmem:[#allocation42_spill] sm:$0xff]  ;;  %v1043_v27 = vrot.slane %v5266_v50, 4  ;;  %v1512_v55 = vsel %vm273_vm0, %v6524_v0, %v6523_v24 }
 0x192   : > { %1453 = vrot.lane.b32.xlu0 %v1388_v37, %s3986_s30  ;;  %v1511_v53 = vsel %vm273_vm0, %v6521_v15, %v4569_v38  ;;  %v6522_v37 = vld [vmem:[#allocation25_spill] sm:$0xff]  ;;  %v1395_v38 = vsel %vm1320_vm7, %v1392_v44, %v1394_v30  ;;  %v1545_v36 = vsel %vm1529_vm8, %v1512_v55, %v6525_v58  ;;  %v5348_v55 = vld [vmem:[#allocation3 + $0x20] sm:$0xff] }
 0x193   : > { %v899_v22 = vpop.permute.xlu1 %898  ;;  %v1544_v42 = vsel %vm1529_vm8, %v1511_v53, %v6522_v37  ;;  %v6526_v44 = vld [vmem:[#allocation9_spill] sm:$0xff]  ;;  %v6529_v37 = vld [vmem:[#allocation8_spill] sm:$0xff] }
 0x194   : > { %v1426_v51 = vpop.permute.xlu0 %1425  ;;  %v1577_v56 = vsel %vm1562_vm9, %v1544_v42, %v899_v22  ;;  %v5327_v30 = vld [vmem:[#allocation3 + $0x18] sm:$0xff]  ;;  %v6530_v42 = vld [vmem:[#allocation44_spill] sm:$0xff] }
 0x195   : > { %v1674_v16 = vsel %vm1661_vm12, %v1641_v21, %v1426_v51  ;;  %928 = vrot.lane.b32.xlu1 %v864_v7, %s3983_s8  ;;  %v1042_v7 = vrot.slane %v5263_v48, 4  ;;  %v1046_v51 = vsel %vm966_vm5, %v1043_v27, %v1045_v20  ;;  %v6531_v20 = vld [vmem:[#allocation26_spill] sm:$0xff] }
 0x196   : > { %1455 = vrot.lane.b32.xlu0 %v1390_v40, %s3986_s30  ;;  %3742 = vmatprep.mubr.msk.f32.mxu0 %vm1698_vm13, %v1674_v16  ;;  %v1222_v16 = vrot.slane %v3914_v4, 5 }
 0x197   : > { %v901_v11 = vpop.permute.xlu1 %900  ;;  %v1044_v26 = vsel %vm966_vm5, %v1042_v7, %v1043_v27  ;;  %v5345_v7 = vld [vmem:[#allocation3 + $0x28] sm:$0xff] }
 0x198   : > { %v1428_v8 = vpop.permute.xlu0 %1427  ;;  %v1578_v21 = vsel %vm1562_vm9, %v1545_v36, %v901_v11  ;;  %v1223_v10 = vsel %vm1143_vm6, %v1220_v18, %v1222_v16 }
 0x199   : > { %v1675_v59 = vsel %vm1661_vm12, %v1642_v17, %v1428_v8  ;;  %1105 = vrot.lane.b32.xlu1 %v1041_v29, %s3984_s23  ;;  %v1397_v17 = vrot.slane %v5266_v50, 6  ;;  %v1399_v8 = vrot.slane %v3914_v4, 6 }
 0x19a   : > { %1103 = vrot.lane.b32.xlu0 %v1039_v23, %s3984_s23  ;;  %3743 = vmatmul.mubr.msk.f32.gmra.mxu0 %vm1698_vm13, %v1675_v59 }
 0x19b   : > { %v1078_v43 = vpop.permute.xlu1 %1077  ;;  %v1398_v34 = vsel %vm1320_vm7, %v1396_v5, %v1397_v17 }
 0x19c   : > { %v1076_v19 = vpop.permute.xlu0 %1075  ;;  %v1611_v35 = vsel %vm1595_vm10, %v1578_v21, %v1078_v43  ;;  %v1400_v43 = vsel %vm1320_vm7, %v1397_v17, %v1399_v8  ;;  %v6535_v8 = vld [vmem:[#allocation28_spill] sm:$0xff] }
 0x19d   : > { %1282 = vrot.lane.b32.xlu1 %v1218_v47, %s3985_s29  ;;  %v1610_v52 = vsel %vm1595_vm10, %v1577_v56, %v1076_v19  ;;  %v1221_v47 = vsel %vm1143_vm6, %v1219_v54, %v1220_v18  ;;  %v6527_v19 = vld [vmem:[#allocation45_spill] sm:$0xff]  ;;  %v1514_v56 = vsel %vm273_vm0, %v6530_v42, %v6529_v37  ;;  %v6538_v42 = vld [vmem:[#allocation12_spill] sm:$0xff] }
 0x19e   : > { %1280 = vrot.lane.b32.xlu0 %v1216_v14, %s3985_s29 }
 0x19f   : > { %v1255_v61 = vpop.permute.xlu1 %1254 }
 0x1a0   : > { %v1253_v63 = vpop.permute.xlu0 %1252  ;;  %v1644_v45 = vsel %vm1628_vm11, %v1611_v35, %v1255_v61  ;;  %v6533_v35 = vld [vmem:[#allocation29_spill] sm:$0xff] }
 0x1a1   : > { %930 = vrot.lane.b32.xlu1 %v867_v31, %s3983_s8  ;;  %v1643_v22 = vsel %vm1628_vm11, %v1610_v52, %v1253_v63  ;;  %v1513_v31 = vsel %vm273_vm0, %v6527_v19, %v6526_v44  ;;  %v5330_v63 = vld [vmem:[#allocation3 + $0x10] sm:$0xff]  ;;  %v1547_v52 = vsel %vm1529_vm8, %v1514_v56, %v6531_v20  ;;  %v1518_v56 = vsel %vm273_vm0, %v4970_v2, %v6538_v42  ;;  %v6539_v20 = vld [vmem:[#allocation30_spill] sm:$0xff] }
 0x1a2   : > { %1457 = vrot.lane.b32.xlu0 %v1393_v33, %s3986_s30  ;;  %v1546_v61 = vsel %vm1529_vm8, %v1513_v31, %v6528_v32  ;;  %v6536_v31 = vld [vmem:[#allocation13_spill] sm:$0xff]  ;;  %v6547_v42 = vld [vmem:[#allocation34_spill] sm:$0xff] }
 0x1a3   : > { %v903_v12 = vpop.permute.xlu1 %902 }
 0x1a4   : > { %v1430_v40 = vpop.permute.xlu0 %1429  ;;  %v1579_v33 = vsel %vm1562_vm9, %v1546_v61, %v903_v12  ;;  %v6537_v61 = vld [vmem:[#allocation31_spill] sm:$0xff] }
 0x1a5   : > { %v1676_v62 = vsel %vm1661_vm12, %v1643_v22, %v1430_v40  ;;  %932 = vrot.lane.b32.xlu1 %v869_v6, %s3983_s8 }
 0x1a6   : > { %1459 = vrot.lane.b32.xlu0 %v1395_v38, %s3986_s30  ;;  %3745 = vmatprep.mubr.msk.f32.mxu0 %vm1698_vm13, %v1676_v62 }
 0x1a7   : > { %v905_v29 = vpop.permute.xlu1 %904 }
 0x1a8   : > { %v1432_v23 = vpop.permute.xlu0 %1431  ;;  %v1580_v38 = vsel %vm1562_vm9, %v1547_v52, %v905_v29  ;;  %v1551_v52 = vsel %vm1529_vm8, %v1518_v56, %v6539_v20 }
 0x1a9   : > { %v1677_v11 = vsel %vm1661_vm12, %v1644_v45, %v1432_v23  ;;  %1109 = vrot.lane.b32.xlu1 %v1046_v51, %s3984_s23  ;;  %v6532_v51 = vld [vmem:[#allocation11_spill] sm:$0xff]  ;;  %v6534_v23 = vld [vmem:[#allocation10_spill] sm:$0xff] }
 0x1aa   : > { %1107 = vrot.lane.b32.xlu0 %v1044_v26, %s3984_s23  ;;  %3746 = vmatmul.mubr.msk.f32.gmra.mxu0 %vm1698_vm13, %v1677_v11  ;;  %v1515_v18 = vsel %vm273_vm0, %v4912_v57, %v6532_v51  ;;  %v1516_v11 = vsel %vm273_vm0, %v4915_v25, %v6534_v23 }
 0x1ab   : > { %v1082_v59 = vpop.permute.xlu1 %1081  ;;  %v1548_v29 = vsel %vm1529_vm8, %v1515_v18, %v6533_v35  ;;  %v6541_v18 = vld [vmem:[#allocation33_spill] sm:$0xff] }
 0x1ac   : > { %v1080_v41 = vpop.permute.xlu0 %1079  ;;  %v1613_v24 = vsel %vm1595_vm10, %v1580_v38, %v1082_v59  ;;  %v1549_v59 = vsel %vm1529_vm8, %v1516_v11, %v6535_v8 }
 0x1ad   : > { %1286 = vrot.lane.b32.xlu1 %v1223_v10, %s3985_s29  ;;  %v1612_v15 = vsel %vm1595_vm10, %v1579_v33, %v1080_v41 }
 0x1ae   : > { %1284 = vrot.lane.b32.xlu0 %v1221_v47, %s3985_s29 }
 0x1af   : > { %v1259_v14 = vpop.permute.xlu1 %1258 }
 0x1b0   : > { %v1257_v4 = vpop.permute.xlu0 %1256  ;;  %v1646_v22 = vsel %vm1628_vm11, %v1613_v24, %v1259_v14 }
 0x1b1   : > { %1463 = vrot.lane.b32.xlu1 %v1400_v43, %s3986_s30  ;;  %v1645_v6 = vsel %vm1628_vm11, %v1612_v15, %v1257_v4  ;;  %v1517_v4 = vsel %vm273_vm0, %v4967_v28, %v6536_v31 }
 0x1b2   : > { %1461 = vrot.lane.b32.xlu0 %v1398_v34, %s3986_s30  ;;  %v1550_v33 = vsel %vm1529_vm8, %v1517_v4, %v6537_v61 }
 0x1b3   : > { %v907_v53 = vpop.permute.xlu1 %906 }
 0x1b4   : > { %v1434_v27 = vpop.permute.xlu0 %1433  ;;  %v1581_v26 = vsel %vm1562_vm9, %v1548_v29, %v907_v53 }
 0x1b5   : > { %v1678_v12 = vsel %vm1661_vm12, %v1645_v6, %v1434_v27  ;;  %2147 = vrot.lane.b32.xlu1 %v5327_v30, %s3981_s6 }
 0x1b6   : > { %3748 = vmatprep.mubr.msk.f32.mxu0 %vm1698_vm13, %v1678_v12  ;;  %2145 = vrot.lane.b32.xlu0 %v5330_v63, %s3981_s6 }
 0x1b7   : > { %v909_v0 = vpop.permute.xlu1 %908 }
 0x1b8   : > { %v1436_v40 = vpop.permute.xlu0 %1435  ;;  %v1582_v47 = vsel %vm1562_vm9, %v1549_v59, %v909_v0 }
 0x1b9   : > { %v1679_v58 = vsel %vm1661_vm12, %v1646_v22, %v1436_v40  ;;  %2151 = vrot.lane.b32.xlu1 %v5345_v7, %s3981_s6 }
 0x1ba   : > { %3749 = vmatmul.mubr.msk.f32.gmra.mxu0 %vm1698_vm13, %v1679_v58  ;;  %2149 = vrot.lane.b32.xlu0 %v5348_v55, %s3981_s6 }
 0x1bb   : > { %v1086_v36 = vpop.permute.xlu1 %1085 }
 0x1bc   : > { %v1084_v62 = vpop.permute.xlu0 %1083  ;;  %v1615_v5 = vsel %vm1595_vm10, %v1582_v47, %v1086_v36 }
 0x1bd   : > { %v1614_v54 = vsel %vm1595_vm10, %v1581_v26, %v1084_v62  ;;  %v6540_v62 = vld [vmem:[#allocation15_spill] sm:$0xff] }
 0x1bf   : > { %v1263_v21 = vpop.permute.xlu1 %1262 }
 0x1c0   : > { %v1261_v16 = vpop.permute.xlu0 %1260  ;;  %v1648_v43 = vsel %vm1628_vm11, %v1615_v5, %v1263_v21  ;;  %v1519_v21 = vsel %vm273_vm0, %v5026_v60, %v6540_v62 }
 0x1c1   : > { %v1647_v10 = vsel %vm1628_vm11, %v1614_v54, %v1261_v16  ;;  %v1552_v16 = vsel %vm1529_vm8, %v1519_v21, %v6541_v18  ;;  %v6542_v54 = vld [vmem:[#allocation14_spill] sm:$0xff] }
 0x1c3   : > { %v911_v45 = vpop.permute.xlu1 %910 }
 0x1c4   : > { %v1438_v17 = vpop.permute.xlu0 %1437  ;;  %v1583_v15 = vsel %vm1562_vm9, %v1550_v33, %v911_v45  ;;  %v1520_v45 = vsel %vm273_vm0, %v5029_v49, %v6542_v54  ;;  %v6546_v33 = vld [vmem:[#allocation16_spill] sm:$0xff] }
 0x1c5   : > { %v1680_v57 = vsel %vm1661_vm12, %v1647_v10, %v1438_v17  ;;  %v6543_v10 = vld [vmem:[#allocation32_spill] sm:$0xff] }
 0x1c6   : > { %3751 = vmatprep.mubr.msk.f32.mxu0 %vm1698_vm13, %v1680_v57  ;;  %v1553_v17 = vsel %vm1529_vm8, %v1520_v45, %v6543_v10 }
 0x1c7   : > { %v913_v41 = vpop.permute.xlu1 %912 }
 0x1c8   : > { %v1440_v14 = vpop.permute.xlu0 %1439  ;;  %v1584_v12 = vsel %vm1562_vm9, %v1551_v52, %v913_v41 }
 0x1c9   : > { %v1681_v25 = vsel %vm1661_vm12, %v1648_v43, %v1440_v14 }
 0x1ca   : > { %3752 = vmatmul.mubr.msk.f32.gmra.mxu0 %vm1698_vm13, %v1681_v25  ;;  %v6544_v25 = vld [vmem:[#allocation17_spill] sm:$0xff] }
 0x1cb   : > { %v1090_v34 = vpop.permute.xlu1 %1089 }
 0x1cc   : > { %v1088_v44 = vpop.permute.xlu0 %1087  ;;  %v1617_v38 = vsel %vm1595_vm10, %v1584_v12, %v1090_v34  ;;  %v1521_v34 = vsel %vm273_vm0, %v5081_v1, %v6544_v25 }
 0x1cd   : > { %v1616_v53 = vsel %vm1595_vm10, %v1583_v15, %v1088_v44  ;;  %v1522_v15 = vsel %vm273_vm0, %v5084_v3, %v6546_v33 }
 0x1ce   : > { %v1555_v56 = vsel %vm1529_vm8, %v1522_v15, %v6547_v42 }
 0x1cf   : > { %v1267_v19 = vpop.permute.xlu1 %1266 }
 0x1d0   : > { %v1265_v32 = vpop.permute.xlu0 %1264  ;;  %v1650_v0 = vsel %vm1628_vm11, %v1617_v38, %v1267_v19  ;;  %v6545_v19 = vld [vmem:[#allocation35_spill] sm:$0xff] }
 0x1d1   : > { %v1649_v6 = vsel %vm1628_vm11, %v1616_v53, %v1265_v32  ;;  %v1554_v31 = vsel %vm1529_vm8, %v1521_v34, %v6545_v19 }
 0x1d3   : > { %v915_v37 = vpop.permute.xlu1 %914 }
 0x1d4   : > { %v1442_v27 = vpop.permute.xlu0 %1441  ;;  %v1585_v35 = vsel %vm1562_vm9, %v1552_v16, %v915_v37 }
 0x1d5   : > { %v1682_v28 = vsel %vm1661_vm12, %v1649_v6, %v1442_v27 }
 0x1d6   : > { %3754 = vmatprep.mubr.msk.f32.mxu0 %vm1698_vm13, %v1682_v28 }
 0x1d7   : > { %v917_v24 = vpop.permute.xlu1 %916 }
 0x1d8   : > { %v1444_v22 = vpop.permute.xlu0 %1443  ;;  %v1586_v8 = vsel %vm1562_vm9, %v1553_v17, %v917_v24 }
 0x1d9   : > { %v1683_v2 = vsel %vm1661_vm12, %v1650_v0, %v1444_v22  ;;  %v6548_v0 = vld [vmem:[#allocation19_spill] sm:$0xff] }
 0x1da   : > { %3755 = vmatmul.mubr.msk.f32.gmra.mxu0 %vm1698_vm13, %v1683_v2  ;;  %v1523_v22 = vsel %vm273_vm0, %v5149_v39, %v6548_v0  ;;  %v6558_v0 = vld [vmem:[#allocation40_spill] sm:$0xff] }
 0x1db   : > { %v1094_v40 = vpop.permute.xlu1 %1093 }
 0x1dc   : > { %v1092_v58 = vpop.permute.xlu0 %1091  ;;  %v1619_v59 = vsel %vm1595_vm10, %v1586_v8, %v1094_v40  ;;  %v6549_v40 = vld [vmem:[#allocation37_spill] sm:$0xff] }
 0x1dd   : > { %v1618_v29 = vsel %vm1595_vm10, %v1585_v35, %v1092_v58  ;;  %v1556_v58 = vsel %vm1529_vm8, %v1523_v22, %v6549_v40  ;;  %v6559_v40 = vld [vmem:[#allocation41_spill] sm:$0xff] }
 0x1df   : > { %v1271_v36 = vpop.permute.xlu1 %1270 }
 0x1e0   : > { %v1269_v51 = vpop.permute.xlu0 %1268  ;;  %v1652_v47 = vsel %vm1628_vm11, %v1619_v59, %v1271_v36 }
 0x1e1   : > { %v1651_v23 = vsel %vm1628_vm11, %v1618_v29, %v1269_v51  ;;  %v6550_v51 = vld [vmem:[#allocation18_spill] sm:$0xff]  ;;  %v6551_v29 = vld [vmem:[#allocation36_spill] sm:$0xff] }
 0x1e2   : > { %v1524_v18 = vsel %vm273_vm0, %v5152_v13, %v6550_v51 }
 0x1e3   : > { %v919_v26 = vpop.permute.xlu1 %918 }
 0x1e4   : > { %v1446_v11 = vpop.permute.xlu0 %1445  ;;  %v1587_v4 = vsel %vm1562_vm9, %v1554_v31, %v919_v26  ;;  %v1557_v26 = vsel %vm1529_vm8, %v1524_v18, %v6551_v29 }
 0x1e5   : > { %v1684_v60 = vsel %vm1661_vm12, %v1651_v23, %v1446_v11 }
 0x1e6   : > { %3757 = vmatprep.mubr.msk.f32.mxu0 %vm1698_vm13, %v1684_v60 }
 0x1e7   : > { %v921_v57 = vpop.permute.xlu1 %920 }
 0x1e8   : > { %v1448_v5 = vpop.permute.xlu0 %1447  ;;  %v1588_v6 = vsel %vm1562_vm9, %v1555_v56, %v921_v57  ;;  %v6552_v57 = vld [vmem:[#allocation21_spill] sm:$0xff] }
 0x1e9   : > { %v1685_v49 = vsel %vm1661_vm12, %v1652_v47, %v1448_v5  ;;  %v1525_v47 = vsel %vm273_vm0, %v5208_v9, %v6552_v57 }
 0x1ea   : > { %3758 = vmatmul.mubr.msk.f32.gmra.mxu0 %vm1698_vm13, %v1685_v49  ;;  %v6553_v49 = vld [vmem:[#allocation39_spill] sm:$0xff] }
 0x1eb   : > { %v1098_v41 = vpop.permute.xlu1 %1097 }
 0x1ec   : > { %v1096_v43 = vpop.permute.xlu0 %1095  ;;  %v1621_v27 = vsel %vm1595_vm10, %v1588_v6, %v1098_v41  ;;  %v1558_v41 = vsel %vm1529_vm8, %v1525_v47, %v6553_v49 }
 0x1ed   : > { %v1620_v32 = vsel %vm1595_vm10, %v1587_v4, %v1096_v43  ;;  %v6555_v4 = vld [vmem:[#allocation38_spill] sm:$0xff] }
 0x1ef   : > { %v1275_v14 = vpop.permute.xlu1 %1274 }
 0x1f0   : > { %v1273_v44 = vpop.permute.xlu0 %1272  ;;  %v1654_v52 = vsel %vm1628_vm11, %v1621_v27, %v1275_v14 }
 0x1f1   : > { %v1653_v53 = vsel %vm1628_vm11, %v1620_v32, %v1273_v44  ;;  %v6554_v44 = vld [vmem:[#allocation20_spill] sm:$0xff] }
 0x1f2   : > { %v1526_v19 = vsel %vm273_vm0, %v5211_v46, %v6554_v44 }
 0x1f3   : > { %v923_v61 = vpop.permute.xlu1 %922  ;;  %v1559_v32 = vsel %vm1529_vm8, %v1526_v19, %v6555_v4 }
 0x1f4   : > { %v1450_v37 = vpop.permute.xlu0 %1449  ;;  %v1589_v36 = vsel %vm1562_vm9, %v1556_v58, %v923_v61 }
 0x1f5   : > { %v1686_v1 = vsel %vm1661_vm12, %v1653_v53, %v1450_v37 }
 0x1f6   : > { %3760 = vmatprep.mubr.msk.f32.mxu0 %vm1698_vm13, %v1686_v1 }
 0x1f7   : > { %v925_v20 = vpop.permute.xlu1 %924 }
 0x1f8   : > { %v1452_v28 = vpop.permute.xlu0 %1451  ;;  %v1590_v54 = vsel %vm1562_vm9, %v1557_v26, %v925_v20 }
 0x1f9   : > { %v1687_v3 = vsel %vm1661_vm12, %v1654_v52, %v1452_v28  ;;  %v6556_v28 = vld [vmem:[#allocation22_spill] sm:$0xff] }
 0x1fa   : > { %3761 = vmatmul.mubr.msk.f32.gmra.mxu0 %vm1698_vm13, %v1687_v3  ;;  %v1528_v3 = vsel %vm273_vm0, %v5266_v50, %v6556_v28 }
 0x1fb   : > { %v1102_v12 = vpop.permute.xlu1 %1101  ;;  %v1561_v22 = vsel %vm1529_vm8, %v1528_v3, %v6558_v0 }
 0x1fc   : > { %v1100_v38 = vpop.permute.xlu0 %1099  ;;  %v1623_v45 = vsel %vm1595_vm10, %v1590_v54, %v1102_v12 }
 0x1fd   : > { %v1622_v62 = vsel %vm1595_vm10, %v1589_v36, %v1100_v38  ;;  %v6557_v38 = vld [vmem:[#allocation23_spill] sm:$0xff] }
 0x1ff   : > { %v1279_v24 = vpop.permute.xlu1 %1278 }
 0x200   : > { %v1277_v2 = vpop.permute.xlu0 %1276  ;;  %v1656_v11 = vsel %vm1628_vm11, %v1623_v45, %v1279_v24  ;;  %v1527_v24 = vsel %vm273_vm0, %v5263_v48, %v6557_v38 }
 0x201   : > { %v1655_v16 = vsel %vm1628_vm11, %v1622_v62, %v1277_v2  ;;  %v1560_v58 = vsel %vm1529_vm8, %v1527_v24, %v6559_v40 }
 0x203   : > { %v927_v21 = vpop.permute.xlu1 %926 }
 0x204   : > { %v1454_v35 = vpop.permute.xlu0 %1453  ;;  %v1591_v14 = vsel %vm1562_vm9, %v1558_v41, %v927_v21 }
 0x205   : > { %v1688_v39 = vsel %vm1661_vm12, %v1655_v16, %v1454_v35 }
 0x206   : > { %3763 = vmatprep.mubr.msk.f32.mxu0 %vm1698_vm13, %v1688_v39 }
 0x207   : > { %v929_v23 = vpop.permute.xlu1 %928 }
 0x208   : > { %v1456_v10 = vpop.permute.xlu0 %1455  ;;  %v1592_v33 = vsel %vm1562_vm9, %v1559_v32, %v929_v23 }
 0x209   : > { %v1689_v13 = vsel %vm1661_vm12, %v1656_v11, %v1456_v10 }
 0x20a   : > { %3764 = vmatmul.mubr.msk.f32.gmra.mxu0 %vm1698_vm13, %v1689_v13 }
 0x20b   : > { %v1106_v17 = vpop.permute.xlu1 %1105 }
 0x20c   : > { %v1104_v60 = vpop.permute.xlu0 %1103  ;;  %v1625_v15 = vsel %vm1595_vm10, %v1592_v33, %v1106_v17 }
 0x20d   : > { %v1624_v25 = vsel %vm1595_vm10, %v1591_v14, %v1104_v60 }
 0x20f   : > { %v3726_v8 = vpop.f32.mrf.mxu0  ;;  %v1283_v59 = vpop.permute.xlu1 %1282 }
 0x210   : > { %2025 = vst.msk [vmem:[#allocation3 + $0x38] sm:$0xff] %vm273_vm0, %v3726_v8  ;;  %v1281_v5 = vpop.permute.xlu0 %1280  ;;  %v1658_v42 = vsel %vm1628_vm11, %v1625_v15, %v1283_v59 }
 0x211   : > { %v1864_v43 = vpop.f32.mrf.mxu0  ;;  %v1657_v9 = vsel %vm1628_vm11, %v1624_v25, %v1281_v5 }
 0x212   : > { %2024 = vst.msk [vmem:[#allocation3 + $0x30] sm:$0xff] %vm273_vm0, %v1864_v43 }
 0x213   : > { %v931_v34 = vpop.permute.xlu1 %930 }
 0x214   : > { %v1458_v31 = vpop.permute.xlu0 %1457  ;;  %v1593_v62 = vsel %vm1562_vm9, %v1560_v58, %v931_v34 }
 0x215   : > { %v1690_v61 = vsel %vm1661_vm12, %v1657_v9, %v1458_v31 }
 0x216   : > { %3766 = vmatprep.mubr.msk.f32.mxu0 %vm1698_vm13, %v1690_v61 }
 0x217   : > { %v933_v53 = vpop.permute.xlu1 %932  ;;  %v5476_v37 = vld [vmem:[#allocation3 + $0x38] sm:$0xff] }
 0x218   : > { %2155 = vrot.lane.b32.xlu1 %v5476_v37, %s3981_s6  ;;  %v1460_v46 = vpop.permute.xlu0 %1459  ;;  %v1594_v36 = vsel %vm1562_vm9, %v1561_v22, %v933_v53 }
 0x219   : > { %v1691_v56 = vsel %vm1661_vm12, %v1658_v42, %v1460_v46  ;;  %v5482_v1 = vld [vmem:[#allocation3 + $0x30] sm:$0xff]  ;;  %v2926_v46 = vld [vmem:[%s6473_s2 + $0x18] sm:$0xf] }
 0x21a   : > { %2153 = vrot.lane.b32.xlu0 %v5482_v1, %s3981_s6  ;;  %3767 = vmatmul.mubr.msk.f32.gmra.mxu0 %vm1698_vm13, %v1691_v56  ;;  %v2925_v56 = vld [vmem:[%s6473_s2 + $0x10] sm:$0xff] }
 0x21b   : > { %v3729_v6 = vpop.f32.mrf.mxu0  ;;  %v1110_v27 = vpop.permute.xlu1 %1109  ;;  %3772 = vmatprep.subr.msk.mxu1 %vm966_vm5, %v2926_v46 }
 0x21c   : > { %2027 = vst.msk [vmem:[#allocation3 + $0x48] sm:$0xff] %vm273_vm0, %v3729_v6  ;;  %v1108_v20 = vpop.permute.xlu0 %1107  ;;  %v1627_v21 = vsel %vm1595_vm10, %v1594_v36, %v1110_v27  ;;  %3773 = vmatpush3.msk.msra.mxu1 %vm966_vm5, %v2926_v46  ;;  %v2924_v6 = vld [vmem:[%s6473_s2 + $0x8] sm:$0xff]  ;;  %v2923_v27 = vld [vmem:[%s6473_s2] sm:$0xff] }
 0x21d   : > { %v1874_v52 = vpop.f32.mrf.mxu0  ;;  %v1626_v50 = vsel %vm1595_vm10, %v1593_v62, %v1108_v20  ;;  %3774 = vmatprep.subr.mxu1 %v2925_v56  ;;  %v2069_v46 = vld [vmem:[#allocation3] sm:$0xff] }
 0x21e   : > { %2026 = vst.msk [vmem:[#allocation3 + $0x40] sm:$0xff] %vm273_vm0, %v1874_v52  ;;  %3775 = vmatpush3.msra.mxu1 %v2925_v56 }
 0x21f   : > { %v1287_v12 = vpop.permute.xlu1 %1286  ;;  %3776 = vmatprep.subr.mxu1 %v2924_v6 }
 0x220   : > { %v1285_v2 = vpop.permute.xlu0 %1284  ;;  %v1660_v51 = vsel %vm1628_vm11, %v1627_v21, %v1287_v12  ;;  %3777 = vmatpush3.msra.mxu1 %v2924_v6 }
 0x221   : > { %v1659_v48 = vsel %vm1628_vm11, %v1626_v50, %v1285_v2  ;;  %3778 = vmatprep.subr.mxu1 %v2923_v27 }
 0x222   : > { %3779 = vmatpush3.msra.mxu1 %v2923_v27 }
 0x223   : > { %v1464_v18 = vpop.permute.xlu1 %1463  ;;  %v5504_v16 = vld [vmem:[#allocation3 + $0x48] sm:$0xff] }
 0x224   : > { %v1693_v35 = vsel %vm1661_vm12, %v1660_v51, %v1464_v18  ;;  %2159 = vrot.lane.b32.xlu1 %v5504_v16, %s3981_s6  ;;  %v1462_v29 = vpop.permute.xlu0 %1461 }
 0x225   : > { %v1692_v26 = vsel %vm1661_vm12, %v1659_v48, %v1462_v29  ;;  %v5511_v39 = vld [vmem:[#allocation3 + $0x40] sm:$0xff] }
 0x226   : > { %2157 = vrot.lane.b32.xlu0 %v5511_v39, %s3981_s6  ;;  %3769 = vmatprep.mubr.msk.f32.mxu0 %vm1698_vm13, %v1692_v26 }
 0x227   : > { %v3732_v54 = vpop.f32.mrf.mxu0  ;;  %3770 = vmatmul.mubr.msk.f32.gmra.mxu0 %vm1698_vm13, %v1693_v35  ;;  %v5675_v24 = vpop.permute.xlu1 %2147 }
 0x228   : > { %2029 = vst.msk [vmem:[#allocation3 + $0x58] sm:$0xff] %vm273_vm0, %v3732_v54  ;;  %v5679_v22 = vpop.permute.xlu0 %2145 }
 0x229   : > { %v1884_v45 = vpop.f32.mrf.mxu0  ;;  %v2731_v27 = vsel %vm273_vm0, %v2069_v46, %v5679_v22 }
 0x22a   : > { %2028 = vst.msk [vmem:[#allocation3 + $0x50] sm:$0xff] %vm273_vm0, %v1884_v45 }
 0x22b   : > { %v5687_v40 = vpop.permute.xlu1 %2151 }
 0x22c   : > { %v5691_v58 = vpop.permute.xlu0 %2149 }
 0x22f   : > { %v5519_v23 = vld [vmem:[#allocation3 + $0x58] sm:$0xff] }
 0x230   : > { %2163 = vrot.lane.b32.xlu1 %v5519_v23, %s3981_s6 }
 0x231   : > { %v5523_v11 = vld [vmem:[#allocation3 + $0x50] sm:$0xff] }
 0x232   : > { %2161 = vrot.lane.b32.xlu0 %v5523_v11, %s3981_s6 }
 0x233   : > { %v3735_v10 = vpop.f32.mrf.mxu0 }
 0x234   : > { %2031 = vst.msk [vmem:[#allocation3 + $0x68] sm:$0xff] %vm273_vm0, %v3735_v10 }
 0x235   : > { %v1894_v13 = vpop.f32.mrf.mxu0 }
 0x236   : > { %2030 = vst.msk [vmem:[#allocation3 + $0x60] sm:$0xff] %vm273_vm0, %v1894_v13 }
 0x23b   : > { %v5529_v17 = vld [vmem:[#allocation3 + $0x68] sm:$0xff] }
 0x23c   : > { %2167 = vrot.lane.b32.xlu1 %v5529_v17, %s3981_s6 }
 0x23d   : > { %v5533_v60 = vld [vmem:[#allocation3 + $0x60] sm:$0xff] }
 0x23e   : > { %2165 = vrot.lane.b32.xlu0 %v5533_v60, %s3981_s6 }
 0x23f   : > { %v3738_v8 = vpop.f32.mrf.mxu0 }
 0x240   : > { %2033 = vst.msk [vmem:[#allocation3 + $0x78] sm:$0xff] %vm273_vm0, %v3738_v8 }
 0x241   : > { %v1904_v59 = vpop.f32.mrf.mxu0 }
 0x242   : > { %2032 = vst.msk [vmem:[#allocation3 + $0x70] sm:$0xff] %vm273_vm0, %v1904_v59 }
 0x247   : > { %v5539_v57 = vld [vmem:[#allocation3 + $0x78] sm:$0xff] }
 0x248   : > { %2171 = vrot.lane.b32.xlu1 %v5539_v57, %s3981_s6 }
 0x249   : > { %v5543_v47 = vld [vmem:[#allocation3 + $0x70] sm:$0xff] }
 0x24a   : > { %2169 = vrot.lane.b32.xlu0 %v5543_v47, %s3981_s6 }
 0x24b   : > { %v3741_v5 = vpop.f32.mrf.mxu0 }
 0x24c   : > { %2035 = vst.msk [vmem:[#allocation3 + $0x88] sm:$0xff] %vm273_vm0, %v3741_v5 }
 0x24d   : > { %v1914_v49 = vpop.f32.mrf.mxu0 }
 0x24e   : > { %2034 = vst.msk [vmem:[#allocation3 + $0x80] sm:$0xff] %vm273_vm0, %v1914_v49 }
 0x253   : > { %v5549_v41 = vld [vmem:[#allocation3 + $0x88] sm:$0xff] }
 0x254   : > { %2175 = vrot.lane.b32.xlu1 %v5549_v41, %s3981_s6 }
 0x255   : > { %v5553_v43 = vld [vmem:[#allocation3 + $0x80] sm:$0xff] }
 0x256   : > { %2173 = vrot.lane.b32.xlu0 %v5553_v43, %s3981_s6 }
 0x25a   : > { %v3744_v14 = vpop.f32.mrf.mxu0 }
 0x25b   : > { %2037 = vst.msk [vmem:[#allocation3 + $0x98] sm:$0xff] %vm273_vm0, %v3744_v14 }
 0x25c   : > { %v1924_v25 = vpop.f32.mrf.mxu0 }
 0x25d   : > { %2036 = vst.msk [vmem:[#allocation3 + $0x90] sm:$0xff] %vm273_vm0, %v1924_v25 }
 0x262   : > { %v5559_v34 = vld [vmem:[#allocation3 + $0x98] sm:$0xff] }
 0x263   : > { %2179 = vrot.lane.b32.xlu1 %v5559_v34, %s3981_s6 }
 0x264   : > { %v5563_v44 = vld [vmem:[#allocation3 + $0x90] sm:$0xff] }
 0x265   : > { %2177 = vrot.lane.b32.xlu0 %v5563_v44, %s3981_s6 }
 0x26a   : > { %v3747_v19 = vpop.f32.mrf.mxu0 }
 0x26b   : > { %2039 = vst.msk [vmem:[#allocation3 + $0xa8] sm:$0xff] %vm273_vm0, %v3747_v19 }
 0x26c   : > { %v1934_v9 = vpop.f32.mrf.mxu0 }
 0x26d   : > { %2038 = vst.msk [vmem:[#allocation3 + $0xa0] sm:$0xff] %vm273_vm0, %v1934_v9 }
 0x272   : > { %v5569_v31 = vld [vmem:[#allocation3 + $0xa8] sm:$0xff] }
 0x273   : > { %2183 = vrot.lane.b32.xlu1 %v5569_v31, %s3981_s6 }
 0x274   : > { %v5573_v4 = vld [vmem:[#allocation3 + $0xa0] sm:$0xff] }
 0x275   : > { %2181 = vrot.lane.b32.xlu0 %v5573_v4, %s3981_s6 }
 0x27a   : > { %v3750_v32 = vpop.f32.mrf.mxu0 }
 0x27b   : > { %2041 = vst.msk [vmem:[#allocation3 + $0xb8] sm:$0xff] %vm273_vm0, %v3750_v32 }
 0x27c   : > { %v1944_v61 = vpop.f32.mrf.mxu0 }
 0x27d   : > { %2040 = vst.msk [vmem:[#allocation3 + $0xb0] sm:$0xff] %vm273_vm0, %v1944_v61 }
 0x282   : > { %v5579_v33 = vld [vmem:[#allocation3 + $0xb8] sm:$0xff] }
 0x283   : > { %2187 = vrot.lane.b32.xlu1 %v5579_v33, %s3981_s6 }
 0x284   : > { %v5583_v15 = vld [vmem:[#allocation3 + $0xb0] sm:$0xff] }
 0x285   : > { %2185 = vrot.lane.b32.xlu0 %v5583_v15, %s3981_s6 }
 0x287   : > { %2245 = vrot.lane.b32.xlu1 %v5345_v7, %s3982_s7 }
 0x289   : > { %2243 = vrot.lane.b32.xlu0 %v5348_v55, %s3982_s7 }
 0x28a   : > { %v3753_v53 = vpop.f32.mrf.mxu0  ;;  %v5697_v36 = vpop.permute.xlu1 %2155 }
 0x28b   : > { %2043 = vst.msk [vmem:[#allocation3 + $0xc8] sm:$0xff] %vm273_vm0, %v3753_v53  ;;  %2343 = vrot.lane.b32.xlu1 %v5476_v37, %s3983_s8 }
 0x28c   : > { %v1954_v42 = vpop.f32.mrf.mxu0  ;;  %v5701_v62 = vpop.permute.xlu0 %2153 }
 0x28d   : > { %2042 = vst.msk [vmem:[#allocation3 + $0xc0] sm:$0xff] %vm273_vm0, %v1954_v42  ;;  %2341 = vrot.lane.b32.xlu0 %v5482_v1, %s3983_s8 }
 0x28f   : > { %2441 = vrot.lane.b32.xlu1 %v5504_v16, %s3984_s23 }
 0x291   : > { %2439 = vrot.lane.b32.xlu0 %v5511_v39, %s3984_s23 }
 0x293   : > { %2247 = vrot.lane.b32.xlu1 %v5482_v1, %s3982_s7 }
 0x295   : > { %2537 = vrot.lane.b32.xlu0 %v5523_v11, %s3985_s29 }
 0x296   : > { %v5705_v21 = vpop.permute.xlu1 %2159 }
 0x297   : > { %2635 = vrot.lane.b32.xlu1 %v5533_v60, %s3986_s30 }
 0x298   : > { %v5709_v51 = vpop.permute.xlu0 %2157 }
 0x299   : > { %2539 = vrot.lane.b32.xlu0 %v5519_v23, %s3985_s29 }
 0x29a   : > { %v3756_v20 = vpop.f32.mrf.mxu0 }
 0x29b   : > { %2045 = vst.msk [vmem:[#allocation3 + $0xd8] sm:$0xff] %vm273_vm0, %v3756_v20  ;;  %2345 = vrot.lane.b32.xlu1 %v5511_v39, %s3983_s8 }
 0x29c   : > { %v1964_v52 = vpop.f32.mrf.mxu0 }
 0x29d   : > { %2044 = vst.msk [vmem:[#allocation3 + $0xd0] sm:$0xff] %vm273_vm0, %v1964_v52  ;;  %2249 = vrot.lane.b32.xlu0 %v5476_v37, %s3982_s7 }
 0x29f   : > { %2347 = vrot.lane.b32.xlu1 %v5504_v16, %s3983_s8 }
 0x2a1   : > { %2637 = vrot.lane.b32.xlu0 %v5529_v17, %s3986_s30 }
 0x2a2   : > { %v5714_v48 = vpop.permute.xlu1 %2163 }
 0x2a3   : > { %2445 = vrot.lane.b32.xlu1 %v5519_v23, %s3984_s23 }
 0x2a4   : > { %v5719_v35 = vpop.permute.xlu0 %2161 }
 0x2a5   : > { %2443 = vrot.lane.b32.xlu0 %v5523_v11, %s3984_s23 }
 0x2a7   : > { %2251 = vrot.lane.b32.xlu1 %v5511_v39, %s3982_s7 }
 0x2a9   : > { %2541 = vrot.lane.b32.xlu0 %v5533_v60, %s3985_s29 }
 0x2aa   : > { %v3759_v28 = vpop.f32.mrf.mxu0 }
 0x2ab   : > { %2047 = vst.msk [vmem:[#allocation3 + $0xe8] sm:$0xff] %vm273_vm0, %v3759_v28  ;;  %2639 = vrot.lane.b32.xlu1 %v5543_v47, %s3986_s30 }
 0x2ac   : > { %v1974_v3 = vpop.f32.mrf.mxu0 }
 0x2ad   : > { %2046 = vst.msk [vmem:[#allocation3 + $0xe0] sm:$0xff] %vm273_vm0, %v1974_v3  ;;  %2543 = vrot.lane.b32.xlu0 %v5529_v17, %s3985_s29 }
 0x2ae   : > { %v5723_v29 = vpop.permute.xlu1 %2167 }
 0x2af   : > { %2349 = vrot.lane.b32.xlu1 %v5523_v11, %s3983_s8 }
 0x2b0   : > { %v5727_v26 = vpop.permute.xlu0 %2165 }
 0x2b1   : > { %2253 = vrot.lane.b32.xlu0 %v5504_v16, %s3982_s7 }
 0x2b3   : > { %2351 = vrot.lane.b32.xlu1 %v5519_v23, %s3983_s8 }
 0x2b5   : > { %2641 = vrot.lane.b32.xlu0 %v5539_v57, %s3986_s30 }
 0x2b7   : > { %2449 = vrot.lane.b32.xlu1 %v5529_v17, %s3984_s23 }
 0x2b9   : > { %2447 = vrot.lane.b32.xlu0 %v5533_v60, %s3984_s23 }
 0x2ba   : > { %v3762_v12 = vpop.f32.mrf.mxu0  ;;  %v5731_v54 = vpop.permute.xlu1 %2171 }
 0x2bb   : > { %2049 = vst.msk [vmem:[#allocation3 + $0xf8] sm:$0xff] %vm273_vm0, %v3762_v12  ;;  %2255 = vrot.lane.b32.xlu1 %v5523_v11, %s3982_s7 }
 0x2bc   : > { %v1984_v38 = vpop.f32.mrf.mxu0  ;;  %v5735_v45 = vpop.permute.xlu0 %2169 }
 0x2bd   : > { %2048 = vst.msk [vmem:[#allocation3 + $0xf0] sm:$0xff] %vm273_vm0, %v1984_v38  ;;  %2545 = vrot.lane.b32.xlu0 %v5543_v47, %s3985_s29 }
 0x2bf   : > { %2643 = vrot.lane.b32.xlu1 %v5553_v43, %s3986_s30 }
 0x2c1   : > { %2547 = vrot.lane.b32.xlu0 %v5539_v57, %s3985_s29 }
 0x2c3   : > { %2353 = vrot.lane.b32.xlu1 %v5533_v60, %s3983_s8 }
 0x2c5   : > { %2257 = vrot.lane.b32.xlu0 %v5519_v23, %s3982_s7 }
 0x2c6   : > { %v5740_v13 = vpop.permute.xlu1 %2175 }
 0x2c7   : > { %2355 = vrot.lane.b32.xlu1 %v5529_v17, %s3983_s8 }
 0x2c8   : > { %v5745_v59 = vpop.permute.xlu0 %2173 }
 0x2c9   : > { %2645 = vrot.lane.b32.xlu0 %v5549_v41, %s3986_s30 }
 0x2ca   : > { %v3765_v0 = vpop.f32.mrf.mxu0 }
 0x2cb   : > { %2051 = vst.msk [vmem:[#allocation3 + $0x108] sm:$0xff] %vm273_vm0, %v3765_v0  ;;  %2453 = vrot.lane.b32.xlu1 %v5539_v57, %s3984_s23 }
 0x2cc   : > { %v1994_v2 = vpop.f32.mrf.mxu0 }
 0x2cd   : > { %2050 = vst.msk [vmem:[#allocation3 + $0x100] sm:$0xff] %vm273_vm0, %v1994_v2  ;;  %2451 = vrot.lane.b32.xlu0 %v5543_v47, %s3984_s23 }
 0x2cf   : > { %2259 = vrot.lane.b32.xlu1 %v5533_v60, %s3982_s7 }
 0x2d1   : > { %2549 = vrot.lane.b32.xlu0 %v5553_v43, %s3985_s29 }
 0x2d3   : > { %2647 = vrot.lane.b32.xlu1 %v5563_v44, %s3986_s30 }
 0x2d5   : > { %2551 = vrot.lane.b32.xlu0 %v5549_v41, %s3985_s29  ;;  %v5749_v5 = vpop.permute.xlu1 %2179 }
 0x2d7   : > { %2357 = vrot.lane.b32.xlu1 %v5543_v47, %s3983_s8  ;;  %v5753_v49 = vpop.permute.xlu0 %2177 }
 0x2d9   : > { %2261 = vrot.lane.b32.xlu0 %v5529_v17, %s3982_s7 }
 0x2da   : > { %v3768_v50 = vpop.f32.mrf.mxu0 }
 0x2db   : > { %2053 = vst.msk [vmem:[#allocation3 + $0x118] sm:$0xff] %vm273_vm0, %v3768_v50  ;;  %2359 = vrot.lane.b32.xlu1 %v5539_v57, %s3983_s8  ;;  %v2070_v50 = vld [vmem:[#allocation3 + $0x8] sm:$0xff] }
 0x2dc   : > { %v2004_v18 = vpop.f32.mrf.mxu0 }
 0x2dd   : > { %2052 = vst.msk [vmem:[#allocation3 + $0x110] sm:$0xff] %vm273_vm0, %v2004_v18  ;;  %2649 = vrot.lane.b32.xlu0 %v5559_v34, %s3986_s30 }
 0x2df   : > { %2457 = vrot.lane.b32.xlu1 %v5549_v41, %s3984_s23 }
 0x2e1   : > { %2455 = vrot.lane.b32.xlu0 %v5553_v43, %s3984_s23 }
 0x2e3   : > { %2263 = vrot.lane.b32.xlu1 %v5543_v47, %s3982_s7 }
 0x2e5   : > { %2553 = vrot.lane.b32.xlu0 %v5563_v44, %s3985_s29  ;;  %v5757_v14 = vpop.permute.xlu1 %2183 }
 0x2e7   : > { %2651 = vrot.lane.b32.xlu1 %v5573_v4, %s3986_s30  ;;  %v3771_v10 = vpop.f32.mrf.mxu0  ;;  %v5761_v25 = vpop.permute.xlu0 %2181 }
 0x2e8   : > { %2055 = vst.msk [vmem:[#allocation3 + $0x128] sm:$0xff] %vm273_vm0, %v3771_v10  ;;  %v5803_v10 = vld [vmem:[#allocation3 + $0xc0] sm:$0xff] }
 0x2e9   : > { %2555 = vrot.lane.b32.xlu0 %v5559_v34, %s3985_s29  ;;  %v2014_v8 = vpop.f32.mrf.mxu0 }
 0x2ea   : > { %2054 = vst.msk [vmem:[#allocation3 + $0x120] sm:$0xff] %vm273_vm0, %v2014_v8  ;;  %v2732_v8 = vsel %vm273_vm0, %v2070_v50, %v5675_v24 }
 0x2eb   : > { %2361 = vrot.lane.b32.xlu1 %v5553_v43, %s3983_s8 }
 0x2ed   : > { %2265 = vrot.lane.b32.xlu0 %v5539_v57, %s3982_s7 }
 0x2ef   : > { %2363 = vrot.lane.b32.xlu1 %v5549_v41, %s3983_s8 }
 0x2f1   : > { %2653 = vrot.lane.b32.xlu0 %v5569_v31, %s3986_s30 }
 0x2f3   : > { %2461 = vrot.lane.b32.xlu1 %v5559_v34, %s3984_s23 }
 0x2f5   : > { %v5765_v19 = vpop.permute.xlu1 %2187  ;;  %2459 = vrot.lane.b32.xlu0 %v5563_v44, %s3984_s23 }
 0x2f7   : > { %2267 = vrot.lane.b32.xlu1 %v5553_v43, %s3982_s7  ;;  %v5771_v9 = vpop.permute.xlu0 %2185 }
 0x2f9   : > { %v2246_v32 = vpop.permute.xlu1 %2245  ;;  %2557 = vrot.lane.b32.xlu0 %v5573_v4, %s3985_s29 }
 0x2fb   : > { %2655 = vrot.lane.b32.xlu1 %v5583_v15, %s3986_s30  ;;  %v2244_v61 = vpop.permute.xlu0 %2243 }
 0x2fc   : > { %v2763_v20 = vsel %vm1529_vm8, %v2731_v27, %v2244_v61 }
 0x2fd   : > { %v2344_v53 = vpop.permute.xlu1 %2343  ;;  %2559 = vrot.lane.b32.xlu0 %v5569_v31, %s3985_s29 }
 0x2ff   : > { %2365 = vrot.lane.b32.xlu1 %v5563_v44, %s3983_s8  ;;  %v2342_v42 = vpop.permute.xlu0 %2341 }
 0x300   : > { %v2795_v28 = vsel %vm1562_vm9, %v2763_v20, %v2342_v42  ;;  %v2764_v42 = vsel %vm1529_vm8, %v2732_v8, %v2246_v32 }
 0x301   : > { %v2442_v56 = vpop.permute.xlu1 %2441  ;;  %2269 = vrot.lane.b32.xlu0 %v5549_v41, %s3982_s7  ;;  %v2796_v46 = vsel %vm1562_vm9, %v2764_v42, %v2344_v53  ;;  %v2733_v53 = vsel %vm273_vm0, %v5330_v63, %v5691_v58 }
 0x302   : > { %v2828_v27 = vsel %vm1595_vm10, %v2796_v46, %v2442_v56  ;;  %v5826_v56 = vld [vmem:[#allocation3 + $0xc8] sm:$0xff]  ;;  %v5848_v46 = vld [vmem:[#allocation3 + $0xd0] sm:$0xff] }
 0x303   : > { %2367 = vrot.lane.b32.xlu1 %v5559_v34, %s3983_s8  ;;  %v2440_v6 = vpop.permute.xlu0 %2439 }
 0x304   : > { %v2827_v3 = vsel %vm1595_vm10, %v2795_v28, %v2440_v6 }
 0x305   : > { %v2248_v52 = vpop.permute.xlu1 %2247  ;;  %2657 = vrot.lane.b32.xlu0 %v5579_v33, %s3986_s30 }
 0x307   : > { %2465 = vrot.lane.b32.xlu1 %v5569_v31, %s3984_s23  ;;  %v2538_v12 = vpop.permute.xlu0 %2537 }
 0x308   : > { %v2859_v38 = vsel %vm1628_vm11, %v2827_v3, %v2538_v12  ;;  %v2765_v12 = vsel %vm1529_vm8, %v2733_v53, %v2248_v52  ;;  %v2734_v52 = vsel %vm273_vm0, %v5327_v30, %v5687_v40  ;;  %v5868_v53 = vld [vmem:[#allocation3 + $0xd8] sm:$0xff] }
 0x309   : > { %v2636_v0 = vpop.permute.xlu1 %2635  ;;  %2463 = vrot.lane.b32.xlu0 %v5573_v4, %s3984_s23 }
 0x30a   : > { %v2891_v22 = vsel %vm1661_vm12, %v2859_v38, %v2636_v0 }
 0x30b   : > { %2271 = vrot.lane.b32.xlu1 %v5563_v44, %s3982_s7  ;;  %3780 = vmatprep.mubr.msk.f32.mxu1 %vm1698_vm13, %v2891_v22  ;;  %v2540_v2 = vpop.permute.xlu0 %2539 }
 0x30c   : > { %v2860_v20 = vsel %vm1628_vm11, %v2828_v27, %v2540_v2 }
 0x30d   : > { %v2346_v18 = vpop.permute.xlu1 %2345  ;;  %2561 = vrot.lane.b32.xlu0 %v5583_v15, %s3985_s29 }
 0x30e   : > { %v2797_v0 = vsel %vm1562_vm9, %v2765_v12, %v2346_v18 }
 0x30f   : > { %2659 = vrot.lane.b32.xlu1 %v5803_v10, %s3986_s30  ;;  %v2250_v61 = vpop.permute.xlu0 %2249 }
 0x310   : > { %v2766_v42 = vsel %vm1529_vm8, %v2734_v52, %v2250_v61  ;;  %v5890_v52 = vld [vmem:[#allocation3 + $0xe0] sm:$0xff] }
 0x311   : > { %v2348_v6 = vpop.permute.xlu1 %2347  ;;  %2563 = vrot.lane.b32.xlu0 %v5579_v33, %s3985_s29 }
 0x313   : > { %2369 = vrot.lane.b32.xlu1 %v5573_v4, %s3983_s8  ;;  %v2638_v24 = vpop.permute.xlu0 %2637 }
 0x314   : > { %v2892_v28 = vsel %vm1661_vm12, %v2860_v20, %v2638_v24  ;;  %v2798_v20 = vsel %vm1562_vm9, %v2766_v42, %v2348_v6 }
 0x315   : > { %v2446_v3 = vpop.permute.xlu1 %2445  ;;  %2273 = vrot.lane.b32.xlu0 %v5559_v34, %s3982_s7  ;;  %3781 = vmatmul.mubr.msk.f32.vlgmr.msra.gmra.mxu1 %vm1698_vm13, %v2892_v28 }
 0x316   : > { %v2830_v30 = vsel %vm1595_vm10, %v2798_v20, %v2446_v3  ;;  %v2735_v3 = vsel %vm273_vm0, %v5348_v55, %v5701_v62 }
 0x317   : > { %2371 = vrot.lane.b32.xlu1 %v5569_v31, %s3983_s8  ;;  %v2444_v32 = vpop.permute.xlu0 %2443 }
 0x318   : > { %v2829_v22 = vsel %vm1595_vm10, %v2797_v0, %v2444_v32 }
 0x319   : > { %v2252_v38 = vpop.permute.xlu1 %2251  ;;  %2661 = vrot.lane.b32.xlu0 %v5826_v56, %s3986_s30 }
 0x31a   : > { %v2767_v12 = vsel %vm1529_vm8, %v2735_v3, %v2252_v38  ;;  %v2736_v38 = vsel %vm273_vm0, %v5345_v7, %v5697_v36 }
 0x31b   : > { %2469 = vrot.lane.b32.xlu1 %v5579_v33, %s3984_s23  ;;  %v2542_v2 = vpop.permute.xlu0 %2541 }
 0x31c   : > { %v2861_v50 = vsel %vm1628_vm11, %v2829_v22, %v2542_v2 }
 0x31d   : > { %v2640_v8 = vpop.permute.xlu1 %2639  ;;  %2467 = vrot.lane.b32.xlu0 %v5583_v15, %s3984_s23 }
 0x31e   : > { %v2893_v63 = vsel %vm1661_vm12, %v2861_v50, %v2640_v8 }
 0x31f   : > { %2275 = vrot.lane.b32.xlu1 %v5573_v4, %s3982_s7  ;;  %3783 = vmatprep.mubr.msk.f32.mxu1 %vm1698_vm13, %v2893_v63  ;;  %v2544_v58 = vpop.permute.xlu0 %2543 }
 0x320   : > { %v2862_v40 = vsel %vm1628_vm11, %v2830_v30, %v2544_v58 }
 0x321   : > { %v2350_v18 = vpop.permute.xlu1 %2349  ;;  %2565 = vrot.lane.b32.xlu0 %v5803_v10, %s3985_s29 }
 0x323   : > { %2663 = vrot.lane.b32.xlu1 %v5848_v46, %s3986_s30  ;;  %v2254_v27 = vpop.permute.xlu0 %2253 }
 0x324   : > { %v2768_v58 = vsel %vm1529_vm8, %v2736_v38, %v2254_v27 }
 0x325   : > { %v2352_v24 = vpop.permute.xlu1 %2351  ;;  %2567 = vrot.lane.b32.xlu0 %v5826_v56, %s3985_s29 }
 0x327   : > { %2373 = vrot.lane.b32.xlu1 %v5583_v15, %s3983_s8  ;;  %v2642_v61 = vpop.permute.xlu0 %2641 }
 0x328   : > { %v2894_v28 = vsel %vm1661_vm12, %v2862_v40, %v2642_v61  ;;  %v2737_v40 = vsel %vm273_vm0, %v5482_v1, %v5709_v51  ;;  %v5910_v61 = vld [vmem:[#allocation3 + $0xe8] sm:$0xff] }
 0x329   : > { %v2450_v32 = vpop.permute.xlu1 %2449  ;;  %2277 = vrot.lane.b32.xlu0 %v5569_v31, %s3982_s7  ;;  %3784 = vmatmul.mubr.msk.f32.gmra.mxu1 %vm1698_vm13, %v2894_v28  ;;  %v2799_v31 = vsel %vm1562_vm9, %v2767_v12, %v2350_v18 }
 0x32b   : > { %2375 = vrot.lane.b32.xlu1 %v5579_v33, %s3983_s8  ;;  %v2448_v6 = vpop.permute.xlu0 %2447 }
 0x32c   : > { %v2831_v22 = vsel %vm1595_vm10, %v2799_v31, %v2448_v6 }
 0x32d   : > { %v2256_v0 = vpop.permute.xlu1 %2255  ;;  %2665 = vrot.lane.b32.xlu0 %v5868_v53, %s3986_s30 }
 0x32e   : > { %v2769_v28 = vsel %vm1529_vm8, %v2737_v40, %v2256_v0  ;;  %v2738_v0 = vsel %vm273_vm0, %v5476_v37, %v5705_v21 }
 0x32f   : > { %2473 = vrot.lane.b32.xlu1 %v5826_v56, %s3984_s23  ;;  %v2546_v2 = vpop.permute.xlu0 %2545 }
 0x330   : > { %v2863_v50 = vsel %vm1628_vm11, %v2831_v22, %v2546_v2 }
 0x331   : > { %v2644_v8 = vpop.permute.xlu1 %2643  ;;  %2471 = vrot.lane.b32.xlu0 %v5803_v10, %s3984_s23 }
 0x332   : > { %v2895_v55 = vsel %vm1661_vm12, %v2863_v50, %v2644_v8  ;;  %v5932_v50 = vld [vmem:[#allocation3 + $0xf0] sm:$0xff] }
 0x333   : > { %2279 = vrot.lane.b32.xlu1 %v5583_v15, %s3982_s7  ;;  %3786 = vmatprep.mubr.msk.f32.mxu1 %vm1698_vm13, %v2895_v55  ;;  %v2548_v62 = vpop.permute.xlu0 %2547  ;;  %v2800_v15 = vsel %vm1562_vm9, %v2768_v58, %v2352_v24 }
 0x334   : > { %v2832_v7 = vsel %vm1595_vm10, %v2800_v15, %v2450_v32  ;;  %v2739_v15 = vsel %vm273_vm0, %v5511_v39, %v5719_v35 }
 0x335   : > { %v2354_v63 = vpop.permute.xlu1 %2353  ;;  %2569 = vrot.lane.b32.xlu0 %v5848_v46, %s3985_s29  ;;  %v2864_v36 = vsel %vm1628_vm11, %v2832_v7, %v2548_v62 }
 0x337   : > { %2667 = vrot.lane.b32.xlu1 %v5890_v52, %s3986_s30  ;;  %v2258_v18 = vpop.permute.xlu0 %2257 }
 0x338   : > { %v2770_v2 = vsel %vm1529_vm8, %v2738_v0, %v2258_v18 }
 0x339   : > { %v2356_v42 = vpop.permute.xlu1 %2355  ;;  %2571 = vrot.lane.b32.xlu0 %v5868_v53, %s3985_s29 }
 0x33a   : > { %v2802_v55 = vsel %vm1562_vm9, %v2770_v2, %v2356_v42  ;;  %v5952_v42 = vld [vmem:[#allocation3 + $0xf8] sm:$0xff]  ;;  %v2741_v2 = vsel %vm273_vm0, %v5523_v11, %v5727_v26 }
 0x33b   : > { %2377 = vrot.lane.b32.xlu1 %v5803_v10, %s3983_s8  ;;  %v2646_v27 = vpop.permute.xlu0 %2645 }
 0x33c   : > { %v2896_v20 = vsel %vm1661_vm12, %v2864_v36, %v2646_v27 }
 0x33d   : > { %v2454_v30 = vpop.permute.xlu1 %2453  ;;  %2281 = vrot.lane.b32.xlu0 %v5579_v33, %s3982_s7  ;;  %3787 = vmatmul.mubr.msk.f32.gmra.mxu1 %vm1698_vm13, %v2896_v20  ;;  %v2801_v33 = vsel %vm1562_vm9, %v2769_v28, %v2354_v63  ;;  %v2740_v28 = vsel %vm273_vm0, %v5504_v16, %v5714_v48 }
 0x33e   : > { %v2834_v37 = vsel %vm1595_vm10, %v2802_v55, %v2454_v30 }
 0x33f   : > { %2379 = vrot.lane.b32.xlu1 %v5826_v56, %s3983_s8  ;;  %v2452_v24 = vpop.permute.xlu0 %2451 }
 0x340   : > { %v2833_v6 = vsel %vm1595_vm10, %v2801_v33, %v2452_v24 }
 0x341   : > { %v2260_v32 = vpop.permute.xlu1 %2259  ;;  %2669 = vrot.lane.b32.xlu0 %v5910_v61, %s3986_s30 }
 0x342   : > { %v2771_v7 = vsel %vm1529_vm8, %v2739_v15, %v2260_v32 }
 0x343   : > { %2477 = vrot.lane.b32.xlu1 %v5868_v53, %s3984_s23  ;;  %v2550_v3 = vpop.permute.xlu0 %2549 }
 0x344   : > { %v2865_v12 = vsel %vm1628_vm11, %v2833_v6, %v2550_v3 }
 0x345   : > { %v2648_v31 = vpop.permute.xlu1 %2647  ;;  %2475 = vrot.lane.b32.xlu0 %v5848_v46, %s3984_s23 }
 0x346   : > { %v2897_v1 = vsel %vm1661_vm12, %v2865_v12, %v2648_v31 }
 0x347   : > { %2283 = vrot.lane.b32.xlu1 %v5803_v10, %s3982_s7  ;;  %3789 = vmatprep.mubr.msk.f32.mxu1 %vm1698_vm13, %v2897_v1  ;;  %v2552_v51 = vpop.permute.xlu0 %2551  ;;  %v5980_v1 = vld [vmem:[#allocation3 + $0x100] sm:$0xff] }
 0x348   : > { %v2866_v21 = vsel %vm1628_vm11, %v2834_v37, %v2552_v51 }
 0x349   : > { %v2358_v22 = vpop.permute.xlu1 %2357  ;;  %2573 = vrot.lane.b32.xlu0 %v5890_v52, %s3985_s29 }
 0x34a   : > { %v2803_v27 = vsel %vm1562_vm9, %v2771_v7, %v2358_v22 }
 0x34b   : > { %2671 = vrot.lane.b32.xlu1 %v5932_v50, %s3986_s30  ;;  %v2262_v8 = vpop.permute.xlu0 %2261 }
 0x34c   : > { %v2772_v33 = vsel %vm1529_vm8, %v2740_v28, %v2262_v8  ;;  %v2743_v28 = vsel %vm273_vm0, %v5533_v60, %v5735_v45 }
 0x34d   : > { %v2360_v62 = vpop.permute.xlu1 %2359  ;;  %2575 = vrot.lane.b32.xlu0 %v5910_v61, %s3985_s29 }
 0x34e   : > { %v2804_v3 = vsel %vm1562_vm9, %v2772_v33, %v2360_v62 }
 0x34f   : > { %2381 = vrot.lane.b32.xlu1 %v5848_v46, %s3983_s8  ;;  %v2650_v38 = vpop.permute.xlu0 %2649 }
 0x350   : > { %v2898_v63 = vsel %vm1661_vm12, %v2866_v21, %v2650_v38 }
 0x351   : > { %v2458_v58 = vpop.permute.xlu1 %2457  ;;  %2285 = vrot.lane.b32.xlu0 %v5826_v56, %s3982_s7  ;;  %3790 = vmatmul.mubr.msk.f32.gmra.mxu1 %vm1698_vm13, %v2898_v63  ;;  %v6002_v63 = vld [vmem:[#allocation3 + $0x108] sm:$0xff] }
 0x352   : > { %v2836_v31 = vsel %vm1595_vm10, %v2804_v3, %v2458_v58 }
 0x353   : > { %2383 = vrot.lane.b32.xlu1 %v5868_v53, %s3983_s8  ;;  %v2456_v18 = vpop.permute.xlu0 %2455 }
 0x354   : > { %v2835_v20 = vsel %vm1595_vm10, %v2803_v27, %v2456_v18  ;;  %v2742_v18 = vsel %vm273_vm0, %v5519_v23, %v5723_v29 }
 0x355   : > { %v2264_v36 = vpop.permute.xlu1 %2263  ;;  %2673 = vrot.lane.b32.xlu0 %v5952_v42, %s3986_s30 }
 0x356   : > { %v2773_v8 = vsel %vm1529_vm8, %v2741_v2, %v2264_v36 }
 0x357   : > { %2189 = vrot.lane.b32.xlu1 %v5803_v10, %s3981_s6  ;;  %v2554_v30 = vpop.permute.xlu0 %2553 }
 0x358   : > { %v2867_v24 = vsel %vm1628_vm11, %v2835_v20, %v2554_v30 }
 0x359   : > { %v2652_v40 = vpop.permute.xlu1 %2651  ;;  %2479 = vrot.lane.b32.xlu0 %v5890_v52, %s3984_s23 }
 0x35a   : > { %v2899_v39 = vsel %vm1661_vm12, %v2867_v24, %v2652_v40 }
 0x35b   : > { %2577 = vrot.lane.b32.xlu1 %v5932_v50, %s3985_s29  ;;  %3792 = vmatprep.mubr.msk.f32.mxu1 %vm1698_vm13, %v2899_v39  ;;  %v2556_v35 = vpop.permute.xlu0 %2555  ;;  %v6029_v39 = vld [vmem:[#allocation3 + $0x110] sm:$0xff] }
 0x35c   : > { %v2868_v16 = vsel %vm1628_vm11, %v2836_v31, %v2556_v35 }
 0x35d   : > { %v2362_v32 = vpop.permute.xlu1 %2361  ;;  %2481 = vrot.lane.b32.xlu0 %v5910_v61, %s3984_s23 }
 0x35e   : > { %v2805_v62 = vsel %vm1562_vm9, %v2773_v8, %v2362_v32 }
 0x35f   : > { %2287 = vrot.lane.b32.xlu1 %v5848_v46, %s3982_s7  ;;  %v2266_v6 = vpop.permute.xlu0 %2265 }
 0x360   : > { %v2774_v7 = vsel %vm1529_vm8, %v2742_v18, %v2266_v6 }
 0x361   : > { %v2364_v12 = vpop.permute.xlu1 %2363  ;;  %2191 = vrot.lane.b32.xlu0 %v5826_v56, %s3981_s6 }
 0x362   : > { %v2806_v27 = vsel %vm1562_vm9, %v2774_v7, %v2364_v12 }
 0x363   : > { %2675 = vrot.lane.b32.xlu1 %v5980_v1, %s3986_s30  ;;  %v2654_v48 = vpop.permute.xlu0 %2653 }
 0x364   : > { %v2900_v51 = vsel %vm1661_vm12, %v2868_v16, %v2654_v48  ;;  %v6050_v48 = vld [vmem:[#allocation3 + $0x118] sm:$0xff] }
 0x365   : > { %v2462_v0 = vpop.permute.xlu1 %2461  ;;  %2579 = vrot.lane.b32.xlu0 %v5952_v42, %s3985_s29  ;;  %3793 = vmatmul.mubr.msk.f32.gmra.mxu1 %vm1698_vm13, %v2900_v51  ;;  %v2744_v51 = vsel %vm273_vm0, %v5529_v17, %v5731_v54 }
 0x366   : > { %v2838_v30 = vsel %vm1595_vm10, %v2806_v27, %v2462_v0 }
 0x367   : > { %2385 = vrot.lane.b32.xlu1 %v5890_v52, %s3983_s8  ;;  %v2460_v22 = vpop.permute.xlu0 %2459 }
 0x368   : > { %v2837_v37 = vsel %vm1595_vm10, %v2805_v62, %v2460_v22 }
 0x369   : > { %v2268_v55 = vpop.permute.xlu1 %2267  ;;  %2289 = vrot.lane.b32.xlu0 %v5868_v53, %s3982_s7 }
 0x36a   : > { %v2775_v32 = vsel %vm1529_vm8, %v2743_v28, %v2268_v55 }
 0x36b   : > { %2387 = vrot.lane.b32.xlu1 %v5910_v61, %s3983_s8  ;;  %v2558_v21 = vpop.permute.xlu0 %2557 }
 0x36c   : > { %v2869_v38 = vsel %vm1628_vm11, %v2837_v37, %v2558_v21 }
 0x36d   : > { %v2656_v58 = vpop.permute.xlu1 %2655  ;;  %2677 = vrot.lane.b32.xlu0 %v6002_v63, %s3986_s30 }
 0x36e   : > { %v2901_v11 = vsel %vm1661_vm12, %v2869_v38, %v2656_v58  ;;  %v2745_v58 = vsel %vm273_vm0, %v5543_v47, %v5745_v59 }
 0x36f   : > { %2193 = vrot.lane.b32.xlu1 %v5848_v46, %s3981_s6  ;;  %3795 = vmatprep.mubr.msk.f32.mxu1 %vm1698_vm13, %v2901_v11  ;;  %v2560_v26 = vpop.permute.xlu0 %2559 }
 0x370   : > { %v2870_v23 = vsel %vm1628_vm11, %v2838_v30, %v2560_v26  ;;  %v2746_v30 = vsel %vm273_vm0, %v5539_v57, %v5740_v13 }
 0x371   : > { %v2366_v15 = vpop.permute.xlu1 %2365  ;;  %2483 = vrot.lane.b32.xlu0 %v5932_v50, %s3984_s23 }
 0x372   : > { %v2807_v6 = vsel %vm1562_vm9, %v2775_v32, %v2366_v15  ;;  %v6080_v15 = vld [vmem:[#allocation3 + $0x120] sm:$0xff] }
 0x373   : > { %2581 = vrot.lane.b32.xlu1 %v5980_v1, %s3985_s29  ;;  %v2270_v36 = vpop.permute.xlu0 %2269 }
 0x374   : > { %v2776_v22 = vsel %vm1529_vm8, %v2744_v51, %v2270_v36 }
 0x375   : > { %v2368_v20 = vpop.permute.xlu1 %2367  ;;  %2485 = vrot.lane.b32.xlu0 %v5952_v42, %s3984_s23 }
 0x376   : > { %v2808_v8 = vsel %vm1562_vm9, %v2776_v22, %v2368_v20  ;;  %v6126_v22 = vld [vmem:[#allocation3 + $0x130] sm:$0xff] }
 0x377   : > { %2291 = vrot.lane.b32.xlu1 %v5890_v52, %s3982_s7  ;;  %v2658_v29 = vpop.permute.xlu0 %2657 }
 0x378   : > { %v2902_v24 = vsel %vm1661_vm12, %v2870_v23, %v2658_v29 }
 0x379   : > { %v2466_v40 = vpop.permute.xlu1 %2465  ;;  %2195 = vrot.lane.b32.xlu0 %v5868_v53, %s3981_s6  ;;  %3796 = vmatmul.mubr.msk.f32.gmra.mxu1 %vm1698_vm13, %v2902_v24 }
 0x37a   : > { %v2840_v62 = vsel %vm1595_vm10, %v2808_v8, %v2466_v40  ;;  %v6100_v40 = vld [vmem:[#allocation3 + $0x128] sm:$0xff]  ;;  %v2748_v8 = vsel %vm273_vm0, %v5549_v41, %v5749_v5 }
 0x37b   : > { %2679 = vrot.lane.b32.xlu1 %v6029_v39, %s3986_s30  ;;  %v2464_v35 = vpop.permute.xlu0 %2463 }
 0x37c   : > { %v2839_v3 = vsel %vm1595_vm10, %v2807_v6, %v2464_v35 }
 0x37d   : > { %v2272_v33 = vpop.permute.xlu1 %2271  ;;  %2583 = vrot.lane.b32.xlu0 %v6002_v63, %s3985_s29 }
 0x37e   : > { %v2777_v11 = vsel %vm1529_vm8, %v2745_v58, %v2272_v33 }
 0x37f   : > { %2389 = vrot.lane.b32.xlu1 %v5932_v50, %s3983_s8  ;;  %v2562_v12 = vpop.permute.xlu0 %2561 }
 0x380   : > { %v2871_v31 = vsel %vm1628_vm11, %v2839_v3, %v2562_v12  ;;  %v2747_v12 = vsel %vm273_vm0, %v5553_v43, %v5753_v49 }
 0x381   : > { %v2660_v16 = vpop.permute.xlu1 %2659  ;;  %2293 = vrot.lane.b32.xlu0 %v5910_v61, %s3982_s7 }
 0x382   : > { %v2903_v60 = vsel %vm1661_vm12, %v2871_v31, %v2660_v16 }
 0x383   : > { %2391 = vrot.lane.b32.xlu1 %v5952_v42, %s3983_s8  ;;  %3798 = vmatprep.mubr.msk.f32.mxu1 %vm1698_vm13, %v2903_v60  ;;  %v2564_v45 = vpop.permute.xlu0 %2563 }
 0x384   : > { %v2872_v17 = vsel %vm1628_vm11, %v2840_v62, %v2564_v45 }
 0x385   : > { %v2370_v0 = vpop.permute.xlu1 %2369  ;;  %2681 = vrot.lane.b32.xlu0 %v6050_v48, %s3986_s30 }
 0x386   : > { %v2809_v18 = vsel %vm1562_vm9, %v2777_v11, %v2370_v0 }
 0x387   : > { %2197 = vrot.lane.b32.xlu1 %v5890_v52, %s3981_s6  ;;  %v2274_v2 = vpop.permute.xlu0 %2273 }
 0x388   : > { %v2778_v29 = vsel %vm1529_vm8, %v2746_v30, %v2274_v2  ;;  %v2109_v30 = vld [vmem:[#allocation3 + $0x140] sm:$0xff] }
 0x389   : > { %v2372_v55 = vpop.permute.xlu1 %2371  ;;  %2487 = vrot.lane.b32.xlu0 %v5980_v1, %s3984_s23 }
 0x38a   : > { %v2810_v35 = vsel %vm1562_vm9, %v2778_v29, %v2372_v55 }
 0x38b   : > { %2585 = vrot.lane.b32.xlu1 %v6029_v39, %s3985_s29  ;;  %v2662_v54 = vpop.permute.xlu0 %2661 }
 0x38c   : > { %v2904_v37 = vsel %vm1661_vm12, %v2872_v17, %v2662_v54 }
 0x38d   : > { %v2470_v21 = vpop.permute.xlu1 %2469  ;;  %2489 = vrot.lane.b32.xlu0 %v6002_v63, %s3984_s23  ;;  %3799 = vmatmul.mubr.msk.f32.gmra.mxu1 %vm1698_vm13, %v2904_v37 }
 0x38e   : > { %v2842_v57 = vsel %vm1595_vm10, %v2810_v35, %v2470_v21 }
 0x38f   : > { %2295 = vrot.lane.b32.xlu1 %v5932_v50, %s3982_s7  ;;  %v2468_v38 = vpop.permute.xlu0 %2467 }
 0x390   : > { %v2841_v7 = vsel %vm1595_vm10, %v2809_v18, %v2468_v38  ;;  %v2108_v38 = vld [vmem:[#allocation3 + $0x138] sm:$0xff]  ;;  %v2749_v18 = vsel %vm273_vm0, %v5563_v44, %v5761_v25 }
 0x391   : > { %v2276_v26 = vpop.permute.xlu1 %2275  ;;  %2199 = vrot.lane.b32.xlu0 %v5910_v61, %s3981_s6 }
 0x392   : > { %v2779_v31 = vsel %vm1529_vm8, %v2747_v12, %v2276_v26 }
 0x393   : > { %2683 = vrot.lane.b32.xlu1 %v6080_v15, %s3986_s30  ;;  %v2566_v36 = vpop.permute.xlu0 %2565 }
 0x394   : > { %v2873_v27 = vsel %vm1628_vm11, %v2841_v7, %v2566_v36 }
 0x395   : > { %v2664_v20 = vpop.permute.xlu1 %2663  ;;  %2587 = vrot.lane.b32.xlu0 %v6050_v48, %s3985_s29 }
 0x396   : > { %v2905_v47 = vsel %vm1661_vm12, %v2873_v27, %v2664_v20 }
 0x397   : > { %2393 = vrot.lane.b32.xlu1 %v5980_v1, %s3983_s8  ;;  %3801 = vmatprep.mubr.msk.f32.mxu1 %vm1698_vm13, %v2905_v47  ;;  %v2568_v59 = vpop.permute.xlu0 %2567 }
 0x398   : > { %v2874_v13 = vsel %vm1628_vm11, %v2842_v57, %v2568_v59 }
 0x399   : > { %v2374_v23 = vpop.permute.xlu1 %2373  ;;  %2297 = vrot.lane.b32.xlu0 %v5952_v42, %s3982_s7 }
 0x39a   : > { %v2811_v60 = vsel %vm1562_vm9, %v2779_v31, %v2374_v23  ;;  %v2750_v23 = vsel %vm273_vm0, %v5559_v34, %v5757_v14 }
 0x39b   : > { %2395 = vrot.lane.b32.xlu1 %v6002_v63, %s3983_s8  ;;  %v2278_v24 = vpop.permute.xlu0 %2277 }
 0x39c   : > { %v2780_v62 = vsel %vm1529_vm8, %v2748_v8, %v2278_v24 }
 0x39d   : > { %v2376_v28 = vpop.permute.xlu1 %2375  ;;  %2685 = vrot.lane.b32.xlu0 %v6100_v40, %s3986_s30 }
 0x39e   : > { %v2812_v54 = vsel %vm1562_vm9, %v2780_v62, %v2376_v28  ;;  %v3915_v62 = vld [vmem:[#allocation3 + $0xa8] sm:$0xff] }
 0x39f   : > { %2201 = vrot.lane.b32.xlu1 %v5932_v50, %s3981_s6  ;;  %v2666_v32 = vpop.permute.xlu0 %2665 }
 0x3a0   : > { %v2906_v33 = vsel %vm1661_vm12, %v2874_v13, %v2666_v32  ;;  %v2110_v32 = vld [vmem:[#allocation3 + $0x148] sm:$0xff] }
 0x3a1   : > { %v2474_v6 = vpop.permute.xlu1 %2473  ;;  %2491 = vrot.lane.b32.xlu0 %v6029_v39, %s3984_s23  ;;  %3802 = vmatmul.mubr.msk.f32.gmra.mxu1 %vm1698_vm13, %v2906_v33 }
 0x3a2   : > { %v2844_v21 = vsel %vm1595_vm10, %v2812_v54, %v2474_v6 }
 0x3a3   : > { %2589 = vrot.lane.b32.xlu1 %v6080_v15, %s3985_s29  ;;  %v2472_v3 = vpop.permute.xlu0 %2471 }
 0x3a4   : > { %v2843_v45 = vsel %vm1595_vm10, %v2811_v60, %v2472_v3 }
 0x3a5   : > { %v2280_v16 = vpop.permute.xlu1 %2279  ;;  %2493 = vrot.lane.b32.xlu0 %v6050_v48, %s3984_s23 }
 0x3a6   : > { %v2781_v7 = vsel %vm1529_vm8, %v2749_v18, %v2280_v16 }
 0x3a7   : > { %2299 = vrot.lane.b32.xlu1 %v5980_v1, %s3982_s7  ;;  %v2570_v51 = vpop.permute.xlu0 %2569 }
 0x3a8   : > { %v2875_v0 = vsel %vm1628_vm11, %v2843_v45, %v2570_v51 }
 0x3a9   : > { %v2668_v2 = vpop.permute.xlu1 %2667  ;;  %2203 = vrot.lane.b32.xlu0 %v5952_v42, %s3981_s6 }
 0x3aa   : > { %v2907_v43 = vsel %vm1661_vm12, %v2875_v0, %v2668_v2 }
 0x3ab   : > { %2687 = vrot.lane.b32.xlu1 %v6126_v22, %s3986_s30  ;;  %3804 = vmatprep.mubr.msk.f32.mxu1 %vm1698_vm13, %v2907_v43  ;;  %v2572_v49 = vpop.permute.xlu0 %2571 }
 0x3ac   : > { %v2876_v41 = vsel %vm1628_vm11, %v2844_v21, %v2572_v49 }
 0x3ad   : > { %v2378_v55 = vpop.permute.xlu1 %2377  ;;  %2591 = vrot.lane.b32.xlu0 %v6100_v40, %s3985_s29 }
 0x3ae   : > { %v2813_v27 = vsel %vm1562_vm9, %v2781_v7, %v2378_v55 }
 0x3af   : > { %2397 = vrot.lane.b32.xlu1 %v6029_v39, %s3983_s8  ;;  %v2282_v17 = vpop.permute.xlu0 %2281 }
 0x3b0   : > { %v2782_v24 = vsel %vm1529_vm8, %v2750_v23, %v2282_v17  ;;  %v2752_v17 = vsel %vm273_vm0, %v3915_v62, %v5765_v19 }
 0x3b1   : > { %v2380_v37 = vpop.permute.xlu1 %2379  ;;  %2301 = vrot.lane.b32.xlu0 %v6002_v63, %s3982_s7 }
 0x3b2   : > { %v2814_v28 = vsel %vm1562_vm9, %v2782_v24, %v2380_v37 }
 0x3b3   : > { %2399 = vrot.lane.b32.xlu1 %v6050_v48, %s3983_s8  ;;  %v2670_v5 = vpop.permute.xlu0 %2669 }
 0x3b4   : > { %v2908_v58 = vsel %vm1661_vm12, %v2876_v41, %v2670_v5 }
 0x3b5   : > { %v2478_v11 = vpop.permute.xlu1 %2477  ;;  %2689 = vrot.lane.b32.xlu0 %v2108_v38, %s3986_s30  ;;  %3805 = vmatmul.mubr.msk.f32.gmra.mxu1 %vm1698_vm13, %v2908_v58 }
 0x3b6   : > { %v2846_v57 = vsel %vm1595_vm10, %v2814_v28, %v2478_v11 }
 0x3b7   : > { %2205 = vrot.lane.b32.xlu1 %v5980_v1, %s3981_s6  ;;  %v2476_v26 = vpop.permute.xlu0 %2475 }
 0x3b8   : > { %v2845_v20 = vsel %vm1595_vm10, %v2813_v27, %v2476_v26 }
 0x3b9   : > { %v2284_v36 = vpop.permute.xlu1 %2283  ;;  %2495 = vrot.lane.b32.xlu0 %v6080_v15, %s3984_s23 }
 0x3bb   : > { %2593 = vrot.lane.b32.xlu1 %v6126_v22, %s3985_s29  ;;  %v2574_v47 = vpop.permute.xlu0 %2573 }
 0x3bc   : > { %v2877_v1 = vsel %vm1628_vm11, %v2845_v20, %v2574_v47 }
 0x3bd   : > { %v2672_v59 = vpop.permute.xlu1 %2671  ;;  %2497 = vrot.lane.b32.xlu0 %v6100_v40, %s3984_s23 }
 0x3be   : > { %v2909_v44 = vsel %vm1661_vm12, %v2877_v1, %v2672_v59  ;;  %v3916_v1 = vld [vmem:[#allocation3 + $0xb0] sm:$0xff] }
 0x3bf   : > { %2303 = vrot.lane.b32.xlu1 %v6029_v39, %s3982_s7  ;;  %3807 = vmatprep.mubr.msk.f32.mxu1 %vm1698_vm13, %v2909_v44  ;;  %v2576_v25 = vpop.permute.xlu0 %2575 }
 0x3c0   : > { %v2878_v13 = vsel %vm1628_vm11, %v2846_v57, %v2576_v25 }
 0x3c1   : > { %v2382_v29 = vpop.permute.xlu1 %2381  ;;  %2207 = vrot.lane.b32.xlu0 %v6002_v63, %s3981_s6 }
 0x3c3   : > { %2691 = vrot.lane.b32.xlu1 %v2109_v30, %s3986_s30  ;;  %v2286_v35 = vpop.permute.xlu0 %2285 }
 0x3c4   : > { %v2784_v21 = vsel %vm1529_vm8, %v2752_v17, %v2286_v35 }
 0x3c5   : > { %v2384_v39 = vpop.permute.xlu1 %2383  ;;  %2595 = vrot.lane.b32.xlu0 %v2108_v38, %s3985_s29 }
 0x3c6   : > { %v2816_v11 = vsel %vm1562_vm9, %v2784_v21, %v2384_v39 }
 0x3c7   : > { %2401 = vrot.lane.b32.xlu1 %v6080_v15, %s3983_s8  ;;  %v2674_v34 = vpop.permute.xlu0 %2673  ;;  %v2751_v15 = vsel %vm273_vm0, %v5573_v4, %v5771_v9  ;;  %v2112_v4 = vld [vmem:[#allocation3 + $0x158] sm:$0xff] }
 0x3c8   : > { %v2910_v14 = vsel %vm1661_vm12, %v2878_v13, %v2674_v34 }
 0x3c9   : > { %v2190_v63 = vpop.permute.xlu1 %2189  ;;  %2305 = vrot.lane.b32.xlu0 %v6050_v48, %s3982_s7  ;;  %3808 = vmatmul.mubr.msk.f32.gmra.mxu1 %vm1698_vm13, %v2910_v14  ;;  %v2783_v48 = vsel %vm1529_vm8, %v2751_v15, %v2284_v36 }
 0x3ca   : > { %v2815_v12 = vsel %vm1562_vm9, %v2783_v48, %v2382_v29  ;;  %v2753_v59 = vsel %vm273_vm0, %v3916_v1, %v2190_v63 }
 0x3cb   : > { %2403 = vrot.lane.b32.xlu1 %v6100_v40, %s3983_s8  ;;  %v2480_v33 = vpop.permute.xlu0 %2479  ;;  %s6208_s8 = scalar_lea.vmem %s6474_s3, %s3642_s28  ;;  %s3567_s28 = sshll.u32 %s196_s27, 1 }
 0x3cc   : > { %v2847_v40 = vsel %vm1595_vm10, %v2815_v12, %v2480_v33 }
 0x3cd   : > { %v2578_v6 = vpop.permute.xlu1 %2577  ;;  %2693 = vrot.lane.b32.xlu0 %v2110_v32, %s3986_s30 }
 0x3ce   : > { %v2879_v9 = vsel %vm1628_vm11, %v2847_v40, %v2578_v6 }
 0x3cf   : > { %2501 = vrot.lane.b32.xlu1 %v2108_v38, %s3984_s23  ;;  %v2482_v3 = vpop.permute.xlu0 %2481 }
 0x3d0   : > { %v2848_v18 = vsel %vm1595_vm10, %v2816_v11, %v2482_v3 }
 0x3d1   : > { %v2288_v31 = vpop.permute.xlu1 %2287  ;;  %2499 = vrot.lane.b32.xlu0 %v6126_v22, %s3984_s23  ;;  %v2111_v22 = vld [vmem:[#allocation3 + $0x150] sm:$0xff]  ;;  %s198_s23 = scalar_lea.vmem [#allocation4], %s3567_s28 }
 0x3d2   : > { %v2785_v25 = vsel %vm1529_vm8, %v2753_v59, %v2288_v31  ;;  %v3917_v31 = vld [vmem:[#allocation3 + $0xb8] sm:$0xff] }
 0x3d3   : > { %2599 = vrot.lane.b32.xlu1 %v2110_v32, %s3985_s29  ;;  %v6201_v16 = vpop.permute.xlu0 %2191 }
 0x3d4   : > { %v2754_v40 = vsel %vm273_vm0, %v3917_v31, %v6201_v16 }
 0x3d5   : > { %v2676_v60 = vpop.permute.xlu1 %2675  ;;  %v3782_v45 = vpop.f32.mrf.mxu1  ;;  %2597 = vrot.lane.b32.xlu0 %v2109_v30, %s3985_s29  ;;  %s3479_s29 = sshll.u32 %s198_s23, 4  ;;  %s3480_s29 = int_to_ptr.vmem [resolvable:$true] %s3479_s29 }
 0x3d6   : > { %v2911_v51 = vsel %vm1661_vm12, %v2879_v9, %v2676_v60  ;;  %3252 = vst.msk [vmem:[%s6208_s8 + $0x8] sm:$0xff] %vm273_vm0, %v3782_v45  ;;  %v3353_v0 = vmul.f32 %v3782_v45, %v3782_v45  ;;  %v3284_v49 = vsel %vm273_vm0, %v3782_v45, 0.0  ;;  %s3918_s11 = scalar_lea.vmem %s3480_s29, 32  ;;  %p3925_p0 = scmp.lt.s32.totalorder %s3480_s29, %s3923_s12 }
 0x3d7   : > { %2697 = vrot.lane.b32.xlu1 %v2112_v4, %s3986_s30  ;;  %v3092_v2 = vpop.f32.mrf.mxu1  ;;  %3810 = vmatprep.mubr.msk.f32.mxu1 %vm1698_vm13, %v2911_v51  ;;  %v2580_v43 = vpop.permute.xlu0 %2579  ;;  %p3919_p11 = scmp.ne.s32.totalorder %s3480_s29, %s3918_s11  ;;  %p3926_p1 = scmp.lt.s32.totalorder %s3924_s13, %s3918_s11 }
 0x3d8   : > { %3251 = vst.msk [vmem:[%s6208_s8] sm:$0xff] %vm273_vm0, %v3092_v2  ;;  %v3283_v8 = vsel %vm273_vm0, %v3092_v2, 0.0  ;;  %v3352_v55 = vmul.f32 %v3092_v2, %v3092_v2  ;;  %v3385_v38 = vsel %vm273_vm0, %v3353_v0, 0.0  ;;  %v2880_v19 = vsel %vm1628_vm11, %v2848_v18, %v2580_v43 }
 0x3d9   : > { %v3285_v54 = vadd.f32 %v3284_v49, %v3283_v8  ;;  %v2386_v37 = vpop.permute.xlu1 %2385  ;;  %2695 = vrot.lane.b32.xlu0 %v2111_v22, %s3986_s30  ;;  %p3920_p12 = pnand %p3919_p11, %p4051_p5  ;;  %p3927_p2 = por %p3926_p1, %p3925_p0 }
 0x3da   : > { %v3384_v41 = vsel %vm273_vm0, %v3352_v55, 0.0  ;;  %v2817_v30 = vsel %vm1562_vm9, %v2785_v25, %v2386_v37 }
 0x3db   : > { %v3386_v5 = vadd.f32 %v3385_v38, %v3384_v41  ;;  %v2290_v58 = vpop.permute.xlu0 %2289  ;;  %p3921_p13 = pneg %p3920_p12 }
 0x3dc   : > { %v2786_v60 = vsel %vm1529_vm8, %v2754_v40, %v2290_v58 }
 0x3dd   : > { %v2388_v26 = vpop.permute.xlu1 %2387  ;;  %p3928_p3 = pnand %p3927_p2, %p3921_p13 }
 0x3de   : > { %v2818_v51 = vsel %vm1562_vm9, %v2786_v60, %v2388_v26 }
 0x3df   : > { %v2678_v7 = vpop.permute.xlu0 %2677 }
 0x3e0   : > { %v2912_v36 = vsel %vm1661_vm12, %v2880_v19, %v2678_v7 }
 0x3e1   : > { %v2194_v27 = vpop.permute.xlu1 %2193  ;;  %3811 = vmatmul.mubr.msk.f32.gmra.mxu1 %vm1698_vm13, %v2912_v36 }
 0x3e2   : > { %v2755_v17 = vsel %vm273_vm0, %v5803_v10, %v2194_v27 }
 0x3e3   : > { %v2484_v20 = vpop.permute.xlu0 %2483 }
 0x3e4   : > { %v2849_v24 = vsel %vm1595_vm10, %v2817_v30, %v2484_v20 }
 0x3e5   : > { %v2582_v47 = vpop.permute.xlu1 %2581 }
 0x3e6   : > { %v2881_v34 = vsel %vm1628_vm11, %v2849_v24, %v2582_v47 }
 0x3e7   : > { %v2486_v44 = vpop.permute.xlu0 %2485 }
 0x3e8   : > { %v2850_v22 = vsel %vm1595_vm10, %v2818_v51, %v2486_v44 }
 0x3e9   : > { %v2292_v23 = vpop.permute.xlu1 %2291  ;;  %v3785_v29 = vpop.f32.mrf.mxu1 }
 0x3ea   : > { %3254 = vst.msk [vmem:[%s6208_s8 + $0x18] sm:$0xff] %vm273_vm0, %v3785_v29  ;;  %v3355_v39 = vmul.f32 %v3785_v29, %v3785_v29  ;;  %v3288_v32 = vsel %vm273_vm0, %v3785_v29, 0.0  ;;  %v2787_v21 = vsel %vm1529_vm8, %v2755_v17, %v2292_v23 }
 0x3eb   : > { %v3102_v35 = vpop.f32.mrf.mxu1  ;;  %v2196_v28 = vpop.permute.xlu0 %2195 }
 0x3ec   : > { %3253 = vst.msk [vmem:[%s6208_s8 + $0x10] sm:$0xff] %vm273_vm0, %v3102_v35  ;;  %v3286_v57 = vsel %vm273_vm0, %v3102_v35, 0.0  ;;  %v3354_v13 = vmul.f32 %v3102_v35, %v3102_v35  ;;  %v3389_v12 = vsel %vm273_vm0, %v3355_v39, 0.0  ;;  %v2756_v30 = vsel %vm273_vm0, %v5826_v56, %v2196_v28 }
 0x3ed   : > { %v3287_v14 = vadd.f32 %v3286_v57, %v3285_v54  ;;  %v2680_v63 = vpop.permute.xlu1 %2679 }
 0x3ee   : > { %v3387_v33 = vsel %vm273_vm0, %v3354_v13, 0.0  ;;  %v2913_v6 = vsel %vm1661_vm12, %v2881_v34, %v2680_v63 }
 0x3ef   : > { %v3388_v15 = vadd.f32 %v3387_v33, %v3386_v5  ;;  %3813 = vmatprep.mubr.msk.f32.mxu1 %vm1698_vm13, %v2913_v6  ;;  %v2584_v3 = vpop.permute.xlu0 %2583  ;;  %v3289_v48 = vadd.f32 %v3288_v32, %v3287_v14 }
 0x3f0   : > { %v2882_v2 = vsel %vm1628_vm11, %v2850_v22, %v2584_v3 }
 0x3f1   : > { %v2390_v4 = vpop.permute.xlu1 %2389  ;;  %v3390_v9 = vadd.f32 %v3389_v12, %v3388_v15 }
 0x3f2   : > { %v2819_v58 = vsel %vm1562_vm9, %v2787_v21, %v2390_v4 }
 0x3f3   : > { %v2294_v45 = vpop.permute.xlu0 %2293 }
 0x3f4   : > { %v2788_v29 = vsel %vm1529_vm8, %v2756_v30, %v2294_v45 }
 0x3f5   : > { %v2392_v0 = vpop.permute.xlu1 %2391 }
 0x3f6   : > { %v2820_v35 = vsel %vm1562_vm9, %v2788_v29, %v2392_v0 }
 0x3f7   : > { %v2682_v43 = vpop.permute.xlu0 %2681 }
 0x3f8   : > { %v2914_v49 = vsel %vm1661_vm12, %v2882_v2, %v2682_v43 }
 0x3f9   : > { %v2198_v8 = vpop.permute.xlu1 %2197  ;;  %3814 = vmatmul.mubr.msk.f32.gmra.mxu1 %vm1698_vm13, %v2914_v49 }
 0x3fa   : > { %v2757_v40 = vsel %vm273_vm0, %v5848_v46, %v2198_v8 }
 0x3fb   : > { %v2488_v16 = vpop.permute.xlu0 %2487 }
 0x3fc   : > { %v2851_v18 = vsel %vm1595_vm10, %v2819_v58, %v2488_v16 }
 0x3fd   : > { %v2586_v55 = vpop.permute.xlu1 %2585  ;;  %v3788_v62 = vpop.f32.mrf.mxu1 }
 0x3fe   : > { %3256 = vst.msk [vmem:[%s6208_s8 + $0x28] sm:$0xff] %vm273_vm0, %v3788_v62  ;;  %v3357_v38 = vmul.f32 %v3788_v62, %v3788_v62  ;;  %v3292_v19 = vsel %vm273_vm0, %v3788_v62, 0.0  ;;  %v2883_v47 = vsel %vm1628_vm11, %v2851_v18, %v2586_v55 }
 0x3ff   : > { %v3112_v54 = vpop.f32.mrf.mxu1  ;;  %v2490_v37 = vpop.permute.xlu0 %2489 }
 0x400   : > { %3255 = vst.msk [vmem:[%s6208_s8 + $0x20] sm:$0xff] %vm273_vm0, %v3112_v54  ;;  %v3290_v41 = vsel %vm273_vm0, %v3112_v54, 0.0  ;;  %v3356_v5 = vmul.f32 %v3112_v54, %v3112_v54  ;;  %v3393_v20 = vsel %vm273_vm0, %v3357_v38, 0.0  ;;  %v2852_v57 = vsel %vm1595_vm10, %v2820_v35, %v2490_v37 }
 0x401   : > { %v3291_v11 = vadd.f32 %v3290_v41, %v3289_v48  ;;  %v2296_v26 = vpop.permute.xlu1 %2295 }
 0x402   : > { %v3391_v10 = vsel %vm273_vm0, %v3356_v5, 0.0  ;;  %v2789_v45 = vsel %vm1529_vm8, %v2757_v40, %v2296_v26 }
 0x403   : > { %v3392_v7 = vadd.f32 %v3391_v10, %v3390_v9  ;;  %v2200_v36 = vpop.permute.xlu0 %2199  ;;  %v3293_v27 = vadd.f32 %v3292_v19, %v3291_v11 }
 0x404   : > { %v2758_v62 = vsel %vm273_vm0, %v5868_v53, %v2200_v36 }
 0x405   : > { %v2684_v1 = vpop.permute.xlu1 %2683  ;;  %v3394_v59 = vadd.f32 %v3393_v20, %v3392_v7 }
 0x406   : > { %v2915_v44 = vsel %vm1661_vm12, %v2883_v47, %v2684_v1 }
 0x407   : > { %3816 = vmatprep.mubr.msk.f32.mxu1 %vm1698_vm13, %v2915_v44  ;;  %v2588_v25 = vpop.permute.xlu0 %2587 }
 0x408   : > { %v2884_v13 = vsel %vm1628_vm11, %v2852_v57, %v2588_v25 }
 0x409   : > { %v2394_v23 = vpop.permute.xlu1 %2393 }
 0x40a   : > { %v2821_v0 = vsel %vm1562_vm9, %v2789_v45, %v2394_v23 }
 0x40b   : > { %v2298_v24 = vpop.permute.xlu0 %2297 }
 0x40c   : > { %v2790_v54 = vsel %vm1529_vm8, %v2758_v62, %v2298_v24 }
 0x40d   : > { %v2396_v39 = vpop.permute.xlu1 %2395 }
 0x40e   : > { %v2822_v21 = vsel %vm1562_vm9, %v2790_v54, %v2396_v39 }
 0x40f   : > { %v2686_v34 = vpop.permute.xlu0 %2685 }
 0x410   : > { %v2916_v14 = vsel %vm1661_vm12, %v2884_v13, %v2686_v34 }
 0x411   : > { %v2202_v63 = vpop.permute.xlu1 %2201  ;;  %v3791_v32 = vpop.f32.mrf.mxu1  ;;  %3817 = vmatmul.mubr.msk.f32.gmra.mxu1 %vm1698_vm13, %v2916_v14 }
 0x412   : > { %3258 = vst.msk [vmem:[%s6208_s8 + $0x38] sm:$0xff] %vm273_vm0, %v3791_v32  ;;  %v3359_v33 = vmul.f32 %v3791_v32, %v3791_v32  ;;  %v3296_v12 = vsel %vm273_vm0, %v3791_v32, 0.0  ;;  %v2759_v23 = vsel %vm273_vm0, %v5890_v52, %v2202_v63 }
 0x413   : > { %v3122_v56 = vpop.f32.mrf.mxu1  ;;  %v2492_v28 = vpop.permute.xlu0 %2491 }
 0x414   : > { %3257 = vst.msk [vmem:[%s6208_s8 + $0x30] sm:$0xff] %vm273_vm0, %v3122_v56  ;;  %v3294_v6 = vsel %vm273_vm0, %v3122_v56, 0.0  ;;  %v3358_v15 = vmul.f32 %v3122_v56, %v3122_v56  ;;  %v3397_v51 = vsel %vm273_vm0, %v3359_v33, 0.0  ;;  %v2853_v43 = vsel %vm1595_vm10, %v2821_v0, %v2492_v28 }
 0x415   : > { %v3295_v3 = vadd.f32 %v3294_v6, %v3293_v27  ;;  %v2590_v48 = vpop.permute.xlu1 %2589 }
 0x416   : > { %v3395_v31 = vsel %vm273_vm0, %v3358_v15, 0.0  ;;  %v2885_v16 = vsel %vm1628_vm11, %v2853_v43, %v2590_v48 }
 0x417   : > { %v3396_v4 = vadd.f32 %v3395_v31, %v3394_v59  ;;  %v2494_v9 = vpop.permute.xlu0 %2493  ;;  %v3297_v60 = vadd.f32 %v3296_v12, %v3295_v3 }
 0x418   : > { %v2854_v5 = vsel %vm1595_vm10, %v2822_v21, %v2494_v9 }
 0x419   : > { %v2300_v22 = vpop.permute.xlu1 %2299  ;;  %v3398_v2 = vadd.f32 %v3397_v51, %v3396_v4 }
 0x41a   : > { %v2791_v24 = vsel %vm1529_vm8, %v2759_v23, %v2300_v22 }
 0x41b   : > { %v2204_v49 = vpop.permute.xlu0 %2203 }
 0x41c   : > { %v2760_v52 = vsel %vm273_vm0, %v5910_v61, %v2204_v49 }
 0x41d   : > { %v2688_v55 = vpop.permute.xlu1 %2687 }
 0x41e   : > { %v2917_v46 = vsel %vm1661_vm12, %v2885_v16, %v2688_v55 }
 0x41f   : > { %3819 = vmatprep.mubr.msk.f32.mxu1 %vm1698_vm13, %v2917_v46  ;;  %v2592_v8 = vpop.permute.xlu0 %2591 }
 0x420   : > { %v2886_v58 = vsel %vm1628_vm11, %v2854_v5, %v2592_v8 }
 0x421   : > { %v2398_v17 = vpop.permute.xlu1 %2397 }
 0x422   : > { %v2823_v35 = vsel %vm1562_vm9, %v2791_v24, %v2398_v17 }
 0x423   : > { %v2302_v37 = vpop.permute.xlu0 %2301 }
 0x424   : > { %v2792_v33 = vsel %vm1529_vm8, %v2760_v52, %v2302_v37 }
 0x425   : > { %v2400_v38 = vpop.permute.xlu1 %2399  ;;  %v3794_v41 = vpop.f32.mrf.mxu1 }
 0x426   : > { %3260 = vst.msk [vmem:[%s6208_s8 + $0x48] sm:$0xff] %vm273_vm0, %v3794_v41  ;;  %v3361_v18 = vmul.f32 %v3794_v41, %v3794_v41  ;;  %v3300_v27 = vsel %vm273_vm0, %v3794_v41, 0.0  ;;  %v2824_v31 = vsel %vm1562_vm9, %v2792_v33, %v2400_v38 }
 0x427   : > { %v3132_v11 = vpop.f32.mrf.mxu1  ;;  %v2690_v26 = vpop.permute.xlu0 %2689 }
 0x428   : > { %3259 = vst.msk [vmem:[%s6208_s8 + $0x40] sm:$0xff] %vm273_vm0, %v3132_v11  ;;  %v3298_v53 = vsel %vm273_vm0, %v3132_v11, 0.0  ;;  %v3360_v19 = vmul.f32 %v3132_v11, %v3132_v11  ;;  %v2918_v10 = vsel %vm1661_vm12, %v2886_v58, %v2690_v26  ;;  %v3401_v44 = vsel %vm273_vm0, %v3361_v18, 0.0 }
 0x429   : > { %v3299_v7 = vadd.f32 %v3298_v53, %v3297_v60  ;;  %v2206_v36 = vpop.permute.xlu1 %2205  ;;  %3820 = vmatmul.mubr.msk.f32.gmra.mxu1 %vm1698_vm13, %v2918_v10 }
 0x42a   : > { %v3399_v20 = vsel %vm273_vm0, %v3360_v19, 0.0  ;;  %v2761_v62 = vsel %vm273_vm0, %v5932_v50, %v2206_v36 }
 0x42b   : > { %v3400_v47 = vadd.f32 %v3399_v20, %v3398_v2  ;;  %v2496_v1 = vpop.permute.xlu0 %2495  ;;  %v3301_v59 = vadd.f32 %v3300_v27, %v3299_v7 }
 0x42c   : > { %v2855_v57 = vsel %vm1595_vm10, %v2823_v35, %v2496_v1 }
 0x42d   : > { %v2594_v25 = vpop.permute.xlu1 %2593  ;;  %v3402_v30 = vadd.f32 %v3401_v44, %v3400_v47 }
 0x42e   : > { %v2887_v34 = vsel %vm1628_vm11, %v2855_v57, %v2594_v25 }
 0x42f   : > { %v2498_v29 = vpop.permute.xlu0 %2497 }
 0x430   : > { %v2856_v61 = vsel %vm1595_vm10, %v2824_v31, %v2498_v29 }
 0x431   : > { %v2304_v39 = vpop.permute.xlu1 %2303 }
 0x432   : > { %v2793_v37 = vsel %vm1529_vm8, %v2761_v62, %v2304_v39 }
 0x433   : > { %v2208_v13 = vpop.permute.xlu0 %2207 }
 0x434   : > { %v2762_v8 = vsel %vm273_vm0, %v5952_v42, %v2208_v13 }
 0x435   : > { %v2692_v14 = vpop.permute.xlu1 %2691 }
 0x436   : > { %v2919_v32 = vsel %vm1661_vm12, %v2887_v34, %v2692_v14 }
 0x437   : > { %3822 = vmatprep.mubr.msk.f32.mxu1 %vm1698_vm13, %v2919_v32  ;;  %v2596_v56 = vpop.permute.xlu0 %2595 }
 0x438   : > { %v2888_v45 = vsel %vm1628_vm11, %v2856_v61, %v2596_v56 }
 0x439   : > { %v2402_v63 = vpop.permute.xlu1 %2401  ;;  %v3797_v28 = vpop.f32.mrf.mxu1 }
 0x43a   : > { %3262 = vst.msk [vmem:[%s6208_s8 + $0x58] sm:$0xff] %vm273_vm0, %v3797_v28  ;;  %v3363_v3 = vmul.f32 %v3797_v28, %v3797_v28  ;;  %v3304_v9 = vsel %vm273_vm0, %v3797_v28, 0.0  ;;  %v2825_v21 = vsel %vm1562_vm9, %v2793_v37, %v2402_v63 }
 0x43b   : > { %v3142_v6 = vpop.f32.mrf.mxu1  ;;  %v2306_v15 = vpop.permute.xlu0 %2305 }
 0x43c   : > { %3261 = vst.msk [vmem:[%s6208_s8 + $0x50] sm:$0xff] %vm273_vm0, %v3142_v6  ;;  %v3302_v48 = vsel %vm273_vm0, %v3142_v6, 0.0  ;;  %v3362_v12 = vmul.f32 %v3142_v6, %v3142_v6  ;;  %v3405_v2 = vsel %vm273_vm0, %v3363_v3, 0.0  ;;  %v2794_v17 = vsel %vm1529_vm8, %v2762_v8, %v2306_v15 }
 0x43d   : > { %v3303_v40 = vadd.f32 %v3302_v48, %v3301_v59  ;;  %v2404_v4 = vpop.permute.xlu1 %2403 }
 0x43e   : > { %v3403_v60 = vsel %vm273_vm0, %v3362_v12, 0.0  ;;  %v2826_v38 = vsel %vm1562_vm9, %v2794_v17, %v2404_v4 }
 0x43f   : > { %v3404_v51 = vadd.f32 %v3403_v60, %v3402_v30  ;;  %v2694_v0 = vpop.permute.xlu0 %2693  ;;  %v3305_v22 = vadd.f32 %v3304_v9, %v3303_v40 }
 0x440   : > { %v2920_v43 = vsel %vm1661_vm12, %v2888_v45, %v2694_v0 }
 0x441   : > { %v2502_v49 = vpop.permute.xlu1 %2501  ;;  %3823 = vmatmul.mubr.msk.f32.gmra.mxu1 %vm1698_vm13, %v2920_v43  ;;  %v3406_v16 = vadd.f32 %v3405_v2, %v3404_v51 }
 0x442   : > { %v2858_v58 = vsel %vm1595_vm10, %v2826_v38, %v2502_v49 }
 0x443   : > { %v2500_v55 = vpop.permute.xlu0 %2499 }
 0x444   : > { %v2857_v41 = vsel %vm1595_vm10, %v2825_v21, %v2500_v55 }
 0x445   : > { %v2600_v46 = vpop.permute.xlu1 %2599 }
 0x446   : > { %v2890_v50 = vsel %vm1628_vm11, %v2858_v58, %v2600_v46 }
 0x447   : > { %v2598_v54 = vpop.permute.xlu0 %2597 }
 0x448   : > { %v2889_v42 = vsel %vm1628_vm11, %v2857_v41, %v2598_v54 }
 0x449   : > { %v2698_v5 = vpop.permute.xlu1 %2697 }
 0x44a   : > { %v2922_v18 = vsel %vm1661_vm12, %v2890_v50, %v2698_v5 }
 0x44b   : > { %v2696_v11 = vpop.permute.xlu0 %2695 }
 0x44c   : > { %v2921_v26 = vsel %vm1661_vm12, %v2889_v42, %v2696_v11 }
 0x44d   : > { %v3800_v53 = vpop.f32.mrf.mxu1  ;;  %3825 = vmatprep.mubr.msk.f32.mxu1 %vm1698_vm13, %v2921_v26 }
 0x44e   : > { %3264 = vst.msk [vmem:[%s6208_s8 + $0x68] sm:$0xff] %vm273_vm0, %v3800_v53  ;;  %3826 = vmatmul.mubr.msk.f32.gmra.mxu1 %vm1698_vm13, %v2922_v18  ;;  %v3365_v10 = vmul.f32 %v3800_v53, %v3800_v53  ;;  %v3308_v20 = vsel %vm273_vm0, %v3800_v53, 0.0 }
 0x44f   : > { %v3152_v19 = vpop.f32.mrf.mxu1 }
 0x450   : > { %3263 = vst.msk [vmem:[%s6208_s8 + $0x60] sm:$0xff] %vm273_vm0, %v3152_v19  ;;  %v3306_v7 = vsel %vm273_vm0, %v3152_v19, 0.0  ;;  %v3364_v36 = vmul.f32 %v3152_v19, %v3152_v19  ;;  %v3409_v44 = vsel %vm273_vm0, %v3365_v10, 0.0 }
 0x451   : > { %v3307_v27 = vadd.f32 %v3306_v7, %v3305_v22 }
 0x452   : > { %v3407_v47 = vsel %vm273_vm0, %v3364_v36, 0.0 }
 0x453   : > { %v3408_v1 = vadd.f32 %v3407_v47, %v3406_v16  ;;  %v3309_v59 = vadd.f32 %v3308_v20, %v3307_v27 }
 0x455   : > { %v3410_v25 = vadd.f32 %v3409_v44, %v3408_v1 }
 0x461   : > { %v3803_v30 = vpop.f32.mrf.mxu1 }
 0x462   : > { %3266 = vst.msk [vmem:[%s6208_s8 + $0x78] sm:$0xff] %vm273_vm0, %v3803_v30  ;;  %v3367_v29 = vmul.f32 %v3803_v30, %v3803_v30  ;;  %v3312_v57 = vsel %vm273_vm0, %v3803_v30, 0.0 }
 0x463   : > { %v3162_v23 = vpop.f32.mrf.mxu1 }
 0x464   : > { %3265 = vst.msk [vmem:[%s6208_s8 + $0x70] sm:$0xff] %vm273_vm0, %v3162_v23  ;;  %v3310_v24 = vsel %vm273_vm0, %v3162_v23, 0.0  ;;  %v3366_v35 = vmul.f32 %v3162_v23, %v3162_v23  ;;  %v3413_v32 = vsel %vm273_vm0, %v3367_v29, 0.0 }
 0x465   : > { %v3311_v39 = vadd.f32 %v3310_v24, %v3309_v59 }
 0x466   : > { %v3411_v13 = vsel %vm273_vm0, %v3366_v35, 0.0 }
 0x467   : > { %v3412_v34 = vadd.f32 %v3411_v13, %v3410_v25  ;;  %v3313_v14 = vadd.f32 %v3312_v57, %v3311_v39 }
 0x469   : > { %v3414_v56 = vadd.f32 %v3413_v32, %v3412_v34 }
 0x475   : > { %v3806_v52 = vpop.f32.mrf.mxu1 }
 0x476   : > { %3268 = vst.msk [vmem:[%s6208_s8 + $0x88] sm:$0xff] %vm273_vm0, %v3806_v52  ;;  %v3369_v28 = vmul.f32 %v3806_v52, %v3806_v52  ;;  %v3316_v3 = vsel %vm273_vm0, %v3806_v52, 0.0 }
 0x477   : > { %v3172_v63 = vpop.f32.mrf.mxu1 }
 0x478   : > { %3267 = vst.msk [vmem:[%s6208_s8 + $0x80] sm:$0xff] %vm273_vm0, %v3172_v63  ;;  %v3314_v33 = vsel %vm273_vm0, %v3172_v63, 0.0  ;;  %v3368_v6 = vmul.f32 %v3172_v63, %v3172_v63  ;;  %v3417_v40 = vsel %vm273_vm0, %v3369_v28, 0.0 }
 0x479   : > { %v3315_v15 = vadd.f32 %v3314_v33, %v3313_v14 }
 0x47a   : > { %v3415_v48 = vsel %vm273_vm0, %v3368_v6, 0.0 }
 0x47b   : > { %v3416_v12 = vadd.f32 %v3415_v48, %v3414_v56  ;;  %v3317_v31 = vadd.f32 %v3316_v3, %v3315_v15 }
 0x47d   : > { %v3418_v4 = vadd.f32 %v3417_v40, %v3416_v12 }
 0x489   : > { %v3809_v61 = vpop.f32.mrf.mxu1 }
 0x48a   : > { %3270 = vst.msk [vmem:[%s6208_s8 + $0x98] sm:$0xff] %vm273_vm0, %v3809_v61  ;;  %v3371_v60 = vmul.f32 %v3809_v61, %v3809_v61  ;;  %v3320_v22 = vsel %vm273_vm0, %v3809_v61, 0.0 }
 0x48b   : > { %v3182_v9 = vpop.f32.mrf.mxu1 }
 0x48c   : > { %3269 = vst.msk [vmem:[%s6208_s8 + $0x90] sm:$0xff] %vm273_vm0, %v3182_v9  ;;  %v3318_v45 = vsel %vm273_vm0, %v3182_v9, 0.0  ;;  %v3370_v51 = vmul.f32 %v3182_v9, %v3182_v9  ;;  %v3421_v16 = vsel %vm273_vm0, %v3371_v60, 0.0 }
 0x48d   : > { %v3319_v0 = vadd.f32 %v3318_v45, %v3317_v31 }
 0x48e   : > { %v3419_v2 = vsel %vm273_vm0, %v3370_v51, 0.0 }
 0x48f   : > { %v3420_v43 = vadd.f32 %v3419_v2, %v3418_v4  ;;  %v3321_v49 = vadd.f32 %v3320_v22, %v3319_v0 }
 0x491   : > { %v3422_v55 = vadd.f32 %v3421_v16, %v3420_v43 }
 0x4a1   : > { %v3812_v46 = vpop.f32.mrf.mxu1 }
 0x4a2   : > { %3272 = vst.msk [vmem:[%s6208_s8 + $0xa8] sm:$0xff] %vm273_vm0, %v3812_v46  ;;  %v3373_v62 = vmul.f32 %v3812_v46, %v3812_v46  ;;  %v3324_v21 = vsel %vm273_vm0, %v3812_v46, 0.0 }
 0x4a3   : > { %v3192_v8 = vpop.f32.mrf.mxu1 }
 0x4a4   : > { %3271 = vst.msk [vmem:[%s6208_s8 + $0xa0] sm:$0xff] %vm273_vm0, %v3192_v8  ;;  %v3322_v17 = vsel %vm273_vm0, %v3192_v8, 0.0  ;;  %v3372_v54 = vmul.f32 %v3192_v8, %v3192_v8  ;;  %v3425_v58 = vsel %vm273_vm0, %v3373_v62, 0.0 }
 0x4a5   : > { %v3323_v37 = vadd.f32 %v3322_v17, %v3321_v49 }
 0x4a6   : > { %v3423_v38 = vsel %vm273_vm0, %v3372_v54, 0.0 }
 0x4a7   : > { %v3424_v41 = vadd.f32 %v3423_v38, %v3422_v55  ;;  %v3325_v5 = vadd.f32 %v3324_v21, %v3323_v37 }
 0x4a9   : > { %v3426_v42 = vadd.f32 %v3425_v58, %v3424_v41 }
 0x4b9   : > { %v3815_v11 = vpop.f32.mrf.mxu1 }
 0x4ba   : > { %3274 = vst.msk [vmem:[%s6208_s8 + $0xb8] sm:$0xff] %vm273_vm0, %v3815_v11  ;;  %v3375_v26 = vmul.f32 %v3815_v11, %v3815_v11  ;;  %v3328_v10 = vsel %vm273_vm0, %v3815_v11, 0.0 }
 0x4bb   : > { %v3202_v50 = vpop.f32.mrf.mxu1 }
 0x4bc   : > { %3273 = vst.msk [vmem:[%s6208_s8 + $0xb0] sm:$0xff] %vm273_vm0, %v3202_v50  ;;  %v3326_v18 = vsel %vm273_vm0, %v3202_v50, 0.0  ;;  %v3374_v53 = vmul.f32 %v3202_v50, %v3202_v50  ;;  %v3429_v20 = vsel %vm273_vm0, %v3375_v26, 0.0 }
 0x4bd   : > { %v3327_v19 = vadd.f32 %v3326_v18, %v3325_v5 }
 0x4be   : > { %v3427_v7 = vsel %vm273_vm0, %v3374_v53, 0.0 }
 0x4bf   : > { %v3428_v36 = vadd.f32 %v3427_v7, %v3426_v42  ;;  %v3329_v27 = vadd.f32 %v3328_v10, %v3327_v19 }
 0x4c1   : > { %v3430_v47 = vadd.f32 %v3429_v20, %v3428_v36 }
 0x4d1   : > { %v3818_v1 = vpop.f32.mrf.mxu1 }
 0x4d2   : > { %3276 = vst.msk [vmem:[%s6208_s8 + $0xc8] sm:$0xff] %vm273_vm0, %v3818_v1  ;;  %v3377_v35 = vmul.f32 %v3818_v1, %v3818_v1  ;;  %v3332_v34 = vsel %vm273_vm0, %v3818_v1, 0.0 }
 0x4d3   : > { %v3212_v59 = vpop.f32.mrf.mxu1 }
 0x4d4   : > { %3275 = vst.msk [vmem:[%s6208_s8 + $0xc0] sm:$0xff] %vm273_vm0, %v3212_v59  ;;  %v3376_v30 = vmul.f32 %v3212_v59, %v3212_v59  ;;  %v3330_v23 = vsel %vm273_vm0, %v3212_v59, 0.0  ;;  %v3433_v52 = vsel %vm273_vm0, %v3377_v35, 0.0 }
 0x4d5   : > { %v3331_v24 = vadd.f32 %v3330_v23, %v3329_v27 }
 0x4d6   : > { %v3431_v29 = vsel %vm273_vm0, %v3376_v30, 0.0 }
 0x4d7   : > { %v3432_v13 = vadd.f32 %v3431_v29, %v3430_v47  ;;  %v3333_v56 = vadd.f32 %v3332_v34, %v3331_v24 }
 0x4d9   : > { %v3434_v33 = vadd.f32 %v3433_v52, %v3432_v13 }
 0x4e9   : > { %v3821_v44 = vpop.f32.mrf.mxu1 }
 0x4ea   : > { %3278 = vst.msk [vmem:[%s6208_s8 + $0xd8] sm:$0xff] %vm273_vm0, %v3821_v44  ;;  %v3379_v6 = vmul.f32 %v3821_v44, %v3821_v44  ;;  %v3336_v48 = vsel %vm273_vm0, %v3821_v44, 0.0 }
 0x4eb   : > { %v3222_v25 = vpop.f32.mrf.mxu1 }
 0x4ec   : > { %3277 = vst.msk [vmem:[%s6208_s8 + $0xd0] sm:$0xff] %vm273_vm0, %v3222_v25  ;;  %v3378_v39 = vmul.f32 %v3222_v25, %v3222_v25  ;;  %v3334_v14 = vsel %vm273_vm0, %v3222_v25, 0.0  ;;  %v3437_v40 = vsel %vm273_vm0, %v3379_v6, 0.0 }
 0x4ed   : > { %v3335_v28 = vadd.f32 %v3334_v14, %v3333_v56 }
 0x4ee   : > { %v3435_v63 = vsel %vm273_vm0, %v3378_v39, 0.0 }
 0x4ef   : > { %v3436_v3 = vadd.f32 %v3435_v63, %v3434_v33  ;;  %v3337_v31 = vadd.f32 %v3336_v48, %v3335_v28 }
 0x4f1   : > { %v3438_v9 = vadd.f32 %v3437_v40, %v3436_v3 }
 0x501   : > { %v3824_v57 = vpop.f32.mrf.mxu1 }
 0x502   : > { %3280 = vst.msk [vmem:[%s6208_s8 + $0xe8] sm:$0xff] %vm273_vm0, %v3824_v57  ;;  %v3381_v60 = vmul.f32 %v3824_v57, %v3824_v57  ;;  %v3340_v0 = vsel %vm273_vm0, %v3824_v57, 0.0 }
 0x503   : > { %v3232_v32 = vpop.f32.mrf.mxu1 }
 0x504   : > { %3279 = vst.msk [vmem:[%s6208_s8 + $0xe0] sm:$0xff] %vm273_vm0, %v3232_v32  ;;  %v3380_v15 = vmul.f32 %v3232_v32, %v3232_v32  ;;  %v3338_v12 = vsel %vm273_vm0, %v3232_v32, 0.0  ;;  %v3441_v43 = vsel %vm273_vm0, %v3381_v60, 0.0 }
 0x505   : > { %v3339_v61 = vadd.f32 %v3338_v12, %v3337_v31 }
 0x506   : > { %v3439_v4 = vsel %vm273_vm0, %v3380_v15, 0.0 }
 0x507   : > { %v3440_v45 = vadd.f32 %v3439_v4, %v3438_v9  ;;  %v3341_v2 = vadd.f32 %v3340_v0, %v3339_v61 }
 0x509   : > { %v3442_v8 = vadd.f32 %v3441_v43, %v3440_v45 }
 0x50e   : > { %v3827_v51 = vpop.f32.mrf.mxu1 }
 0x50f   : > { %3282 = vst.msk [vmem:[%s6208_s8 + $0xf8] sm:$0xff] %vm273_vm0, %v3827_v51  ;;  %v3383_v49 = vmul.f32 %v3827_v51, %v3827_v51  ;;  %v3344_v62 = vsel %vm273_vm0, %v3827_v51, 0.0 }
 0x510   : > { %v3242_v22 = vpop.f32.mrf.mxu1 }
 0x511   : > { %3281 = vst.msk [vmem:[%s6208_s8 + $0xf0] sm:$0xff] %vm273_vm0, %v3242_v22  ;;  %v3342_v16 = vsel %vm273_vm0, %v3242_v22, 0.0  ;;  %v3382_v55 = vmul.f32 %v3242_v22, %v3242_v22  ;;  %v3445_v21 = vsel %vm273_vm0, %v3383_v49, 0.0 }
 0x512   : > { %v3343_v46 = vadd.f32 %v3342_v16, %v3341_v2 }
 0x513   : > { %v3443_v17 = vsel %vm273_vm0, %v3382_v55, 0.0 }
 0x514   : > { %v3345_v54 = vadd.f32 %v3344_v62, %v3343_v46  ;;  %v3444_v37 = vadd.f32 %v3443_v17, %v3442_v8 }
 0x516   : > { %v3346_v38 = vrot.slane %v3345_v54, 4  ;;  %v3446_v41 = vadd.f32 %v3445_v21, %v3444_v37 }
 0x518   : > { %v3347_v5 = vadd.f32 %v3346_v38, %v3345_v54  ;;  %v3447_v58 = vrot.slane %v3446_v41, 4 }
 0x51a   : > { %v3348_v42 = vrot.slane %v3347_v5, 2  ;;  %v3448_v11 = vadd.f32 %v3447_v58, %v3446_v41 }
 0x51c   : > { %v3349_v50 = vadd.f32 %v3348_v42, %v3347_v5  ;;  %v3449_v26 = vrot.slane %v3448_v11, 2 }
 0x51e   : > { %v3350_v18 = vrot.slane %v3349_v50, 1  ;;  %v3450_v53 = vadd.f32 %v3449_v26, %v3448_v11 }
 0x520   : > { %v3451_v19 = vrot.slane %v3450_v53, 1  ;;  %v3351_v10 = vadd.f32 %v3350_v18, %v3349_v50 }
 0x522   : > { %v3452_v7 = vadd.f32 %v3451_v19, %v3450_v53 }
 0x524   : > { %v3454_v36 = vsel %vm3453_vm14, %v3351_v10, %v3452_v7 }
 0x525   : > { %3456 = vst.msk [vmem:[%s198_s23] sm:$0x3] %vm3455_vm15, %v3454_v36 }
 0x526   : > { %3931 = shalt.err (!%p3928_p3)
}
 0x527   : > { %s3932_s14 = scalar_lea.hbm %s6436_s9, 32  ;;  %s3936_s7 = scalar_lea.hbm %s6475_s4, 64 }
 0x528   : > { %p3933_p4 = scmp.ne.s32.totalorder %s6436_s9, %s3932_s14  ;;  %p3937_p9 = scmp.lt.s32.totalorder %s6436_s9, %s6475_s4 }
 0x529   : > { %p3938_p10 = scmp.lt.s32.totalorder %s3936_s7, %s3932_s14 }
 0x52a   : > { %p3934_p7 = pnand %p3933_p4, %p4051_p5 }
 0x52b   : > { %p3939_p11 = por %p3938_p10, %p3937_p9 }
 0x52c   : > { %p3935_p8 = pneg %p3934_p7 }
 0x52e   : > { %p3940_p12 = pnand %p3939_p11, %p3935_p8 }
 0x530   : > { %3943 = shalt.err (!%p3940_p12)
}
 0x531   : > { %3828 = dma.vmem_to_hbm [thread:$0]  (%p4051_p5), %s3480_s29, 32, %s6436_s9, %s3463_s10  }
 0x532 PF: > { %p3834_p13 = scmp.ge.s32.totalorder %s3978_s18, 2  ;;  %s3499_s28 = sand.u32 1, %s3966_s15  }
 0x533   : > { %s3500_s22 = scalar_lea.sflag [#allocation5], %s3499_s28 }
 0x534   : > { %p3831_p0 = pnand %p3834_p13, %p4055_p6 }
 0x536   : > { %p3832_p1 = pneg %p3831_p0 }
 0x538   : > { %3961 = dma.done.wait (%p3832_p1), %s3500_s22, 32  }
 0x539   : > { %3963 = vsyncadd (%p3832_p1), %s3500_s22, 4294967264  ;;  %p15_p2 = scmp.ge.s32.totalorder %s4038_s21, 4   ;;  %s6560_s15 = smov %s3970_s16 }
 0x53a   : > { %s6561_s16 = smov %s3974_s17  ;;  %s6562_s17 = smov %s4049_s24 }
 0x53b   : > { %s6563_s18 = smov %s4038_s21  ;;  %17 = sbr.rel (!%p15_p2) target bundleno = 3 (0x3), region = 81 }
 0x540   :  { %3505 = vsyncpa [#allocation5], 1 }
 0x541   :  { %3507 = vsyncpa [#allocation5 + $0x1], 1 }

</bundles_post_ra>
